<compile_context>
chip_gen: v5e
topology: v5e:2x2
jax: 0.10.0
libtpu: 0.0.40
codegen_flags: <defaults>
</compile_context>

<pallas_src>
import functools

import jax
import jax.numpy as jnp
from jax.experimental import pallas as pl
from jax.experimental.pallas import tpu as pltpu


# --------------------------------------------------------------------------------------
# Kernel
# --------------------------------------------------------------------------------------
def _layernorm(x, g, b, eps=1e-5):
    mu = jnp.mean(x, axis=-1, keepdims=True)
    var = jnp.mean((x - mu) ** 2, axis=-1, keepdims=True)
    return (x - mu) * jax.lax.rsqrt(var + eps) * g + b


def fused_encoder_kernel(x_ref, mask_ref,
                         wqkv_ref, bqkv_ref, woh_ref, bo_ref,
                         g1_ref, be1_ref, w1_ref, b1_ref, w2_ref, b2_ref,
                         g2_ref, be2_ref, wout_ref,
                         o_ref, *, nhead, num_layers, out_dim):
    """All nn.TransformerEncoderLayer's (post-LN, ReLU FFN) + out Linear, fused."""
    nb, T, E = x_ref.shape
    hd = E // nhead
    M = nb * T
    scale = 1.0 / float(hd) ** 0.5
    cdt = jnp.bfloat16  # MXU operand dtype (f32 accumulation everywhere)

    x2 = x_ref[...].reshape(M, E)                                   # f32 activations
    # Hoisted ONCE (JAX does not CSE broadcast_in_dim).
    mask_b = jnp.broadcast_to(mask_ref[...][None, :, :], (nb, T, T))

    # TODO(synk): dropout layers are identity (eval-mode / inference semantics).
    for l in range(num_layers):                                     # static unroll
        # ---- fused QKV projection: one MXU pass with 3E output lanes ----
        qkv = jnp.dot(x2.astype(cdt), wqkv_ref[l],
                      preferred_element_type=jnp.float32) + bqkv_ref[l]   # (M, 3E)

        wo_l = woh_ref[l]                                           # (nhead, hd, E) bf16
        attn = jnp.zeros((M, E), jnp.float32)
        for h in range(nhead):                                      # static unroll
            qh = qkv[:, h * hd:(h + 1) * hd].reshape(nb, T, hd)
            kh = qkv[:, E + h * hd:E + (h + 1) * hd].reshape(nb, T, hd)
            vh = qkv[:, 2 * E + h * hd:2 * E + (h + 1) * hd].reshape(nb, T, hd)

            s = jnp.einsum('ntd,nsd->nts', qh.astype(cdt), kh.astype(cdt),
                           preferred_element_type=jnp.float32) * scale + mask_b
            m = jnp.max(s, axis=-1, keepdims=True)
            p = jnp.exp(s - m)
            p = p * pl.reciprocal(jnp.sum(p, axis=-1, keepdims=True), approx=True)

            ctx = jnp.einsum('nts,nsd->ntd', p.astype(cdt), vh.astype(cdt),
                             preferred_element_type=jnp.float32)    # (nb, T, hd)
            # Fold this head directly into the output projection (no lane concat).
            attn = attn + jnp.dot(ctx.reshape(M, hd).astype(cdt), wo_l[h],
                                  preferred_element_type=jnp.float32)
        attn = attn + bo_ref[l]

        # post-norm residual blocks (norm_first=False PyTorch default), f32 elementwise
        y = _layernorm(x2 + attn, g1_ref[l], be1_ref[l])
        ff = jnp.maximum(
            jnp.dot(y.astype(cdt), w1_ref[l],
                    preferred_element_type=jnp.float32) + b1_ref[l], 0.0)
        ff = jnp.dot(ff.astype(cdt), w2_ref[l],
                     preferred_element_type=jnp.float32) + b2_ref[l]
        x2 = _layernorm(y + ff, g2_ref[l], be2_ref[l])

    # ---- self.out = nn.Linear(E, out_dim, bias=False) ----
    if out_dim == 1:
        # VPU multiply + XLU lane reduction; lane-dense (nb, T) store instead of (nb,T,1).
        x3 = x2.reshape(nb, T, E)
        o_ref[...] = jnp.sum(x3 * wout_ref[...], axis=-1)
    else:
        o = jnp.dot(x2.astype(cdt), wout_ref[...],
                    preferred_element_type=jnp.float32)
        o_ref[...] = o.reshape(nb, T, out_dim)


# --------------------------------------------------------------------------------------
# pallas_call wrapper
# --------------------------------------------------------------------------------------
def _rep_spec(a):
    zeros = (0,) * a.ndim
    return pl.BlockSpec(a.shape, lambda i, _z=zeros: _z)


def _pick_batch_block(N, requested):
    """Batch tile size; must divide N and keep the (N, T) output block legal."""
    if requested is None:
        return N
    nb = min(int(requested), N)
    if nb >= 1 and N % nb == 0 and (nb == N or nb % 8 == 0):
        return nb
    return N


def _prep_kernel_params(params, nhead):
    """Host-side weight packing: bf16 MXU weights, per-head Wo row blocks, etc."""
    L, E, _ = params['wqkv_t'].shape
    hd = E // nhead
    out_dim = params['w_out_t'].shape[-1]
    bf = jnp.bfloat16
    if out_dim == 1:
        wout = params['w_out_t'].reshape(1, E)                      # f32 row (VPU path)
    else:
        wout = params['w_out_t'].astype(bf)
    return dict(
        wqkv=params['wqkv_t'].astype(bf),                           # (L, E, 3E)
        bqkv=params['bqkv'],                                        # (L, 1, 3E)
        wo_h=params['wo_t'].reshape(L, nhead, hd, E).astype(bf),    # (L, H, hd, E)
        bo=params['bo'],
        ln1_g=params['ln1_g'], ln1_b=params['ln1_b'],
        w1=params['w1_t'].astype(bf), b1=params['b1'],
        w2=params['w2_t'].astype(bf), b2=params['b2'],
        ln2_g=params['ln2_g'], ln2_b=params['ln2_b'],
        wout=wout,
    )


def masked_temporal_self_attention(att_in, params, mask, nhead, batch_block=None):
    """Returns (att_in, self.out(transformer_encoder(att_in, mask)).squeeze(-1))."""
    T, N, E = att_in.shape
    x = jnp.transpose(att_in, (1, 0, 2)).astype(jnp.float32)        # (N, T, E)
    kp = _prep_kernel_params(params, nhead)
    num_layers = params['wqkv_t'].shape[0]
    out_dim = params['w_out_t'].shape[-1]

    nb = _pick_batch_block(N, batch_block)
    grid = (N // nb,)

    weight_args = (mask, kp['wqkv'], kp['bqkv'], kp['wo_h'], kp['bo'],
                   kp['ln1_g'], kp['ln1_b'], kp['w1'], kp['b1'],
                   kp['w2'], kp['b2'], kp['ln2_g'], kp['ln2_b'], kp['wout'])

    in_specs = [pl.BlockSpec((nb, T, E), lambda i: (i, 0, 0))]
    in_specs += [_rep_spec(a) for a in weight_args]

    if out_dim == 1:
        out_shape = jax.ShapeDtypeStruct((N, T), jnp.float32)
        out_spec = pl.BlockSpec((nb, T), lambda i: (i, 0))
    else:
        out_shape = jax.ShapeDtypeStruct((N, T, out_dim), jnp.float32)
        out_spec = pl.BlockSpec((nb, T, out_dim), lambda i: (i, 0, 0))

    o = pl.pallas_call(
        functools.partial(fused_encoder_kernel, nhead=nhead,
                          num_layers=num_layers, out_dim=out_dim),
        out_shape=out_shape,
        grid=grid,
        in_specs=in_specs,
        out_specs=out_spec,
        compiler_params=pltpu.CompilerParams(
            dimension_semantics=("parallel",)),     # lets v7x shard batch across both TCs
    )(x, *weight_args)

    if out_dim == 1:
        out = jnp.transpose(o, (1, 0))              # (T, N) — matches torch .squeeze(-1)
    else:
        out = jnp.transpose(o, (1, 0, 2))
    return att_in, out


# --------------------------------------------------------------------------------------
# Module-level glue (mask construction, params)
# --------------------------------------------------------------------------------------
def build_mask(time_steps, attn_wnd):
    """masks = triu(-inf, 1) + triu(-inf, attn_wnd).T  (allow 0 <= i-j < attn_wnd).

    A large finite negative is used instead of -inf: exp() still underflows to exactly 0
    for masked entries, but fully-masked rows cannot produce NaN.
    """
    attn_wnd = attn_wnd if attn_wnd != -1 else time_steps
    neg = jnp.full((time_steps, time_steps), -1e30, dtype=jnp.float32)
    m1 = jnp.triu(neg, k=1)
    m2 = jnp.triu(neg, k=attn_wnd).T
    return m1 + m2


def init_params(key, E, dim_ff, out_dim, num_layers):
    """Per-layer weights stacked along a leading layer axis, pre-transposed to x @ W."""
    s = 0.1
    L = num_layers
    ks = jax.random.split(key, 5)
    return dict(
        wqkv_t=s * jax.random.normal(ks[0], (L, E, 3 * E), jnp.float32),
        bqkv=jnp.zeros((L, 1, 3 * E), jnp.float32),
        wo_t=s * jax.random.normal(ks[1], (L, E, E), jnp.float32),
        bo=jnp.zeros((L, 1, E), jnp.float32),
        ln1_g=jnp.ones((L, 1, E), jnp.float32),
        ln1_b=jnp.zeros((L, 1, E), jnp.float32),
        w1_t=s * jax.random.normal(ks[2], (L, E, dim_ff), jnp.float32),
        b1=jnp.zeros((L, 1, dim_ff), jnp.float32),
        w2_t=s * jax.random.normal(ks[3], (L, dim_ff, E), jnp.float32),
        b2=jnp.zeros((L, 1, E), jnp.float32),
        ln2_g=jnp.ones((L, 1, E), jnp.float32),
        ln2_b=jnp.zeros((L, 1, E), jnp.float32),
        w_out_t=s * jax.random.normal(ks[4], (E, out_dim), jnp.float32),
    )


# --------------------------------------------------------------------------------------
if __name__ == "__main__":
    hidden_dim = 16
    E = hidden_dim * 2      # d_model = 2 * hidden_dim = 32
    nhead = 4
    out_dim = 1
    num_layers = 2
    time_steps = 8
    attn_wnd = 3
    dim_ff = 2048           # PyTorch TransformerEncoderLayer default dim_feedforward
    n_pairs = 4             # batch of temporal node pairs

    key = jax.random.PRNGKey(0)
    k_x, k_p = jax.random.split(key)

    # TODO(synk): the SAGE GNN over DGL blocks is graph-data dependent; the kernel
    # consumes the stacked temporal pair embeddings (att_in) of shape (T, N, 2*hidden).
    att_in = jax.random.normal(k_x, (time_steps, n_pairs, E), jnp.float32)

    params = init_params(k_p, E, dim_ff, out_dim, num_layers)
    mask = build_mask(time_steps, attn_wnd)

    att_in_out, out = masked_temporal_self_attention(att_in, params, mask, nhead)
    jax.block_until_ready((att_in_out, out))

    assert att_in_out.shape == (time_steps, n_pairs, E)
    assert out.shape == (time_steps, n_pairs)
    assert bool(jnp.all(jnp.isfinite(out)))
    print("KERNEL_OK")
</pallas_src>

<mosaic_0001>
module attributes {stable_mosaic.version = 11 : i64} {
  func.func @fused_encoder_kernel(%arg0: i32, %arg1: memref<4x8x32xf32, #tpu.memory_space<vmem>>, %arg2: memref<8x8xf32, #tpu.memory_space<vmem>>, %arg3: memref<2x32x96xbf16, #tpu.memory_space<vmem>>, %arg4: memref<2x1x96xf32, #tpu.memory_space<vmem>>, %arg5: memref<2x4x8x32xbf16, #tpu.memory_space<vmem>>, %arg6: memref<2x1x32xf32, #tpu.memory_space<vmem>>, %arg7: memref<2x1x32xf32, #tpu.memory_space<vmem>>, %arg8: memref<2x1x32xf32, #tpu.memory_space<vmem>>, %arg9: memref<2x32x2048xbf16, #tpu.memory_space<vmem>>, %arg10: memref<2x1x2048xf32, #tpu.memory_space<vmem>>, %arg11: memref<2x2048x32xbf16, #tpu.memory_space<vmem>>, %arg12: memref<2x1x32xf32, #tpu.memory_space<vmem>>, %arg13: memref<2x1x32xf32, #tpu.memory_space<vmem>>, %arg14: memref<2x1x32xf32, #tpu.memory_space<vmem>>, %arg15: memref<1x32xf32, #tpu.memory_space<vmem>>, %arg16: memref<4x8xf32, #tpu.memory_space<vmem>>) attributes {dimension_semantics = [#tpu.dimension_semantics<parallel>], iteration_bounds = array<i64: 1>, scalar_prefetch = 0 : i64, scratch_operands = 0 : i64, tpu.core_type = #tpu.core_type<tc>, window_params = [{transform_indices = @transform_0, window_bounds = array<i64: 4, 8, 32>}, {pipeline_mode = #tpu.pipeline_mode<synchronous>, transform_indices = @transform_1, window_bounds = array<i64: 8, 8>}, {pipeline_mode = #tpu.pipeline_mode<synchronous>, transform_indices = @transform_2, window_bounds = array<i64: 2, 32, 96>}, {pipeline_mode = #tpu.pipeline_mode<synchronous>, transform_indices = @transform_3, window_bounds = array<i64: 2, 1, 96>}, {pipeline_mode = #tpu.pipeline_mode<synchronous>, transform_indices = @transform_4, window_bounds = array<i64: 2, 4, 8, 32>}, {pipeline_mode = #tpu.pipeline_mode<synchronous>, transform_indices = @transform_5, window_bounds = array<i64: 2, 1, 32>}, {pipeline_mode = #tpu.pipeline_mode<synchronous>, transform_indices = @transform_6, window_bounds = array<i64: 2, 1, 32>}, {pipeline_mode = #tpu.pipeline_mode<synchronous>, transform_indices = @transform_7, window_bounds = array<i64: 2, 1, 32>}, {pipeline_mode = #tpu.pipeline_mode<synchronous>, transform_indices = @transform_8, window_bounds = array<i64: 2, 32, 2048>}, {pipeline_mode = #tpu.pipeline_mode<synchronous>, transform_indices = @transform_9, window_bounds = array<i64: 2, 1, 2048>}, {pipeline_mode = #tpu.pipeline_mode<synchronous>, transform_indices = @transform_10, window_bounds = array<i64: 2, 2048, 32>}, {pipeline_mode = #tpu.pipeline_mode<synchronous>, transform_indices = @transform_11, window_bounds = array<i64: 2, 1, 32>}, {pipeline_mode = #tpu.pipeline_mode<synchronous>, transform_indices = @transform_12, window_bounds = array<i64: 2, 1, 32>}, {pipeline_mode = #tpu.pipeline_mode<synchronous>, transform_indices = @transform_13, window_bounds = array<i64: 2, 1, 32>}, {pipeline_mode = #tpu.pipeline_mode<synchronous>, transform_indices = @transform_14, window_bounds = array<i64: 1, 32>}, {transform_indices = @transform_15, window_bounds = array<i64: 4, 8>}]} {
    %c0 = arith.constant 0 : index
    %c0_0 = arith.constant 0 : index
    %c0_1 = arith.constant 0 : index
    %0 = vector.load %arg1[%c0, %c0_0, %c0_1] : memref<4x8x32xf32, #tpu.memory_space<vmem>>, vector<4x8x32xf32>
    %1 = vector.shape_cast %0 : vector<4x8x32xf32> to vector<32x32xf32>
    %c0_2 = arith.constant 0 : index
    %c0_3 = arith.constant 0 : index
    %2 = vector.load %arg2[%c0_2, %c0_3] : memref<8x8xf32, #tpu.memory_space<vmem>>, vector<8x8xf32>
    %3 = vector.shape_cast %2 : vector<8x8xf32> to vector<1x8x8xf32>
    %4 = vector.shape_cast %3 : vector<1x8x8xf32> to vector<1x8x8xf32>
    %5 = vector.broadcast %4 : vector<1x8x8xf32> to vector<4x8x8xf32>
    %6 = arith.truncf %1 : vector<32x32xf32> to vector<32x32xbf16>
    %c0_4 = arith.constant 0 : index
    %c0_5 = arith.constant 0 : index
    %c0_6 = arith.constant 0 : index
    %7 = vector.load %arg3[%c0_4, %c0_5, %c0_6] : memref<2x32x96xbf16, #tpu.memory_space<vmem>>, vector<1x32x96xbf16>
    %8 = vector.shape_cast %7 : vector<1x32x96xbf16> to vector<32x96xbf16>
    %cst = arith.constant dense<0.000000e+00> : vector<32x96xf32>
    %9 = tpu.matmul %6, %8, %cst {dimension_numbers = #tpu.dot_dimension_numbers<[1], [0], [0], [1], [0, 0, 1, 1], [], []>} : vector<32x32xbf16>, vector<32x96xbf16>, vector<32x96xf32> -> vector<32x96xf32>
    %c0_7 = arith.constant 0 : index
    %c0_8 = arith.constant 0 : index
    %c0_9 = arith.constant 0 : index
    %10 = vector.load %arg4[%c0_7, %c0_8, %c0_9] : memref<2x1x96xf32, #tpu.memory_space<vmem>>, vector<1x1x96xf32>
    %11 = vector.shape_cast %10 : vector<1x1x96xf32> to vector<1x96xf32>
    %12 = vector.broadcast %11 : vector<1x96xf32> to vector<32x96xf32>
    %13 = arith.addf %9, %12 : vector<32x96xf32>
    %c0_10 = arith.constant 0 : index
    %c0_11 = arith.constant 0 : index
    %c0_12 = arith.constant 0 : index
    %c0_13 = arith.constant 0 : index
    %14 = vector.load %arg5[%c0_10, %c0_11, %c0_12, %c0_13] : memref<2x4x8x32xbf16, #tpu.memory_space<vmem>>, vector<1x4x8x32xbf16>
    %15 = vector.shape_cast %14 : vector<1x4x8x32xbf16> to vector<4x8x32xbf16>
    %cst_14 = arith.constant 0.000000e+00 : f32
    %16 = vector.broadcast %cst_14 : f32 to vector<32x32xf32>
    %17 = vector.extract_strided_slice %13 {offsets = [0, 0], sizes = [32, 8], strides = [1, 1]} : vector<32x96xf32> to vector<32x8xf32>
    %18 = vector.shape_cast %17 : vector<32x8xf32> to vector<4x8x8xf32>
    %19 = vector.extract_strided_slice %13 {offsets = [0, 32], sizes = [32, 8], strides = [1, 1]} : vector<32x96xf32> to vector<32x8xf32>
    %20 = vector.shape_cast %19 : vector<32x8xf32> to vector<4x8x8xf32>
    %21 = vector.extract_strided_slice %13 {offsets = [0, 64], sizes = [32, 8], strides = [1, 1]} : vector<32x96xf32> to vector<32x8xf32>
    %22 = vector.shape_cast %21 : vector<32x8xf32> to vector<4x8x8xf32>
    %23 = arith.truncf %18 : vector<4x8x8xf32> to vector<4x8x8xbf16>
    %24 = arith.truncf %20 : vector<4x8x8xf32> to vector<4x8x8xbf16>
    "tpu.trace_start"() <{level = 10 : i32, message = "ntd,nsd->nts"}> : () -> ()
    %cst_15 = arith.constant dense<0.000000e+00> : vector<4x8x8xf32>
    %25 = tpu.matmul %23, %24, %cst_15 {dimension_numbers = #tpu.dot_dimension_numbers<[2], [2], [1], [1], [0, 0, 0, 1, 1, 1], [0], [0]>} : vector<4x8x8xbf16>, vector<4x8x8xbf16>, vector<4x8x8xf32> -> vector<4x8x8xf32>
    "tpu.trace_stop"() : () -> ()
    %cst_16 = arith.constant 0.353553385 : f32
    %26 = vector.broadcast %cst_16 : f32 to vector<4x8x8xf32>
    %27 = arith.mulf %25, %26 : vector<4x8x8xf32>
    %28 = arith.addf %27, %5 : vector<4x8x8xf32>
    %cst_17 = arith.constant dense<0xFF800000> : vector<4x8xf32>
    %29 = vector.multi_reduction <maximumf>, %28, %cst_17 [2] : vector<4x8x8xf32> to vector<4x8xf32>
    %30 = vector.shape_cast %29 : vector<4x8xf32> to vector<4x8x1xf32>
    %31 = vector.broadcast %30 : vector<4x8x1xf32> to vector<4x8x8xf32>
    %32 = arith.subf %28, %31 : vector<4x8x8xf32>
    %33 = math.exp %32 : vector<4x8x8xf32>
    %cst_18 = arith.constant dense<0.000000e+00> : vector<4x8xf32>
    %34 = vector.multi_reduction <add>, %33, %cst_18 [2] : vector<4x8x8xf32> to vector<4x8xf32>
    %35 = vector.shape_cast %34 : vector<4x8xf32> to vector<4x8x1xf32>
    %36 = tpu.reciprocal %35 {approx = true} : vector<4x8x1xf32> -> vector<4x8x1xf32>
    %37 = vector.broadcast %36 : vector<4x8x1xf32> to vector<4x8x8xf32>
    %38 = arith.mulf %33, %37 : vector<4x8x8xf32>
    %39 = arith.truncf %38 : vector<4x8x8xf32> to vector<4x8x8xbf16>
    %40 = arith.truncf %22 : vector<4x8x8xf32> to vector<4x8x8xbf16>
    "tpu.trace_start"() <{level = 10 : i32, message = "nts,nsd->ntd"}> : () -> ()
    %cst_19 = arith.constant dense<0.000000e+00> : vector<4x8x8xf32>
    %41 = tpu.matmul %39, %40, %cst_19 {dimension_numbers = #tpu.dot_dimension_numbers<[2], [1], [1], [2], [0, 0, 0, 1, 1, 2], [0], [0]>} : vector<4x8x8xbf16>, vector<4x8x8xbf16>, vector<4x8x8xf32> -> vector<4x8x8xf32>
    "tpu.trace_stop"() : () -> ()
    %42 = vector.shape_cast %41 : vector<4x8x8xf32> to vector<32x8xf32>
    %43 = arith.truncf %42 : vector<32x8xf32> to vector<32x8xbf16>
    %44 = vector.extract_strided_slice %15 {offsets = [0, 0, 0], sizes = [1, 8, 32], strides = [1, 1, 1]} : vector<4x8x32xbf16> to vector<1x8x32xbf16>
    %45 = vector.shape_cast %44 : vector<1x8x32xbf16> to vector<8x32xbf16>
    %cst_20 = arith.constant dense<0.000000e+00> : vector<32x32xf32>
    %46 = tpu.matmul %43, %45, %cst_20 {dimension_numbers = #tpu.dot_dimension_numbers<[1], [0], [0], [1], [0, 0, 1, 1], [], []>} : vector<32x8xbf16>, vector<8x32xbf16>, vector<32x32xf32> -> vector<32x32xf32>
    %47 = arith.addf %16, %46 : vector<32x32xf32>
    %48 = vector.extract_strided_slice %13 {offsets = [0, 8], sizes = [32, 8], strides = [1, 1]} : vector<32x96xf32> to vector<32x8xf32>
    %49 = vector.shape_cast %48 : vector<32x8xf32> to vector<4x8x8xf32>
    %50 = vector.extract_strided_slice %13 {offsets = [0, 40], sizes = [32, 8], strides = [1, 1]} : vector<32x96xf32> to vector<32x8xf32>
    %51 = vector.shape_cast %50 : vector<32x8xf32> to vector<4x8x8xf32>
    %52 = vector.extract_strided_slice %13 {offsets = [0, 72], sizes = [32, 8], strides = [1, 1]} : vector<32x96xf32> to vector<32x8xf32>
    %53 = vector.shape_cast %52 : vector<32x8xf32> to vector<4x8x8xf32>
    %54 = arith.truncf %49 : vector<4x8x8xf32> to vector<4x8x8xbf16>
    %55 = arith.truncf %51 : vector<4x8x8xf32> to vector<4x8x8xbf16>
    "tpu.trace_start"() <{level = 10 : i32, message = "ntd,nsd->nts"}> : () -> ()
    %cst_21 = arith.constant dense<0.000000e+00> : vector<4x8x8xf32>
    %56 = tpu.matmul %54, %55, %cst_21 {dimension_numbers = #tpu.dot_dimension_numbers<[2], [2], [1], [1], [0, 0, 0, 1, 1, 1], [0], [0]>} : vector<4x8x8xbf16>, vector<4x8x8xbf16>, vector<4x8x8xf32> -> vector<4x8x8xf32>
    "tpu.trace_stop"() : () -> ()
    %cst_22 = arith.constant 0.353553385 : f32
    %57 = vector.broadcast %cst_22 : f32 to vector<4x8x8xf32>
    %58 = arith.mulf %56, %57 : vector<4x8x8xf32>
    %59 = arith.addf %58, %5 : vector<4x8x8xf32>
    %cst_23 = arith.constant dense<0xFF800000> : vector<4x8xf32>
    %60 = vector.multi_reduction <maximumf>, %59, %cst_23 [2] : vector<4x8x8xf32> to vector<4x8xf32>
    %61 = vector.shape_cast %60 : vector<4x8xf32> to vector<4x8x1xf32>
    %62 = vector.broadcast %61 : vector<4x8x1xf32> to vector<4x8x8xf32>
    %63 = arith.subf %59, %62 : vector<4x8x8xf32>
    %64 = math.exp %63 : vector<4x8x8xf32>
    %cst_24 = arith.constant dense<0.000000e+00> : vector<4x8xf32>
    %65 = vector.multi_reduction <add>, %64, %cst_24 [2] : vector<4x8x8xf32> to vector<4x8xf32>
    %66 = vector.shape_cast %65 : vector<4x8xf32> to vector<4x8x1xf32>
    %67 = tpu.reciprocal %66 {approx = true} : vector<4x8x1xf32> -> vector<4x8x1xf32>
    %68 = vector.broadcast %67 : vector<4x8x1xf32> to vector<4x8x8xf32>
    %69 = arith.mulf %64, %68 : vector<4x8x8xf32>
    %70 = arith.truncf %69 : vector<4x8x8xf32> to vector<4x8x8xbf16>
    %71 = arith.truncf %53 : vector<4x8x8xf32> to vector<4x8x8xbf16>
    "tpu.trace_start"() <{level = 10 : i32, message = "nts,nsd->ntd"}> : () -> ()
    %cst_25 = arith.constant dense<0.000000e+00> : vector<4x8x8xf32>
    %72 = tpu.matmul %70, %71, %cst_25 {dimension_numbers = #tpu.dot_dimension_numbers<[2], [1], [1], [2], [0, 0, 0, 1, 1, 2], [0], [0]>} : vector<4x8x8xbf16>, vector<4x8x8xbf16>, vector<4x8x8xf32> -> vector<4x8x8xf32>
    "tpu.trace_stop"() : () -> ()
    %73 = vector.shape_cast %72 : vector<4x8x8xf32> to vector<32x8xf32>
    %74 = arith.truncf %73 : vector<32x8xf32> to vector<32x8xbf16>
    %75 = vector.extract_strided_slice %15 {offsets = [1, 0, 0], sizes = [1, 8, 32], strides = [1, 1, 1]} : vector<4x8x32xbf16> to vector<1x8x32xbf16>
    %76 = vector.shape_cast %75 : vector<1x8x32xbf16> to vector<8x32xbf16>
    %cst_26 = arith.constant dense<0.000000e+00> : vector<32x32xf32>
    %77 = tpu.matmul %74, %76, %cst_26 {dimension_numbers = #tpu.dot_dimension_numbers<[1], [0], [0], [1], [0, 0, 1, 1], [], []>} : vector<32x8xbf16>, vector<8x32xbf16>, vector<32x32xf32> -> vector<32x32xf32>
    %78 = arith.addf %47, %77 : vector<32x32xf32>
    %79 = vector.extract_strided_slice %13 {offsets = [0, 16], sizes = [32, 8], strides = [1, 1]} : vector<32x96xf32> to vector<32x8xf32>
    %80 = vector.shape_cast %79 : vector<32x8xf32> to vector<4x8x8xf32>
    %81 = vector.extract_strided_slice %13 {offsets = [0, 48], sizes = [32, 8], strides = [1, 1]} : vector<32x96xf32> to vector<32x8xf32>
    %82 = vector.shape_cast %81 : vector<32x8xf32> to vector<4x8x8xf32>
    %83 = vector.extract_strided_slice %13 {offsets = [0, 80], sizes = [32, 8], strides = [1, 1]} : vector<32x96xf32> to vector<32x8xf32>
    %84 = vector.shape_cast %83 : vector<32x8xf32> to vector<4x8x8xf32>
    %85 = arith.truncf %80 : vector<4x8x8xf32> to vector<4x8x8xbf16>
    %86 = arith.truncf %82 : vector<4x8x8xf32> to vector<4x8x8xbf16>
    "tpu.trace_start"() <{level = 10 : i32, message = "ntd,nsd->nts"}> : () -> ()
    %cst_27 = arith.constant dense<0.000000e+00> : vector<4x8x8xf32>
    %87 = tpu.matmul %85, %86, %cst_27 {dimension_numbers = #tpu.dot_dimension_numbers<[2], [2], [1], [1], [0, 0, 0, 1, 1, 1], [0], [0]>} : vector<4x8x8xbf16>, vector<4x8x8xbf16>, vector<4x8x8xf32> -> vector<4x8x8xf32>
    "tpu.trace_stop"() : () -> ()
    %cst_28 = arith.constant 0.353553385 : f32
    %88 = vector.broadcast %cst_28 : f32 to vector<4x8x8xf32>
    %89 = arith.mulf %87, %88 : vector<4x8x8xf32>
    %90 = arith.addf %89, %5 : vector<4x8x8xf32>
    %cst_29 = arith.constant dense<0xFF800000> : vector<4x8xf32>
    %91 = vector.multi_reduction <maximumf>, %90, %cst_29 [2] : vector<4x8x8xf32> to vector<4x8xf32>
    %92 = vector.shape_cast %91 : vector<4x8xf32> to vector<4x8x1xf32>
    %93 = vector.broadcast %92 : vector<4x8x1xf32> to vector<4x8x8xf32>
    %94 = arith.subf %90, %93 : vector<4x8x8xf32>
    %95 = math.exp %94 : vector<4x8x8xf32>
    %cst_30 = arith.constant dense<0.000000e+00> : vector<4x8xf32>
    %96 = vector.multi_reduction <add>, %95, %cst_30 [2] : vector<4x8x8xf32> to vector<4x8xf32>
    %97 = vector.shape_cast %96 : vector<4x8xf32> to vector<4x8x1xf32>
    %98 = tpu.reciprocal %97 {approx = true} : vector<4x8x1xf32> -> vector<4x8x1xf32>
    %99 = vector.broadcast %98 : vector<4x8x1xf32> to vector<4x8x8xf32>
    %100 = arith.mulf %95, %99 : vector<4x8x8xf32>
    %101 = arith.truncf %100 : vector<4x8x8xf32> to vector<4x8x8xbf16>
    %102 = arith.truncf %84 : vector<4x8x8xf32> to vector<4x8x8xbf16>
    "tpu.trace_start"() <{level = 10 : i32, message = "nts,nsd->ntd"}> : () -> ()
    %cst_31 = arith.constant dense<0.000000e+00> : vector<4x8x8xf32>
    %103 = tpu.matmul %101, %102, %cst_31 {dimension_numbers = #tpu.dot_dimension_numbers<[2], [1], [1], [2], [0, 0, 0, 1, 1, 2], [0], [0]>} : vector<4x8x8xbf16>, vector<4x8x8xbf16>, vector<4x8x8xf32> -> vector<4x8x8xf32>
    "tpu.trace_stop"() : () -> ()
    %104 = vector.shape_cast %103 : vector<4x8x8xf32> to vector<32x8xf32>
    %105 = arith.truncf %104 : vector<32x8xf32> to vector<32x8xbf16>
    %106 = vector.extract_strided_slice %15 {offsets = [2, 0, 0], sizes = [1, 8, 32], strides = [1, 1, 1]} : vector<4x8x32xbf16> to vector<1x8x32xbf16>
    %107 = vector.shape_cast %106 : vector<1x8x32xbf16> to vector<8x32xbf16>
    %cst_32 = arith.constant dense<0.000000e+00> : vector<32x32xf32>
    %108 = tpu.matmul %105, %107, %cst_32 {dimension_numbers = #tpu.dot_dimension_numbers<[1], [0], [0], [1], [0, 0, 1, 1], [], []>} : vector<32x8xbf16>, vector<8x32xbf16>, vector<32x32xf32> -> vector<32x32xf32>
    %109 = arith.addf %78, %108 : vector<32x32xf32>
    %110 = vector.extract_strided_slice %13 {offsets = [0, 24], sizes = [32, 8], strides = [1, 1]} : vector<32x96xf32> to vector<32x8xf32>
    %111 = vector.shape_cast %110 : vector<32x8xf32> to vector<4x8x8xf32>
    %112 = vector.extract_strided_slice %13 {offsets = [0, 56], sizes = [32, 8], strides = [1, 1]} : vector<32x96xf32> to vector<32x8xf32>
    %113 = vector.shape_cast %112 : vector<32x8xf32> to vector<4x8x8xf32>
    %114 = vector.extract_strided_slice %13 {offsets = [0, 88], sizes = [32, 8], strides = [1, 1]} : vector<32x96xf32> to vector<32x8xf32>
    %115 = vector.shape_cast %114 : vector<32x8xf32> to vector<4x8x8xf32>
    %116 = arith.truncf %111 : vector<4x8x8xf32> to vector<4x8x8xbf16>
    %117 = arith.truncf %113 : vector<4x8x8xf32> to vector<4x8x8xbf16>
    "tpu.trace_start"() <{level = 10 : i32, message = "ntd,nsd->nts"}> : () -> ()
    %cst_33 = arith.constant dense<0.000000e+00> : vector<4x8x8xf32>
    %118 = tpu.matmul %116, %117, %cst_33 {dimension_numbers = #tpu.dot_dimension_numbers<[2], [2], [1], [1], [0, 0, 0, 1, 1, 1], [0], [0]>} : vector<4x8x8xbf16>, vector<4x8x8xbf16>, vector<4x8x8xf32> -> vector<4x8x8xf32>
    "tpu.trace_stop"() : () -> ()
    %cst_34 = arith.constant 0.353553385 : f32
    %119 = vector.broadcast %cst_34 : f32 to vector<4x8x8xf32>
    %120 = arith.mulf %118, %119 : vector<4x8x8xf32>
    %121 = arith.addf %120, %5 : vector<4x8x8xf32>
    %cst_35 = arith.constant dense<0xFF800000> : vector<4x8xf32>
    %122 = vector.multi_reduction <maximumf>, %121, %cst_35 [2] : vector<4x8x8xf32> to vector<4x8xf32>
    %123 = vector.shape_cast %122 : vector<4x8xf32> to vector<4x8x1xf32>
    %124 = vector.broadcast %123 : vector<4x8x1xf32> to vector<4x8x8xf32>
    %125 = arith.subf %121, %124 : vector<4x8x8xf32>
    %126 = math.exp %125 : vector<4x8x8xf32>
    %cst_36 = arith.constant dense<0.000000e+00> : vector<4x8xf32>
    %127 = vector.multi_reduction <add>, %126, %cst_36 [2] : vector<4x8x8xf32> to vector<4x8xf32>
    %128 = vector.shape_cast %127 : vector<4x8xf32> to vector<4x8x1xf32>
    %129 = tpu.reciprocal %128 {approx = true} : vector<4x8x1xf32> -> vector<4x8x1xf32>
    %130 = vector.broadcast %129 : vector<4x8x1xf32> to vector<4x8x8xf32>
    %131 = arith.mulf %126, %130 : vector<4x8x8xf32>
    %132 = arith.truncf %131 : vector<4x8x8xf32> to vector<4x8x8xbf16>
    %133 = arith.truncf %115 : vector<4x8x8xf32> to vector<4x8x8xbf16>
    "tpu.trace_start"() <{level = 10 : i32, message = "nts,nsd->ntd"}> : () -> ()
    %cst_37 = arith.constant dense<0.000000e+00> : vector<4x8x8xf32>
    %134 = tpu.matmul %132, %133, %cst_37 {dimension_numbers = #tpu.dot_dimension_numbers<[2], [1], [1], [2], [0, 0, 0, 1, 1, 2], [0], [0]>} : vector<4x8x8xbf16>, vector<4x8x8xbf16>, vector<4x8x8xf32> -> vector<4x8x8xf32>
    "tpu.trace_stop"() : () -> ()
    %135 = vector.shape_cast %134 : vector<4x8x8xf32> to vector<32x8xf32>
    %136 = arith.truncf %135 : vector<32x8xf32> to vector<32x8xbf16>
    %137 = vector.extract_strided_slice %15 {offsets = [3, 0, 0], sizes = [1, 8, 32], strides = [1, 1, 1]} : vector<4x8x32xbf16> to vector<1x8x32xbf16>
    %138 = vector.shape_cast %137 : vector<1x8x32xbf16> to vector<8x32xbf16>
    %cst_38 = arith.constant dense<0.000000e+00> : vector<32x32xf32>
    %139 = tpu.matmul %136, %138, %cst_38 {dimension_numbers = #tpu.dot_dimension_numbers<[1], [0], [0], [1], [0, 0, 1, 1], [], []>} : vector<32x8xbf16>, vector<8x32xbf16>, vector<32x32xf32> -> vector<32x32xf32>
    %140 = arith.addf %109, %139 : vector<32x32xf32>
    %c0_39 = arith.constant 0 : index
    %c0_40 = arith.constant 0 : index
    %c0_41 = arith.constant 0 : index
    %141 = vector.load %arg6[%c0_39, %c0_40, %c0_41] : memref<2x1x32xf32, #tpu.memory_space<vmem>>, vector<1x1x32xf32>
    %142 = vector.shape_cast %141 : vector<1x1x32xf32> to vector<1x32xf32>
    %143 = vector.broadcast %142 : vector<1x32xf32> to vector<32x32xf32>
    %144 = arith.addf %140, %143 : vector<32x32xf32>
    %145 = arith.addf %1, %144 : vector<32x32xf32>
    %c0_42 = arith.constant 0 : index
    %c0_43 = arith.constant 0 : index
    %c0_44 = arith.constant 0 : index
    %146 = vector.load %arg7[%c0_42, %c0_43, %c0_44] : memref<2x1x32xf32, #tpu.memory_space<vmem>>, vector<1x1x32xf32>
    %147 = vector.shape_cast %146 : vector<1x1x32xf32> to vector<1x32xf32>
    %c0_45 = arith.constant 0 : index
    %c0_46 = arith.constant 0 : index
    %c0_47 = arith.constant 0 : index
    %148 = vector.load %arg8[%c0_45, %c0_46, %c0_47] : memref<2x1x32xf32, #tpu.memory_space<vmem>>, vector<1x1x32xf32>
    %149 = vector.shape_cast %148 : vector<1x1x32xf32> to vector<1x32xf32>
    %cst_48 = arith.constant dense<0.000000e+00> : vector<32xf32>
    %150 = vector.multi_reduction <add>, %145, %cst_48 [1] : vector<32x32xf32> to vector<32xf32>
    %151 = vector.shape_cast %150 : vector<32xf32> to vector<32x1xf32>
    %cst_49 = arith.constant 3.200000e+01 : f32
    %152 = vector.broadcast %cst_49 : f32 to vector<32x1xf32>
    %153 = arith.divf %151, %152 : vector<32x1xf32>
    %154 = vector.broadcast %153 : vector<32x1xf32> to vector<32x32xf32>
    %155 = arith.subf %145, %154 : vector<32x32xf32>
    %156 = arith.mulf %155, %155 : vector<32x32xf32>
    %cst_50 = arith.constant dense<0.000000e+00> : vector<32xf32>
    %157 = vector.multi_reduction <add>, %156, %cst_50 [1] : vector<32x32xf32> to vector<32xf32>
    %158 = vector.shape_cast %157 : vector<32xf32> to vector<32x1xf32>
    %cst_51 = arith.constant 3.200000e+01 : f32
    %159 = vector.broadcast %cst_51 : f32 to vector<32x1xf32>
    %160 = arith.divf %158, %159 : vector<32x1xf32>
    %161 = vector.broadcast %153 : vector<32x1xf32> to vector<32x32xf32>
    %162 = arith.subf %145, %161 : vector<32x32xf32>
    %cst_52 = arith.constant 9.99999974E-6 : f32
    %163 = vector.broadcast %cst_52 : f32 to vector<32x1xf32>
    %164 = arith.addf %160, %163 : vector<32x1xf32>
    %165 = math.rsqrt %164 : vector<32x1xf32>
    %166 = vector.broadcast %165 : vector<32x1xf32> to vector<32x32xf32>
    %167 = arith.mulf %162, %166 : vector<32x32xf32>
    %168 = vector.broadcast %147 : vector<1x32xf32> to vector<32x32xf32>
    %169 = arith.mulf %167, %168 : vector<32x32xf32>
    %170 = vector.broadcast %149 : vector<1x32xf32> to vector<32x32xf32>
    %171 = arith.addf %169, %170 : vector<32x32xf32>
    %172 = arith.truncf %171 : vector<32x32xf32> to vector<32x32xbf16>
    %c0_53 = arith.constant 0 : index
    %c0_54 = arith.constant 0 : index
    %c0_55 = arith.constant 0 : index
    %173 = vector.load %arg9[%c0_53, %c0_54, %c0_55] : memref<2x32x2048xbf16, #tpu.memory_space<vmem>>, vector<1x32x2048xbf16>
    %174 = vector.shape_cast %173 : vector<1x32x2048xbf16> to vector<32x2048xbf16>
    %cst_56 = arith.constant dense<0.000000e+00> : vector<32x2048xf32>
    %175 = tpu.matmul %172, %174, %cst_56 {dimension_numbers = #tpu.dot_dimension_numbers<[1], [0], [0], [1], [0, 0, 1, 1], [], []>} : vector<32x32xbf16>, vector<32x2048xbf16>, vector<32x2048xf32> -> vector<32x2048xf32>
    %c0_57 = arith.constant 0 : index
    %c0_58 = arith.constant 0 : index
    %c0_59 = arith.constant 0 : index
    %176 = vector.load %arg10[%c0_57, %c0_58, %c0_59] : memref<2x1x2048xf32, #tpu.memory_space<vmem>>, vector<1x1x2048xf32>
    %177 = vector.shape_cast %176 : vector<1x1x2048xf32> to vector<1x2048xf32>
    %178 = vector.broadcast %177 : vector<1x2048xf32> to vector<32x2048xf32>
    %179 = arith.addf %175, %178 : vector<32x2048xf32>
    %cst_60 = arith.constant 0.000000e+00 : f32
    %180 = vector.broadcast %cst_60 : f32 to vector<32x2048xf32>
    %181 = arith.maximumf %179, %180 : vector<32x2048xf32>
    %182 = arith.truncf %181 : vector<32x2048xf32> to vector<32x2048xbf16>
    %c0_61 = arith.constant 0 : index
    %c0_62 = arith.constant 0 : index
    %c0_63 = arith.constant 0 : index
    %183 = vector.load %arg11[%c0_61, %c0_62, %c0_63] : memref<2x2048x32xbf16, #tpu.memory_space<vmem>>, vector<1x2048x32xbf16>
    %184 = vector.shape_cast %183 : vector<1x2048x32xbf16> to vector<2048x32xbf16>
    %cst_64 = arith.constant dense<0.000000e+00> : vector<32x32xf32>
    %185 = tpu.matmul %182, %184, %cst_64 {dimension_numbers = #tpu.dot_dimension_numbers<[1], [0], [0], [1], [0, 0, 1, 1], [], []>} : vector<32x2048xbf16>, vector<2048x32xbf16>, vector<32x32xf32> -> vector<32x32xf32>
    %c0_65 = arith.constant 0 : index
    %c0_66 = arith.constant 0 : index
    %c0_67 = arith.constant 0 : index
    %186 = vector.load %arg12[%c0_65, %c0_66, %c0_67] : memref<2x1x32xf32, #tpu.memory_space<vmem>>, vector<1x1x32xf32>
    %187 = vector.shape_cast %186 : vector<1x1x32xf32> to vector<1x32xf32>
    %188 = vector.broadcast %187 : vector<1x32xf32> to vector<32x32xf32>
    %189 = arith.addf %185, %188 : vector<32x32xf32>
    %190 = arith.addf %171, %189 : vector<32x32xf32>
    %c0_68 = arith.constant 0 : index
    %c0_69 = arith.constant 0 : index
    %c0_70 = arith.constant 0 : index
    %191 = vector.load %arg13[%c0_68, %c0_69, %c0_70] : memref<2x1x32xf32, #tpu.memory_space<vmem>>, vector<1x1x32xf32>
    %192 = vector.shape_cast %191 : vector<1x1x32xf32> to vector<1x32xf32>
    %c0_71 = arith.constant 0 : index
    %c0_72 = arith.constant 0 : index
    %c0_73 = arith.constant 0 : index
    %193 = vector.load %arg14[%c0_71, %c0_72, %c0_73] : memref<2x1x32xf32, #tpu.memory_space<vmem>>, vector<1x1x32xf32>
    %194 = vector.shape_cast %193 : vector<1x1x32xf32> to vector<1x32xf32>
    %cst_74 = arith.constant dense<0.000000e+00> : vector<32xf32>
    %195 = vector.multi_reduction <add>, %190, %cst_74 [1] : vector<32x32xf32> to vector<32xf32>
    %196 = vector.shape_cast %195 : vector<32xf32> to vector<32x1xf32>
    %cst_75 = arith.constant 3.200000e+01 : f32
    %197 = vector.broadcast %cst_75 : f32 to vector<32x1xf32>
    %198 = arith.divf %196, %197 : vector<32x1xf32>
    %199 = vector.broadcast %198 : vector<32x1xf32> to vector<32x32xf32>
    %200 = arith.subf %190, %199 : vector<32x32xf32>
    %201 = arith.mulf %200, %200 : vector<32x32xf32>
    %cst_76 = arith.constant dense<0.000000e+00> : vector<32xf32>
    %202 = vector.multi_reduction <add>, %201, %cst_76 [1] : vector<32x32xf32> to vector<32xf32>
    %203 = vector.shape_cast %202 : vector<32xf32> to vector<32x1xf32>
    %cst_77 = arith.constant 3.200000e+01 : f32
    %204 = vector.broadcast %cst_77 : f32 to vector<32x1xf32>
    %205 = arith.divf %203, %204 : vector<32x1xf32>
    %206 = vector.broadcast %198 : vector<32x1xf32> to vector<32x32xf32>
    %207 = arith.subf %190, %206 : vector<32x32xf32>
    %cst_78 = arith.constant 9.99999974E-6 : f32
    %208 = vector.broadcast %cst_78 : f32 to vector<32x1xf32>
    %209 = arith.addf %205, %208 : vector<32x1xf32>
    %210 = math.rsqrt %209 : vector<32x1xf32>
    %211 = vector.broadcast %210 : vector<32x1xf32> to vector<32x32xf32>
    %212 = arith.mulf %207, %211 : vector<32x32xf32>
    %213 = vector.broadcast %192 : vector<1x32xf32> to vector<32x32xf32>
    %214 = arith.mulf %212, %213 : vector<32x32xf32>
    %215 = vector.broadcast %194 : vector<1x32xf32> to vector<32x32xf32>
    %216 = arith.addf %214, %215 : vector<32x32xf32>
    %217 = arith.truncf %216 : vector<32x32xf32> to vector<32x32xbf16>
    %c1 = arith.constant 1 : index
    %c0_79 = arith.constant 0 : index
    %c0_80 = arith.constant 0 : index
    %218 = vector.load %arg3[%c1, %c0_79, %c0_80] : memref<2x32x96xbf16, #tpu.memory_space<vmem>>, vector<1x32x96xbf16>
    %219 = vector.shape_cast %218 : vector<1x32x96xbf16> to vector<32x96xbf16>
    %cst_81 = arith.constant dense<0.000000e+00> : vector<32x96xf32>
    %220 = tpu.matmul %217, %219, %cst_81 {dimension_numbers = #tpu.dot_dimension_numbers<[1], [0], [0], [1], [0, 0, 1, 1], [], []>} : vector<32x32xbf16>, vector<32x96xbf16>, vector<32x96xf32> -> vector<32x96xf32>
    %c1_82 = arith.constant 1 : index
    %c0_83 = arith.constant 0 : index
    %c0_84 = arith.constant 0 : index
    %221 = vector.load %arg4[%c1_82, %c0_83, %c0_84] : memref<2x1x96xf32, #tpu.memory_space<vmem>>, vector<1x1x96xf32>
    %222 = vector.shape_cast %221 : vector<1x1x96xf32> to vector<1x96xf32>
    %223 = vector.broadcast %222 : vector<1x96xf32> to vector<32x96xf32>
    %224 = arith.addf %220, %223 : vector<32x96xf32>
    %c1_85 = arith.constant 1 : index
    %c0_86 = arith.constant 0 : index
    %c0_87 = arith.constant 0 : index
    %c0_88 = arith.constant 0 : index
    %225 = vector.load %arg5[%c1_85, %c0_86, %c0_87, %c0_88] : memref<2x4x8x32xbf16, #tpu.memory_space<vmem>>, vector<1x4x8x32xbf16>
    %226 = vector.shape_cast %225 : vector<1x4x8x32xbf16> to vector<4x8x32xbf16>
    %cst_89 = arith.constant 0.000000e+00 : f32
    %227 = vector.broadcast %cst_89 : f32 to vector<32x32xf32>
    %228 = vector.extract_strided_slice %224 {offsets = [0, 0], sizes = [32, 8], strides = [1, 1]} : vector<32x96xf32> to vector<32x8xf32>
    %229 = vector.shape_cast %228 : vector<32x8xf32> to vector<4x8x8xf32>
    %230 = vector.extract_strided_slice %224 {offsets = [0, 32], sizes = [32, 8], strides = [1, 1]} : vector<32x96xf32> to vector<32x8xf32>
    %231 = vector.shape_cast %230 : vector<32x8xf32> to vector<4x8x8xf32>
    %232 = vector.extract_strided_slice %224 {offsets = [0, 64], sizes = [32, 8], strides = [1, 1]} : vector<32x96xf32> to vector<32x8xf32>
    %233 = vector.shape_cast %232 : vector<32x8xf32> to vector<4x8x8xf32>
    %234 = arith.truncf %229 : vector<4x8x8xf32> to vector<4x8x8xbf16>
    %235 = arith.truncf %231 : vector<4x8x8xf32> to vector<4x8x8xbf16>
    "tpu.trace_start"() <{level = 10 : i32, message = "ntd,nsd->nts"}> : () -> ()
    %cst_90 = arith.constant dense<0.000000e+00> : vector<4x8x8xf32>
    %236 = tpu.matmul %234, %235, %cst_90 {dimension_numbers = #tpu.dot_dimension_numbers<[2], [2], [1], [1], [0, 0, 0, 1, 1, 1], [0], [0]>} : vector<4x8x8xbf16>, vector<4x8x8xbf16>, vector<4x8x8xf32> -> vector<4x8x8xf32>
    "tpu.trace_stop"() : () -> ()
    %cst_91 = arith.constant 0.353553385 : f32
    %237 = vector.broadcast %cst_91 : f32 to vector<4x8x8xf32>
    %238 = arith.mulf %236, %237 : vector<4x8x8xf32>
    %239 = arith.addf %238, %5 : vector<4x8x8xf32>
    %cst_92 = arith.constant dense<0xFF800000> : vector<4x8xf32>
    %240 = vector.multi_reduction <maximumf>, %239, %cst_92 [2] : vector<4x8x8xf32> to vector<4x8xf32>
    %241 = vector.shape_cast %240 : vector<4x8xf32> to vector<4x8x1xf32>
    %242 = vector.broadcast %241 : vector<4x8x1xf32> to vector<4x8x8xf32>
    %243 = arith.subf %239, %242 : vector<4x8x8xf32>
    %244 = math.exp %243 : vector<4x8x8xf32>
    %cst_93 = arith.constant dense<0.000000e+00> : vector<4x8xf32>
    %245 = vector.multi_reduction <add>, %244, %cst_93 [2] : vector<4x8x8xf32> to vector<4x8xf32>
    %246 = vector.shape_cast %245 : vector<4x8xf32> to vector<4x8x1xf32>
    %247 = tpu.reciprocal %246 {approx = true} : vector<4x8x1xf32> -> vector<4x8x1xf32>
    %248 = vector.broadcast %247 : vector<4x8x1xf32> to vector<4x8x8xf32>
    %249 = arith.mulf %244, %248 : vector<4x8x8xf32>
    %250 = arith.truncf %249 : vector<4x8x8xf32> to vector<4x8x8xbf16>
    %251 = arith.truncf %233 : vector<4x8x8xf32> to vector<4x8x8xbf16>
    "tpu.trace_start"() <{level = 10 : i32, message = "nts,nsd->ntd"}> : () -> ()
    %cst_94 = arith.constant dense<0.000000e+00> : vector<4x8x8xf32>
    %252 = tpu.matmul %250, %251, %cst_94 {dimension_numbers = #tpu.dot_dimension_numbers<[2], [1], [1], [2], [0, 0, 0, 1, 1, 2], [0], [0]>} : vector<4x8x8xbf16>, vector<4x8x8xbf16>, vector<4x8x8xf32> -> vector<4x8x8xf32>
    "tpu.trace_stop"() : () -> ()
    %253 = vector.shape_cast %252 : vector<4x8x8xf32> to vector<32x8xf32>
    %254 = arith.truncf %253 : vector<32x8xf32> to vector<32x8xbf16>
    %255 = vector.extract_strided_slice %226 {offsets = [0, 0, 0], sizes = [1, 8, 32], strides = [1, 1, 1]} : vector<4x8x32xbf16> to vector<1x8x32xbf16>
    %256 = vector.shape_cast %255 : vector<1x8x32xbf16> to vector<8x32xbf16>
    %cst_95 = arith.constant dense<0.000000e+00> : vector<32x32xf32>
    %257 = tpu.matmul %254, %256, %cst_95 {dimension_numbers = #tpu.dot_dimension_numbers<[1], [0], [0], [1], [0, 0, 1, 1], [], []>} : vector<32x8xbf16>, vector<8x32xbf16>, vector<32x32xf32> -> vector<32x32xf32>
    %258 = arith.addf %227, %257 : vector<32x32xf32>
    %259 = vector.extract_strided_slice %224 {offsets = [0, 8], sizes = [32, 8], strides = [1, 1]} : vector<32x96xf32> to vector<32x8xf32>
    %260 = vector.shape_cast %259 : vector<32x8xf32> to vector<4x8x8xf32>
    %261 = vector.extract_strided_slice %224 {offsets = [0, 40], sizes = [32, 8], strides = [1, 1]} : vector<32x96xf32> to vector<32x8xf32>
    %262 = vector.shape_cast %261 : vector<32x8xf32> to vector<4x8x8xf32>
    %263 = vector.extract_strided_slice %224 {offsets = [0, 72], sizes = [32, 8], strides = [1, 1]} : vector<32x96xf32> to vector<32x8xf32>
    %264 = vector.shape_cast %263 : vector<32x8xf32> to vector<4x8x8xf32>
    %265 = arith.truncf %260 : vector<4x8x8xf32> to vector<4x8x8xbf16>
    %266 = arith.truncf %262 : vector<4x8x8xf32> to vector<4x8x8xbf16>
    "tpu.trace_start"() <{level = 10 : i32, message = "ntd,nsd->nts"}> : () -> ()
    %cst_96 = arith.constant dense<0.000000e+00> : vector<4x8x8xf32>
    %267 = tpu.matmul %265, %266, %cst_96 {dimension_numbers = #tpu.dot_dimension_numbers<[2], [2], [1], [1], [0, 0, 0, 1, 1, 1], [0], [0]>} : vector<4x8x8xbf16>, vector<4x8x8xbf16>, vector<4x8x8xf32> -> vector<4x8x8xf32>
    "tpu.trace_stop"() : () -> ()
    %cst_97 = arith.constant 0.353553385 : f32
    %268 = vector.broadcast %cst_97 : f32 to vector<4x8x8xf32>
    %269 = arith.mulf %267, %268 : vector<4x8x8xf32>
    %270 = arith.addf %269, %5 : vector<4x8x8xf32>
    %cst_98 = arith.constant dense<0xFF800000> : vector<4x8xf32>
    %271 = vector.multi_reduction <maximumf>, %270, %cst_98 [2] : vector<4x8x8xf32> to vector<4x8xf32>
    %272 = vector.shape_cast %271 : vector<4x8xf32> to vector<4x8x1xf32>
    %273 = vector.broadcast %272 : vector<4x8x1xf32> to vector<4x8x8xf32>
    %274 = arith.subf %270, %273 : vector<4x8x8xf32>
    %275 = math.exp %274 : vector<4x8x8xf32>
    %cst_99 = arith.constant dense<0.000000e+00> : vector<4x8xf32>
    %276 = vector.multi_reduction <add>, %275, %cst_99 [2] : vector<4x8x8xf32> to vector<4x8xf32>
    %277 = vector.shape_cast %276 : vector<4x8xf32> to vector<4x8x1xf32>
    %278 = tpu.reciprocal %277 {approx = true} : vector<4x8x1xf32> -> vector<4x8x1xf32>
    %279 = vector.broadcast %278 : vector<4x8x1xf32> to vector<4x8x8xf32>
    %280 = arith.mulf %275, %279 : vector<4x8x8xf32>
    %281 = arith.truncf %280 : vector<4x8x8xf32> to vector<4x8x8xbf16>
    %282 = arith.truncf %264 : vector<4x8x8xf32> to vector<4x8x8xbf16>
    "tpu.trace_start"() <{level = 10 : i32, message = "nts,nsd->ntd"}> : () -> ()
    %cst_100 = arith.constant dense<0.000000e+00> : vector<4x8x8xf32>
    %283 = tpu.matmul %281, %282, %cst_100 {dimension_numbers = #tpu.dot_dimension_numbers<[2], [1], [1], [2], [0, 0, 0, 1, 1, 2], [0], [0]>} : vector<4x8x8xbf16>, vector<4x8x8xbf16>, vector<4x8x8xf32> -> vector<4x8x8xf32>
    "tpu.trace_stop"() : () -> ()
    %284 = vector.shape_cast %283 : vector<4x8x8xf32> to vector<32x8xf32>
    %285 = arith.truncf %284 : vector<32x8xf32> to vector<32x8xbf16>
    %286 = vector.extract_strided_slice %226 {offsets = [1, 0, 0], sizes = [1, 8, 32], strides = [1, 1, 1]} : vector<4x8x32xbf16> to vector<1x8x32xbf16>
    %287 = vector.shape_cast %286 : vector<1x8x32xbf16> to vector<8x32xbf16>
    %cst_101 = arith.constant dense<0.000000e+00> : vector<32x32xf32>
    %288 = tpu.matmul %285, %287, %cst_101 {dimension_numbers = #tpu.dot_dimension_numbers<[1], [0], [0], [1], [0, 0, 1, 1], [], []>} : vector<32x8xbf16>, vector<8x32xbf16>, vector<32x32xf32> -> vector<32x32xf32>
    %289 = arith.addf %258, %288 : vector<32x32xf32>
    %290 = vector.extract_strided_slice %224 {offsets = [0, 16], sizes = [32, 8], strides = [1, 1]} : vector<32x96xf32> to vector<32x8xf32>
    %291 = vector.shape_cast %290 : vector<32x8xf32> to vector<4x8x8xf32>
    %292 = vector.extract_strided_slice %224 {offsets = [0, 48], sizes = [32, 8], strides = [1, 1]} : vector<32x96xf32> to vector<32x8xf32>
    %293 = vector.shape_cast %292 : vector<32x8xf32> to vector<4x8x8xf32>
    %294 = vector.extract_strided_slice %224 {offsets = [0, 80], sizes = [32, 8], strides = [1, 1]} : vector<32x96xf32> to vector<32x8xf32>
    %295 = vector.shape_cast %294 : vector<32x8xf32> to vector<4x8x8xf32>
    %296 = arith.truncf %291 : vector<4x8x8xf32> to vector<4x8x8xbf16>
    %297 = arith.truncf %293 : vector<4x8x8xf32> to vector<4x8x8xbf16>
    "tpu.trace_start"() <{level = 10 : i32, message = "ntd,nsd->nts"}> : () -> ()
    %cst_102 = arith.constant dense<0.000000e+00> : vector<4x8x8xf32>
    %298 = tpu.matmul %296, %297, %cst_102 {dimension_numbers = #tpu.dot_dimension_numbers<[2], [2], [1], [1], [0, 0, 0, 1, 1, 1], [0], [0]>} : vector<4x8x8xbf16>, vector<4x8x8xbf16>, vector<4x8x8xf32> -> vector<4x8x8xf32>
    "tpu.trace_stop"() : () -> ()
    %cst_103 = arith.constant 0.353553385 : f32
    %299 = vector.broadcast %cst_103 : f32 to vector<4x8x8xf32>
    %300 = arith.mulf %298, %299 : vector<4x8x8xf32>
    %301 = arith.addf %300, %5 : vector<4x8x8xf32>
    %cst_104 = arith.constant dense<0xFF800000> : vector<4x8xf32>
    %302 = vector.multi_reduction <maximumf>, %301, %cst_104 [2] : vector<4x8x8xf32> to vector<4x8xf32>
    %303 = vector.shape_cast %302 : vector<4x8xf32> to vector<4x8x1xf32>
    %304 = vector.broadcast %303 : vector<4x8x1xf32> to vector<4x8x8xf32>
    %305 = arith.subf %301, %304 : vector<4x8x8xf32>
    %306 = math.exp %305 : vector<4x8x8xf32>
    %cst_105 = arith.constant dense<0.000000e+00> : vector<4x8xf32>
    %307 = vector.multi_reduction <add>, %306, %cst_105 [2] : vector<4x8x8xf32> to vector<4x8xf32>
    %308 = vector.shape_cast %307 : vector<4x8xf32> to vector<4x8x1xf32>
    %309 = tpu.reciprocal %308 {approx = true} : vector<4x8x1xf32> -> vector<4x8x1xf32>
    %310 = vector.broadcast %309 : vector<4x8x1xf32> to vector<4x8x8xf32>
    %311 = arith.mulf %306, %310 : vector<4x8x8xf32>
    %312 = arith.truncf %311 : vector<4x8x8xf32> to vector<4x8x8xbf16>
    %313 = arith.truncf %295 : vector<4x8x8xf32> to vector<4x8x8xbf16>
    "tpu.trace_start"() <{level = 10 : i32, message = "nts,nsd->ntd"}> : () -> ()
    %cst_106 = arith.constant dense<0.000000e+00> : vector<4x8x8xf32>
    %314 = tpu.matmul %312, %313, %cst_106 {dimension_numbers = #tpu.dot_dimension_numbers<[2], [1], [1], [2], [0, 0, 0, 1, 1, 2], [0], [0]>} : vector<4x8x8xbf16>, vector<4x8x8xbf16>, vector<4x8x8xf32> -> vector<4x8x8xf32>
    "tpu.trace_stop"() : () -> ()
    %315 = vector.shape_cast %314 : vector<4x8x8xf32> to vector<32x8xf32>
    %316 = arith.truncf %315 : vector<32x8xf32> to vector<32x8xbf16>
    %317 = vector.extract_strided_slice %226 {offsets = [2, 0, 0], sizes = [1, 8, 32], strides = [1, 1, 1]} : vector<4x8x32xbf16> to vector<1x8x32xbf16>
    %318 = vector.shape_cast %317 : vector<1x8x32xbf16> to vector<8x32xbf16>
    %cst_107 = arith.constant dense<0.000000e+00> : vector<32x32xf32>
    %319 = tpu.matmul %316, %318, %cst_107 {dimension_numbers = #tpu.dot_dimension_numbers<[1], [0], [0], [1], [0, 0, 1, 1], [], []>} : vector<32x8xbf16>, vector<8x32xbf16>, vector<32x32xf32> -> vector<32x32xf32>
    %320 = arith.addf %289, %319 : vector<32x32xf32>
    %321 = vector.extract_strided_slice %224 {offsets = [0, 24], sizes = [32, 8], strides = [1, 1]} : vector<32x96xf32> to vector<32x8xf32>
    %322 = vector.shape_cast %321 : vector<32x8xf32> to vector<4x8x8xf32>
    %323 = vector.extract_strided_slice %224 {offsets = [0, 56], sizes = [32, 8], strides = [1, 1]} : vector<32x96xf32> to vector<32x8xf32>
    %324 = vector.shape_cast %323 : vector<32x8xf32> to vector<4x8x8xf32>
    %325 = vector.extract_strided_slice %224 {offsets = [0, 88], sizes = [32, 8], strides = [1, 1]} : vector<32x96xf32> to vector<32x8xf32>
    %326 = vector.shape_cast %325 : vector<32x8xf32> to vector<4x8x8xf32>
    %327 = arith.truncf %322 : vector<4x8x8xf32> to vector<4x8x8xbf16>
    %328 = arith.truncf %324 : vector<4x8x8xf32> to vector<4x8x8xbf16>
    "tpu.trace_start"() <{level = 10 : i32, message = "ntd,nsd->nts"}> : () -> ()
    %cst_108 = arith.constant dense<0.000000e+00> : vector<4x8x8xf32>
    %329 = tpu.matmul %327, %328, %cst_108 {dimension_numbers = #tpu.dot_dimension_numbers<[2], [2], [1], [1], [0, 0, 0, 1, 1, 1], [0], [0]>} : vector<4x8x8xbf16>, vector<4x8x8xbf16>, vector<4x8x8xf32> -> vector<4x8x8xf32>
    "tpu.trace_stop"() : () -> ()
    %cst_109 = arith.constant 0.353553385 : f32
    %330 = vector.broadcast %cst_109 : f32 to vector<4x8x8xf32>
    %331 = arith.mulf %329, %330 : vector<4x8x8xf32>
    %332 = arith.addf %331, %5 : vector<4x8x8xf32>
    %cst_110 = arith.constant dense<0xFF800000> : vector<4x8xf32>
    %333 = vector.multi_reduction <maximumf>, %332, %cst_110 [2] : vector<4x8x8xf32> to vector<4x8xf32>
    %334 = vector.shape_cast %333 : vector<4x8xf32> to vector<4x8x1xf32>
    %335 = vector.broadcast %334 : vector<4x8x1xf32> to vector<4x8x8xf32>
    %336 = arith.subf %332, %335 : vector<4x8x8xf32>
    %337 = math.exp %336 : vector<4x8x8xf32>
    %cst_111 = arith.constant dense<0.000000e+00> : vector<4x8xf32>
    %338 = vector.multi_reduction <add>, %337, %cst_111 [2] : vector<4x8x8xf32> to vector<4x8xf32>
    %339 = vector.shape_cast %338 : vector<4x8xf32> to vector<4x8x1xf32>
    %340 = tpu.reciprocal %339 {approx = true} : vector<4x8x1xf32> -> vector<4x8x1xf32>
    %341 = vector.broadcast %340 : vector<4x8x1xf32> to vector<4x8x8xf32>
    %342 = arith.mulf %337, %341 : vector<4x8x8xf32>
    %343 = arith.truncf %342 : vector<4x8x8xf32> to vector<4x8x8xbf16>
    %344 = arith.truncf %326 : vector<4x8x8xf32> to vector<4x8x8xbf16>
    "tpu.trace_start"() <{level = 10 : i32, message = "nts,nsd->ntd"}> : () -> ()
    %cst_112 = arith.constant dense<0.000000e+00> : vector<4x8x8xf32>
    %345 = tpu.matmul %343, %344, %cst_112 {dimension_numbers = #tpu.dot_dimension_numbers<[2], [1], [1], [2], [0, 0, 0, 1, 1, 2], [0], [0]>} : vector<4x8x8xbf16>, vector<4x8x8xbf16>, vector<4x8x8xf32> -> vector<4x8x8xf32>
    "tpu.trace_stop"() : () -> ()
    %346 = vector.shape_cast %345 : vector<4x8x8xf32> to vector<32x8xf32>
    %347 = arith.truncf %346 : vector<32x8xf32> to vector<32x8xbf16>
    %348 = vector.extract_strided_slice %226 {offsets = [3, 0, 0], sizes = [1, 8, 32], strides = [1, 1, 1]} : vector<4x8x32xbf16> to vector<1x8x32xbf16>
    %349 = vector.shape_cast %348 : vector<1x8x32xbf16> to vector<8x32xbf16>
    %cst_113 = arith.constant dense<0.000000e+00> : vector<32x32xf32>
    %350 = tpu.matmul %347, %349, %cst_113 {dimension_numbers = #tpu.dot_dimension_numbers<[1], [0], [0], [1], [0, 0, 1, 1], [], []>} : vector<32x8xbf16>, vector<8x32xbf16>, vector<32x32xf32> -> vector<32x32xf32>
    %351 = arith.addf %320, %350 : vector<32x32xf32>
    %c1_114 = arith.constant 1 : index
    %c0_115 = arith.constant 0 : index
    %c0_116 = arith.constant 0 : index
    %352 = vector.load %arg6[%c1_114, %c0_115, %c0_116] : memref<2x1x32xf32, #tpu.memory_space<vmem>>, vector<1x1x32xf32>
    %353 = vector.shape_cast %352 : vector<1x1x32xf32> to vector<1x32xf32>
    %354 = vector.broadcast %353 : vector<1x32xf32> to vector<32x32xf32>
    %355 = arith.addf %351, %354 : vector<32x32xf32>
    %356 = arith.addf %216, %355 : vector<32x32xf32>
    %c1_117 = arith.constant 1 : index
    %c0_118 = arith.constant 0 : index
    %c0_119 = arith.constant 0 : index
    %357 = vector.load %arg7[%c1_117, %c0_118, %c0_119] : memref<2x1x32xf32, #tpu.memory_space<vmem>>, vector<1x1x32xf32>
    %358 = vector.shape_cast %357 : vector<1x1x32xf32> to vector<1x32xf32>
    %c1_120 = arith.constant 1 : index
    %c0_121 = arith.constant 0 : index
    %c0_122 = arith.constant 0 : index
    %359 = vector.load %arg8[%c1_120, %c0_121, %c0_122] : memref<2x1x32xf32, #tpu.memory_space<vmem>>, vector<1x1x32xf32>
    %360 = vector.shape_cast %359 : vector<1x1x32xf32> to vector<1x32xf32>
    %cst_123 = arith.constant dense<0.000000e+00> : vector<32xf32>
    %361 = vector.multi_reduction <add>, %356, %cst_123 [1] : vector<32x32xf32> to vector<32xf32>
    %362 = vector.shape_cast %361 : vector<32xf32> to vector<32x1xf32>
    %cst_124 = arith.constant 3.200000e+01 : f32
    %363 = vector.broadcast %cst_124 : f32 to vector<32x1xf32>
    %364 = arith.divf %362, %363 : vector<32x1xf32>
    %365 = vector.broadcast %364 : vector<32x1xf32> to vector<32x32xf32>
    %366 = arith.subf %356, %365 : vector<32x32xf32>
    %367 = arith.mulf %366, %366 : vector<32x32xf32>
    %cst_125 = arith.constant dense<0.000000e+00> : vector<32xf32>
    %368 = vector.multi_reduction <add>, %367, %cst_125 [1] : vector<32x32xf32> to vector<32xf32>
    %369 = vector.shape_cast %368 : vector<32xf32> to vector<32x1xf32>
    %cst_126 = arith.constant 3.200000e+01 : f32
    %370 = vector.broadcast %cst_126 : f32 to vector<32x1xf32>
    %371 = arith.divf %369, %370 : vector<32x1xf32>
    %372 = vector.broadcast %364 : vector<32x1xf32> to vector<32x32xf32>
    %373 = arith.subf %356, %372 : vector<32x32xf32>
    %cst_127 = arith.constant 9.99999974E-6 : f32
    %374 = vector.broadcast %cst_127 : f32 to vector<32x1xf32>
    %375 = arith.addf %371, %374 : vector<32x1xf32>
    %376 = math.rsqrt %375 : vector<32x1xf32>
    %377 = vector.broadcast %376 : vector<32x1xf32> to vector<32x32xf32>
    %378 = arith.mulf %373, %377 : vector<32x32xf32>
    %379 = vector.broadcast %358 : vector<1x32xf32> to vector<32x32xf32>
    %380 = arith.mulf %378, %379 : vector<32x32xf32>
    %381 = vector.broadcast %360 : vector<1x32xf32> to vector<32x32xf32>
    %382 = arith.addf %380, %381 : vector<32x32xf32>
    %383 = arith.truncf %382 : vector<32x32xf32> to vector<32x32xbf16>
    %c1_128 = arith.constant 1 : index
    %c0_129 = arith.constant 0 : index
    %c0_130 = arith.constant 0 : index
    %384 = vector.load %arg9[%c1_128, %c0_129, %c0_130] : memref<2x32x2048xbf16, #tpu.memory_space<vmem>>, vector<1x32x2048xbf16>
    %385 = vector.shape_cast %384 : vector<1x32x2048xbf16> to vector<32x2048xbf16>
    %cst_131 = arith.constant dense<0.000000e+00> : vector<32x2048xf32>
    %386 = tpu.matmul %383, %385, %cst_131 {dimension_numbers = #tpu.dot_dimension_numbers<[1], [0], [0], [1], [0, 0, 1, 1], [], []>} : vector<32x32xbf16>, vector<32x2048xbf16>, vector<32x2048xf32> -> vector<32x2048xf32>
    %c1_132 = arith.constant 1 : index
    %c0_133 = arith.constant 0 : index
    %c0_134 = arith.constant 0 : index
    %387 = vector.load %arg10[%c1_132, %c0_133, %c0_134] : memref<2x1x2048xf32, #tpu.memory_space<vmem>>, vector<1x1x2048xf32>
    %388 = vector.shape_cast %387 : vector<1x1x2048xf32> to vector<1x2048xf32>
    %389 = vector.broadcast %388 : vector<1x2048xf32> to vector<32x2048xf32>
    %390 = arith.addf %386, %389 : vector<32x2048xf32>
    %cst_135 = arith.constant 0.000000e+00 : f32
    %391 = vector.broadcast %cst_135 : f32 to vector<32x2048xf32>
    %392 = arith.maximumf %390, %391 : vector<32x2048xf32>
    %393 = arith.truncf %392 : vector<32x2048xf32> to vector<32x2048xbf16>
    %c1_136 = arith.constant 1 : index
    %c0_137 = arith.constant 0 : index
    %c0_138 = arith.constant 0 : index
    %394 = vector.load %arg11[%c1_136, %c0_137, %c0_138] : memref<2x2048x32xbf16, #tpu.memory_space<vmem>>, vector<1x2048x32xbf16>
    %395 = vector.shape_cast %394 : vector<1x2048x32xbf16> to vector<2048x32xbf16>
    %cst_139 = arith.constant dense<0.000000e+00> : vector<32x32xf32>
    %396 = tpu.matmul %393, %395, %cst_139 {dimension_numbers = #tpu.dot_dimension_numbers<[1], [0], [0], [1], [0, 0, 1, 1], [], []>} : vector<32x2048xbf16>, vector<2048x32xbf16>, vector<32x32xf32> -> vector<32x32xf32>
    %c1_140 = arith.constant 1 : index
    %c0_141 = arith.constant 0 : index
    %c0_142 = arith.constant 0 : index
    %397 = vector.load %arg12[%c1_140, %c0_141, %c0_142] : memref<2x1x32xf32, #tpu.memory_space<vmem>>, vector<1x1x32xf32>
    %398 = vector.shape_cast %397 : vector<1x1x32xf32> to vector<1x32xf32>
    %399 = vector.broadcast %398 : vector<1x32xf32> to vector<32x32xf32>
    %400 = arith.addf %396, %399 : vector<32x32xf32>
    %401 = arith.addf %382, %400 : vector<32x32xf32>
    %c1_143 = arith.constant 1 : index
    %c0_144 = arith.constant 0 : index
    %c0_145 = arith.constant 0 : index
    %402 = vector.load %arg13[%c1_143, %c0_144, %c0_145] : memref<2x1x32xf32, #tpu.memory_space<vmem>>, vector<1x1x32xf32>
    %403 = vector.shape_cast %402 : vector<1x1x32xf32> to vector<1x32xf32>
    %c1_146 = arith.constant 1 : index
    %c0_147 = arith.constant 0 : index
    %c0_148 = arith.constant 0 : index
    %404 = vector.load %arg14[%c1_146, %c0_147, %c0_148] : memref<2x1x32xf32, #tpu.memory_space<vmem>>, vector<1x1x32xf32>
    %405 = vector.shape_cast %404 : vector<1x1x32xf32> to vector<1x32xf32>
    %cst_149 = arith.constant dense<0.000000e+00> : vector<32xf32>
    %406 = vector.multi_reduction <add>, %401, %cst_149 [1] : vector<32x32xf32> to vector<32xf32>
    %407 = vector.shape_cast %406 : vector<32xf32> to vector<32x1xf32>
    %cst_150 = arith.constant 3.200000e+01 : f32
    %408 = vector.broadcast %cst_150 : f32 to vector<32x1xf32>
    %409 = arith.divf %407, %408 : vector<32x1xf32>
    %410 = vector.broadcast %409 : vector<32x1xf32> to vector<32x32xf32>
    %411 = arith.subf %401, %410 : vector<32x32xf32>
    %412 = arith.mulf %411, %411 : vector<32x32xf32>
    %cst_151 = arith.constant dense<0.000000e+00> : vector<32xf32>
    %413 = vector.multi_reduction <add>, %412, %cst_151 [1] : vector<32x32xf32> to vector<32xf32>
    %414 = vector.shape_cast %413 : vector<32xf32> to vector<32x1xf32>
    %cst_152 = arith.constant 3.200000e+01 : f32
    %415 = vector.broadcast %cst_152 : f32 to vector<32x1xf32>
    %416 = arith.divf %414, %415 : vector<32x1xf32>
    %417 = vector.broadcast %409 : vector<32x1xf32> to vector<32x32xf32>
    %418 = arith.subf %401, %417 : vector<32x32xf32>
    %cst_153 = arith.constant 9.99999974E-6 : f32
    %419 = vector.broadcast %cst_153 : f32 to vector<32x1xf32>
    %420 = arith.addf %416, %419 : vector<32x1xf32>
    %421 = math.rsqrt %420 : vector<32x1xf32>
    %422 = vector.broadcast %421 : vector<32x1xf32> to vector<32x32xf32>
    %423 = arith.mulf %418, %422 : vector<32x32xf32>
    %424 = vector.broadcast %403 : vector<1x32xf32> to vector<32x32xf32>
    %425 = arith.mulf %423, %424 : vector<32x32xf32>
    %426 = vector.broadcast %405 : vector<1x32xf32> to vector<32x32xf32>
    %427 = arith.addf %425, %426 : vector<32x32xf32>
    %428 = vector.shape_cast %427 : vector<32x32xf32> to vector<4x8x32xf32>
    %c0_154 = arith.constant 0 : index
    %c0_155 = arith.constant 0 : index
    %429 = vector.load %arg15[%c0_154, %c0_155] : memref<1x32xf32, #tpu.memory_space<vmem>>, vector<1x32xf32>
    %430 = vector.shape_cast %429 : vector<1x32xf32> to vector<1x1x32xf32>
    %431 = vector.broadcast %430 : vector<1x1x32xf32> to vector<4x8x32xf32>
    %432 = arith.mulf %428, %431 : vector<4x8x32xf32>
    %cst_156 = arith.constant dense<0.000000e+00> : vector<4x8xf32>
    %433 = vector.multi_reduction <add>, %432, %cst_156 [2] : vector<4x8x32xf32> to vector<4x8xf32>
    %c0_157 = arith.constant 0 : index
    %c0_158 = arith.constant 0 : index
    %434 = vector.load %arg16[%c0_157, %c0_158] : memref<4x8xf32, #tpu.memory_space<vmem>>, vector<4x8xf32>
    tpu.vector_store %arg16[%c0_157, %c0_158], %433 {strides = array<i32>} : memref<4x8xf32, #tpu.memory_space<vmem>>, vector<4x8xf32>,
    return
  }
  func.func @transform_0(%arg0: i32) -> (i32, i32, i32) {
    %c0_i32 = arith.constant 0 : i32
    %c0_i32_0 = arith.constant 0 : i32
    %c0_i32_1 = arith.constant 0 : i32
    return %arg0, %c0_i32, %c0_i32_0 : i32, i32, i32
  }
  func.func @transform_1(%arg0: i32) -> (i32, i32) {
    %c0_i32 = arith.constant 0 : i32
    %c0_i32_0 = arith.constant 0 : i32
    %c0_i32_1 = arith.constant 0 : i32
    return %c0_i32, %c0_i32_0 : i32, i32
  }
  func.func @transform_2(%arg0: i32) -> (i32, i32, i32) {
    %c0_i32 = arith.constant 0 : i32
    %c0_i32_0 = arith.constant 0 : i32
    %c0_i32_1 = arith.constant 0 : i32
    %c0_i32_2 = arith.constant 0 : i32
    return %c0_i32, %c0_i32_0, %c0_i32_1 : i32, i32, i32
  }
  func.func @transform_3(%arg0: i32) -> (i32, i32, i32) {
    %c0_i32 = arith.constant 0 : i32
    %c0_i32_0 = arith.constant 0 : i32
    %c0_i32_1 = arith.constant 0 : i32
    %c0_i32_2 = arith.constant 0 : i32
    return %c0_i32, %c0_i32_0, %c0_i32_1 : i32, i32, i32
  }
  func.func @transform_4(%arg0: i32) -> (i32, i32, i32, i32) {
    %c0_i32 = arith.constant 0 : i32
    %c0_i32_0 = arith.constant 0 : i32
    %c0_i32_1 = arith.constant 0 : i32
    %c0_i32_2 = arith.constant 0 : i32
    %c0_i32_3 = arith.constant 0 : i32
    return %c0_i32, %c0_i32_0, %c0_i32_1, %c0_i32_2 : i32, i32, i32, i32
  }
  func.func @transform_5(%arg0: i32) -> (i32, i32, i32) {
    %c0_i32 = arith.constant 0 : i32
    %c0_i32_0 = arith.constant 0 : i32
    %c0_i32_1 = arith.constant 0 : i32
    %c0_i32_2 = arith.constant 0 : i32
    return %c0_i32, %c0_i32_0, %c0_i32_1 : i32, i32, i32
  }
  func.func @transform_6(%arg0: i32) -> (i32, i32, i32) {
    %c0_i32 = arith.constant 0 : i32
    %c0_i32_0 = arith.constant 0 : i32
    %c0_i32_1 = arith.constant 0 : i32
    %c0_i32_2 = arith.constant 0 : i32
    return %c0_i32, %c0_i32_0, %c0_i32_1 : i32, i32, i32
  }
  func.func @transform_7(%arg0: i32) -> (i32, i32, i32) {
    %c0_i32 = arith.constant 0 : i32
    %c0_i32_0 = arith.constant 0 : i32
    %c0_i32_1 = arith.constant 0 : i32
    %c0_i32_2 = arith.constant 0 : i32
    return %c0_i32, %c0_i32_0, %c0_i32_1 : i32, i32, i32
  }
  func.func @transform_8(%arg0: i32) -> (i32, i32, i32) {
    %c0_i32 = arith.constant 0 : i32
    %c0_i32_0 = arith.constant 0 : i32
    %c0_i32_1 = arith.constant 0 : i32
    %c0_i32_2 = arith.constant 0 : i32
    return %c0_i32, %c0_i32_0, %c0_i32_1 : i32, i32, i32
  }
  func.func @transform_9(%arg0: i32) -> (i32, i32, i32) {
    %c0_i32 = arith.constant 0 : i32
    %c0_i32_0 = arith.constant 0 : i32
    %c0_i32_1 = arith.constant 0 : i32
    %c0_i32_2 = arith.constant 0 : i32
    return %c0_i32, %c0_i32_0, %c0_i32_1 : i32, i32, i32
  }
  func.func @transform_10(%arg0: i32) -> (i32, i32, i32) {
    %c0_i32 = arith.constant 0 : i32
    %c0_i32_0 = arith.constant 0 : i32
    %c0_i32_1 = arith.constant 0 : i32
    %c0_i32_2 = arith.constant 0 : i32
    return %c0_i32, %c0_i32_0, %c0_i32_1 : i32, i32, i32
  }
  func.func @transform_11(%arg0: i32) -> (i32, i32, i32) {
    %c0_i32 = arith.constant 0 : i32
    %c0_i32_0 = arith.constant 0 : i32
    %c0_i32_1 = arith.constant 0 : i32
    %c0_i32_2 = arith.constant 0 : i32
    return %c0_i32, %c0_i32_0, %c0_i32_1 : i32, i32, i32
  }
  func.func @transform_12(%arg0: i32) -> (i32, i32, i32) {
    %c0_i32 = arith.constant 0 : i32
    %c0_i32_0 = arith.constant 0 : i32
    %c0_i32_1 = arith.constant 0 : i32
    %c0_i32_2 = arith.constant 0 : i32
    return %c0_i32, %c0_i32_0, %c0_i32_1 : i32, i32, i32
  }
  func.func @transform_13(%arg0: i32) -> (i32, i32, i32) {
    %c0_i32 = arith.constant 0 : i32
    %c0_i32_0 = arith.constant 0 : i32
    %c0_i32_1 = arith.constant 0 : i32
    %c0_i32_2 = arith.constant 0 : i32
    return %c0_i32, %c0_i32_0, %c0_i32_1 : i32, i32, i32
  }
  func.func @transform_14(%arg0: i32) -> (i32, i32) {
    %c0_i32 = arith.constant 0 : i32
    %c0_i32_0 = arith.constant 0 : i32
    %c0_i32_1 = arith.constant 0 : i32
    return %c0_i32, %c0_i32_0 : i32, i32
  }
  func.func @transform_15(%arg0: i32) -> (i32, i32) {
    %c0_i32 = arith.constant 0 : i32
    %c0_i32_0 = arith.constant 0 : i32
    return %arg0, %c0_i32 : i32, i32
  }
}

</mosaic_0001>

<bundles_post_ra>
// kernel: tpu_custom_call.1
= control target key start
LH: loop header
LB: loop body
LE: loop exit
PB: predicated region body
PF: predicated region fallthrough
CT: control target
= control target key end

     0   :  { %vm79_vm0 = vcmask 261120   ;;  %s11523_s0 = inlined_call_operand.vmem [shape: f32[4,8,32], index: 0, kind: input, shape index: {}]   ;;  %s11524_s1 = inlined_call_operand.vmem [shape: f32[8,8], index: 1, kind: input, shape index: {}]   ;;  %s11525_s2 = inlined_call_operand.vmem [shape: bf16[2,32,96], index: 2, kind: input, shape index: {}]   ;;  %s11526_s3 = inlined_call_operand.vmem [shape: f32[2,1,96], index: 3, kind: input, shape index: {}]   ;;  %s11527_s4 = inlined_call_operand.vmem [shape: bf16[2,4,8,32], index: 4, kind: input, shape index: {}]   ;;  %s11528_s5 = inlined_call_operand.vmem [shape: f32[2,1,32], index: 5, kind: input, shape index: {}]   ;;  %s11529_s6 = inlined_call_operand.vmem [shape: f32[2,1,32], index: 6, kind: input, shape index: {}]   ;;  %s11530_s7 = inlined_call_operand.vmem [shape: f32[2,1,32], index: 7, kind: input, shape index: {}]   ;;  %s11531_s8 = inlined_call_operand.vmem [shape: bf16[2,32,2048], index: 8, kind: input, shape index: {}]   ;;  %s11532_s9 = inlined_call_operand.vmem [shape: f32[2,1,2048], index: 9, kind: input, shape index: {}]   ;;  %s11533_s10 = inlined_call_operand.vmem [shape: bf16[2,2048,32], index: 10, kind: input, shape index: {}]   ;;  %s11534_s11 = inlined_call_operand.vmem [shape: f32[2,1,32], index: 11, kind: input, shape index: {}]   ;;  %s11535_s12 = inlined_call_operand.vmem [shape: f32[2,1,32], index: 12, kind: input, shape index: {}]   ;;  %s11536_s13 = inlined_call_operand.vmem [shape: f32[2,1,32], index: 13, kind: input, shape index: {}]   ;;  %s11537_s14 = inlined_call_operand.vmem [shape: f32[1,32], index: 14, kind: input, shape index: {}]   ;;  %s11538_s15 = inlined_call_operand.hbm [shape: f32[4,8], index: 15, kind: output, shape index: {}]  }
   0x1   :  { %v8498_v0 = vld [vmem:[%s11525_s2 + $0x8] sm:$0xff]  ;;  %v8497_v1 = vld [vmem:[%s11525_s2] sm:$0xff] }
   0x2   :  { %v52_v2 = vld [vmem:[%s11523_s0] sm:$0xff]  ;;  %92 = vmatpush.bf16.msra.mxu0 %v8498_v0  ;;  %v53_v3 = vld [vmem:[%s11523_s0 + $0x8] sm:$0xff] }
   0x3   :  { %v57_v4 = vpack.c.bf16 %v53_v3, %v52_v2 }
   0x6   :  { %93 = vmatpush.bf16.msra.mxu0 %v8497_v1 }
   0x7   :  { %20 = vsyncpa [#allocation3], 0  ;;  %v54_v5 = vld [vmem:[%s11523_s0 + $0x10] sm:$0xff]  ;;  %v55_v6 = vld [vmem:[%s11523_s0 + $0x18] sm:$0xff]  ;;  %s9042_s17 = smov 96   ;;  %vm118_vm1 = vcmask 64512  }
   0x8   :  { %v58_v7 = vpack.c.bf16 %v55_v6, %v54_v5  ;;  %v8834_v9 = vld [vmem:[%s11526_s3] ss:$0 sm:$0xff]  ;;  %s9043_s20 = smov 64   ;;  %s9044_s21 = smov 88   ;;  %vm271_vm2 = vcmask 1043456  }
   0x9   :  { %6756 = vmatmul.msk.bf16.vlgmr.msra.gmra.mxu0 %vm79_vm0, %v57_v4  ;;  %v9185_v44 = vld [vmem:[%s11524_s1] sm:$0xff]  ;;  %s9045_s22 = smov 120   ;;  %s11547_s23 = smov 56  }
   0xa   :  { %s9047_s24 = smov 80   ;;  %s11549_s25 = smov 112  }
   0xb   :  { %s11543_s26 = smov 72   ;;  %s11545_s27 = smov 48  }
   0xc   :  { %s11541_s28 = smov 104   ;;  %s11539_s19 = smov 40  }
  0x19   :  { %6757 = vmatmul.msk.bf16.gmra.mxu0 %vm79_vm0, %v58_v7 }
  0x86   :  { %v95_v8 = vpop.f32.mrf.mxu0 }
  0x87   :  { %v96_v12 = vadd.f32 %v8834_v9, %v95_v8 }
  0x89   :  { %v109_v15 = vpack.c.bf16 %v96_v12, %v96_v12 }
  0x8b   :  { %v114_v19 = vunpack.c.l.b16 %v109_v15 }
  0x8d   :  { %v9162_v22 = vpack.c.b16 %v114_v19, %v114_v19 }
  0x8e   :  { %v97_v10 = vpop.f32.mrf.mxu0 }
  0x8f   :  { %v98_v11 = vadd.f32 %v8834_v9, %v97_v10 }
  0x91   :  { %v110_v13 = vpack.c.bf16 %v98_v11, %v98_v11 }
  0x93   :  { %v139_v14 = vunpack.c.l.b16 %v110_v13 }
  0x95   :  { %v9158_v16 = vpack.c.b16 %v139_v14, %v139_v14 }
  0x96   :  { %v100_v17 = vpop.f32.mrf.mxu0 }
  0x97   :  { %v101_v18 = vadd.f32 %v8834_v9, %v100_v17  ;;  %141 = vrot.lane.b32.xlu0 %v9158_v16, %s9042_s17 }
  0x99   :  { %v111_v20 = vpack.c.bf16 %v101_v18, %v101_v18 }
  0x9b   :  { %v163_v21 = vunpack.c.l.b16 %v111_v20 }
  0x9d   :  { %v9164_v23 = vpack.c.b16 %v163_v21, %v163_v21 }
  0x9e   :  { %v102_v24 = vpop.f32.mrf.mxu0 }
  0x9f   :  { %v103_v25 = vadd.f32 %v8834_v9, %v102_v24  ;;  %165 = vrot.lane.b32.xlu1 %v9164_v23, %s9042_s17  ;;  %116 = vrot.lane.b32.xlu0 %v9162_v22, %s9042_s17 }
  0xa1   :  { %v112_v26 = vpack.c.bf16 %v103_v25, %v103_v25 }
  0xa3   :  { %v187_v27 = vunpack.c.l.b16 %v112_v26 }
  0xa5   :  { %v9170_v28 = vpack.c.b16 %v187_v27, %v187_v27 }
  0xa7   :  { %189 = vrot.lane.b32.xlu1 %v9170_v28, %s9042_s17 }
 0x109   :  { %v142_v29 = vpop.permute.xlu0 %141 }
 0x10a   :  { %v147_v30 = vsel %vm118_vm1, %v142_v29, 0 }
 0x10b   :  { %156 = vmatpush.bf16.xpose.msra.mxu3 %v147_v30 }
 0x111   :  { %v166_v31 = vpop.permute.xlu1 %165  ;;  %v117_v32 = vpop.permute.xlu0 %116 }
 0x112   :  { %6759 = vmatmul.msk.bf16.vlgmr.msra.gmra.mxu3 %vm118_vm1, %v110_v13  ;;  %v123_v33 = vsel %vm118_vm1, %v117_v32, 0  ;;  %v171_v34 = vsel %vm118_vm1, %v166_v31, 0 }
 0x113   :  { %132 = vmatpush.bf16.xpose.msra.mxu1 %v123_v33  ;;  %180 = vmatpush.bf16.xpose.msrb.mxu3 %v171_v34 }
 0x119   :  { %v190_v35 = vpop.permute.xlu1 %189 }
 0x11a   :  { %6758 = vmatmul.msk.bf16.vlgmr.msra.gmra.mxu1 %vm118_vm1, %v109_v15  ;;  %v195_v36 = vsel %vm118_vm1, %v190_v35, 0 }
 0x11b   :  { %204 = vmatpush.bf16.xpose.msrb.mxu1 %v195_v36 }
 0x122   :  { %6760 = vmatmul.msk.bf16.vlgmr.msrb.gmra.mxu3 %vm118_vm1, %v111_v20 }
 0x12a   :  { %6761 = vmatmul.msk.bf16.vlgmr.msrb.gmra.mxu1 %vm118_vm1, %v112_v26 }
 0x195   :  { %v158_v37 = vpop.f32.mrf.mxu3 }
 0x196   :  { %v211_v9 = vmul.f32 0.35355338, %v158_v37 }
 0x197   :  { %v134_v38 = vpop.f32.mrf.mxu1 }
 0x198   :  { %v210_v52 = vmul.f32 0.35355338, %v134_v38  ;;  %v215_v10 = vadd.f32 %v211_v9, %v9185_v44 }
 0x19a   :  { %v214_v53 = vadd.f32 %v210_v52, %v9185_v44  ;;  %v221_v11 = vsel %vm118_vm1, %v215_v10, -inf }
 0x19c   :  { %v218_v54 = vsel %vm118_vm1, %v214_v53, -inf }
 0x19d   :  { %v160_v39 = vpop.f32.mrf.mxu3 }
 0x19f   :  { %v136_v40 = vpop.f32.mrf.mxu1 }
 0x1a5   :  { %v182_v41 = vpop.f32.mrf.mxu3 }
 0x1a6   :  { %v212_v42 = vmul.f32 0.35355338, %v182_v41 }
 0x1a7   :  { %v206_v43 = vpop.f32.mrf.mxu1 }
 0x1a8   :  { %v216_v45 = vadd.f32 %v212_v42, %v9185_v44  ;;  %v213_v46 = vmul.f32 0.35355338, %v206_v43 }
 0x1aa   :  { %v224_v47 = vsel %vm118_vm1, %v216_v45, -inf  ;;  %v217_v49 = vadd.f32 %v213_v46, %v9185_v44 }
 0x1ab   :  { %225 = vmax.xlane.f32.xlu2 %v224_v47 }
 0x1ac   :  { %v227_v51 = vsel %vm118_vm1, %v217_v49, -inf }
 0x1ad   :  { %v184_v48 = vpop.f32.mrf.mxu3 }
 0x1af   :  { %v208_v50 = vpop.f32.mrf.mxu1 }
 0x1b3   :  { %228 = vmax.xlane.f32.xlu2 %v227_v51 }
 0x1cb   :  { %309 = vrot.lane.b32.xlu2 %v9164_v23, %s9043_s20 }
 0x1d3   :  { %330 = vrot.lane.b32.xlu2 %v9170_v28, %s9043_s20 }
 0x1db   :  { %401 = vrot.lane.b32.xlu2 %v9164_v23, %s9044_s21 }
 0x1e3   :  { %424 = vrot.lane.b32.xlu2 %v9170_v28, %s9044_s21 }
 0x20c   :  { %219 = vmax.xlane.f32.xlu2 %v218_v54 }
 0x21e   :  { %v226_v55 = vpop.xlane.xlu2 %225 }
 0x21f   :  { %v232_v56 = vsub.f32 %v216_v45, %v226_v55 }
 0x221   :  { %v238_v57 = vmul.f32 1.442695, %v232_v56 }
 0x223   :  { %8849 = vpow2.f32 %v238_v57 }
 0x226   :  { %v229_v58 = vpop.xlane.xlu2 %228 }
 0x227   :  { %v233_v59 = vsub.f32 %v217_v49, %v229_v58 }
 0x229   :  { %v8850_v60 = vpop.eup %8849  ;;  %v240_v61 = vmul.f32 1.442695, %v233_v59 }
 0x22a   :  { %v248_v62 = vsel %vm118_vm1, %v8850_v60, 0.0 }
 0x22b   :  { %8851 = vpow2.f32 %v240_v61  ;;  %249 = vadd.xlane.f32.xlu0 %v248_v62 }
 0x22e   :  { %v310_v63 = vpop.permute.xlu2 %309 }
 0x22f   :  { %v315_v0 = vsel %vm271_vm2, %v310_v63, 0 }
 0x230   :  { %324 = vmatpush.bf16.msrb.mxu0 %v315_v0 }
 0x231   :  { %v8852_v1 = vpop.eup %8851 }
 0x232   :  { %v251_v2 = vsel %vm118_vm1, %v8852_v1, 0.0 }
 0x233   :  { %252 = vadd.xlane.f32.xlu1 %v251_v2 }
 0x236   :  { %v331_v3 = vpop.permute.xlu2 %330 }
 0x237   :  { %v336_v4 = vsel %vm271_vm2, %v331_v3, 0 }
 0x238   :  { %345 = vmatpush.bf16.msra.mxu1 %v336_v4 }
 0x23e   :  { %v402_v5 = vpop.permute.xlu2 %401 }
 0x23f   :  { %v407_v6 = vsel %vm118_vm1, %v402_v5, 0  ;;  %399 = vrot.lane.b32.xlu0 %v9164_v23, %s9045_s22 }
 0x240   :  { %416 = vmatpush.bf16.xpose.msra.mxu0 %v407_v6 }
 0x246   :  { %v425_v7 = vpop.permute.xlu2 %424 }
 0x247   :  { %v430_v8 = vsel %vm118_vm1, %v425_v7, 0 }
 0x248   :  { %439 = vmatpush.bf16.xpose.msrb.mxu1 %v430_v8 }
 0x24c   :  { %422 = vrot.lane.b32.xlu1 %v9170_v28, %s9045_s22 }
 0x269   :  { %222 = vmax.xlane.f32.xlu0 %v221_v11 }
 0x27d   :  { %288 = vrot.lane.b32.xlu0 %v9158_v16, %s9043_s20 }
 0x27f   :  { %v220_v12 = vpop.xlane.xlu2 %219 }
 0x280   :  { %v230_v13 = vsub.f32 %v214_v53, %v220_v12 }
 0x282   :  { %v234_v14 = vmul.f32 1.442695, %v230_v13 }
 0x284   :  { %8853 = vpow2.f32 %v234_v14 }
 0x285   :  { %378 = vrot.lane.b32.xlu0 %v9158_v16, %s9044_s21 }
 0x28a   :  { %v8854_v15 = vpop.eup %8853 }
 0x28b   :  { %v242_v17 = vsel %vm118_vm1, %v8854_v15, 0.0 }
 0x28c   :  { %243 = vadd.xlane.f32.xlu1 %v242_v17 }
 0x29e   :  { %v250_v18 = vpop.xlane.xlu0 %249 }
 0x29f   :  { %8855 = vrcp.f32 %v250_v18 }
 0x2a5   :  { %v8856_v19 = vpop.eup %8855 }
 0x2a6   :  { %v253_v20 = vpop.xlane.xlu1 %252  ;;  %v260_v21 = vmul.f32 %v8856_v19, %v8850_v60 }
 0x2a7   :  { %8857 = vrcp.f32 %v253_v20 }
 0x2a8   :  { %v264_v24 = vpack.c.bf16 %v260_v21, %v260_v21 }
 0x2aa   :  { %6764 = vmatmul.msk.bf16.vlgmr.msrb.gmra.mxu0 %vm118_vm1, %v264_v24 }
 0x2ad   :  { %v8858_v25 = vpop.eup %8857 }
 0x2ae   :  { %v261_v26 = vmul.f32 %v8858_v25, %v8852_v1 }
 0x2b0   :  { %v265_v27 = vpack.c.bf16 %v261_v26, %v261_v26 }
 0x2b1   :  { %v400_v29 = vpop.permute.xlu0 %399 }
 0x2b2   :  { %6765 = vmatmul.msk.bf16.vlgmr.msra.gmra.mxu1 %vm118_vm1, %v265_v27 }
 0x2ba   :  { %6768 = vmatmul.msk.bf16.vlgmr.msra.gmra.mxu0 %vm118_vm1, %v400_v29 }
 0x2be   :  { %v423_v30 = vpop.permute.xlu1 %422 }
 0x2c2   :  { %6769 = vmatmul.msk.bf16.vlgmr.msrb.gmra.mxu1 %vm118_vm1, %v423_v30 }
 0x2dc   :  { %v223_v31 = vpop.xlane.xlu0 %222 }
 0x2dd   :  { %v231_v32 = vsub.f32 %v215_v10, %v223_v31 }
 0x2df   :  { %v236_v33 = vmul.f32 1.442695, %v231_v32 }
 0x2e1   :  { %8859 = vpow2.f32 %v236_v33 }
 0x2e7   :  { %v8860_v34 = vpop.eup %8859 }
 0x2e8   :  { %v245_v35 = vsel %vm118_vm1, %v8860_v34, 0.0 }
 0x2e9   :  { %246 = vadd.xlane.f32.xlu2 %v245_v35 }
 0x2ef   :  { %v289_v36 = vpop.permute.xlu0 %288 }
 0x2f0   :  { %v294_v37 = vsel %vm271_vm2, %v289_v36, 0 }
 0x2f1   :  { %303 = vmatpush.bf16.msra.mxu3 %v294_v37 }
 0x2f7   :  { %v379_v38 = vpop.permute.xlu0 %378 }
 0x2f8   :  { %v384_v39 = vsel %vm118_vm1, %v379_v38, 0 }
 0x2f9   :  { %393 = vmatpush.bf16.xpose.msrb.mxu3 %v384_v39 }
 0x2ff   :  { %v244_v56 = vpop.xlane.xlu1 %243 }
 0x300   :  { %8861 = vrcp.f32 %v244_v56 }
 0x301   :  { %266 = vrot.lane.b32.xlu2 %v9162_v22, %s9043_s20 }
 0x306   :  { %v8862_v58 = vpop.eup %8861 }
 0x307   :  { %v258_v60 = vmul.f32 %v8862_v58, %v8854_v15 }
 0x309   :  { %355 = vrot.lane.b32.xlu2 %v9162_v22, %s9044_s21  ;;  %v262_v1 = vpack.c.bf16 %v258_v60, %v258_v60 }
 0x311   :  { %376 = vrot.lane.b32.xlu2 %v9158_v16, %s9045_s22 }
 0x327   :  { %v9231_v40 = vpop.f32.mrf.mxu0 }
 0x32f   :  { %v328_v41 = vpop.f32.mrf.mxu0  ;;  %v9233_v42 = vpop.f32.mrf.mxu1 }
 0x330   :  { %v352_v43 = vpack.c.bf16 %v9233_v42, %v9231_v40 }
 0x337   :  { %v349_v45 = vpop.f32.mrf.mxu1  ;;  %v418_v46 = vpop.f32.mrf.mxu0 }
 0x338   :  { %v447_v51 = vmul.f32 0.35355338, %v418_v46 }
 0x33a   :  { %v451_v54 = vadd.f32 %v447_v51, %v9185_v44 }
 0x33c   :  { %v459_v55 = vsel %vm118_vm1, %v451_v54, -inf }
 0x33f   :  { %v420_v47 = vpop.f32.mrf.mxu0  ;;  %v441_v48 = vpop.f32.mrf.mxu1 }
 0x340   :  { %v448_v49 = vmul.f32 0.35355338, %v441_v48 }
 0x342   :  { %v452_v50 = vadd.f32 %v448_v49, %v9185_v44 }
 0x344   :  { %v462_v52 = vsel %vm118_vm1, %v452_v50, -inf }
 0x345   :  { %463 = vmax.xlane.f32.xlu1 %v462_v52 }
 0x347   :  { %v443_v53 = vpop.f32.mrf.mxu1 }
 0x34d   :  { %460 = vmax.xlane.f32.xlu1 %v459_v55 }
 0x35c   :  { %v247_v57 = vpop.xlane.xlu2 %246 }
 0x35d   :  { %8863 = vrcp.f32 %v247_v57 }
 0x363   :  { %v8864_v59 = vpop.eup %8863 }
 0x364   :  { %v259_v61 = vmul.f32 %v8864_v59, %v8860_v34  ;;  %v267_v62 = vpop.permute.xlu2 %266 }
 0x365   :  { %v273_v63 = vsel %vm271_vm2, %v267_v62, 0 }
 0x366   :  { %v263_v0 = vpack.c.bf16 %v259_v61, %v259_v61  ;;  %353 = vrot.lane.b32.xlu1 %v9162_v22, %s9045_s22  ;;  %282 = vmatpush.bf16.msra.mxu2 %v273_v63 }
 0x368   :  { %6763 = vmatmul.msk.bf16.vlgmr.msra.gmra.mxu3 %vm118_vm1, %v263_v0 }
 0x369   :  { %6762 = vmatmul.msk.bf16.vlgmr.msra.gmra.mxu2 %vm118_vm1, %v262_v1 }
 0x36c   :  { %v356_v2 = vpop.permute.xlu2 %355 }
 0x36d   :  { %v361_v3 = vsel %vm118_vm1, %v356_v2, 0 }
 0x36e   :  { %543 = vrot.lane.b32.xlu1 %v9164_v23, %s11547_s23  ;;  %370 = vmatpush.bf16.xpose.msrb.mxu2 %v361_v3 }
 0x374   :  { %v377_v4 = vpop.permute.xlu2 %376 }
 0x376   :  { %564 = vrot.lane.b32.xlu1 %v9170_v28, %s11547_s23 }
 0x378   :  { %6767 = vmatmul.msk.bf16.vlgmr.msrb.gmra.mxu3 %vm118_vm1, %v377_v4 }
 0x37e   :  { %645 = vrot.lane.b32.xlu1 %v9162_v22, %s9047_s24 }
 0x386   :  { %643 = vrot.lane.b32.xlu1 %v9162_v22, %s11549_s25 }
 0x38e   :  { %691 = vrot.lane.b32.xlu1 %v9164_v23, %s9047_s24 }
 0x396   :  { %689 = vrot.lane.b32.xlu1 %v9164_v23, %s11549_s25 }
 0x39e   :  { %712 = vrot.lane.b32.xlu1 %v9170_v28, %s11549_s25 }
 0x3b8   :  { %v464_v5 = vpop.xlane.xlu1 %463 }
 0x3b9   :  { %v468_v6 = vsub.f32 %v452_v50, %v464_v5 }
 0x3bb   :  { %v475_v7 = vmul.f32 1.442695, %v468_v6 }
 0x3bd   :  { %8865 = vpow2.f32 %v475_v7 }
 0x3c0   :  { %v461_v8 = vpop.xlane.xlu1 %460 }
 0x3c1   :  { %v467_v9 = vsub.f32 %v451_v54, %v461_v8 }
 0x3c3   :  { %v8866_v10 = vpop.eup %8865  ;;  %v473_v11 = vmul.f32 1.442695, %v467_v9 }
 0x3c4   :  { %v486_v12 = vsel %vm118_vm1, %v8866_v10, 0.0 }
 0x3c5   :  { %8867 = vpow2.f32 %v473_v11  ;;  %487 = vadd.xlane.f32.xlu2 %v486_v12 }
 0x3cb   :  { %v8868_v13 = vpop.eup %8867 }
 0x3cc   :  { %v483_v14 = vsel %vm118_vm1, %v8868_v13, 0.0 }
 0x3cd   :  { %484 = vadd.xlane.f32.xlu0 %v483_v14 }
 0x3d8   :  { %v354_v15 = vpop.permute.xlu1 %353 }
 0x3d9   :  { %6766 = vmatmul.msk.bf16.vlgmr.msrb.gmra.mxu2 %vm118_vm1, %v354_v15 }
 0x3dd   :  { %666 = vrot.lane.b32.xlu2 %v9158_v16, %s11549_s25 }
 0x3e0   :  { %v544_v17 = vpop.permute.xlu1 %543 }
 0x3e1   :  { %v549_v18 = vsel %vm271_vm2, %v544_v17, 0  ;;  %668 = vrot.lane.b32.xlu0 %v9158_v16, %s9047_s24 }
 0x3e2   :  { %558 = vmatpush.bf16.msrb.mxu0 %v549_v18 }
 0x3e8   :  { %v565_v19 = vpop.permute.xlu1 %564 }
 0x3e9   :  { %v570_v20 = vsel %vm271_vm2, %v565_v19, 0  ;;  %714 = vrot.lane.b32.xlu0 %v9170_v28, %s9047_s24 }
 0x3ea   :  { %579 = vmatpush.bf16.msra.mxu1 %v570_v20 }
 0x3eb   :  { %v9273_v21 = vpop.f32.mrf.mxu3 }
 0x3ec   :  { %v9275_v24 = vpop.f32.mrf.mxu2 }
 0x3ed   :  { %v351_v25 = vpack.c.bf16 %v9273_v21, %v9275_v24  ;;  %v106_v24 = vld [vmem:[%s11527_s4 + $0x4] sm:$0xf] }
 0x3f0   :  { %v646_v26 = vpop.permute.xlu1 %645 }
 0x3f1   :  { %v651_v27 = vsel %vm118_vm1, %v646_v26, 0 }
 0x3f2   :  { %660 = vmatpush.bf16.xpose.msra.mxu0 %v651_v27 }
 0x3f3   :  { %v307_v29 = vpop.f32.mrf.mxu3 }
 0x3f4   :  { %v286_v30 = vpop.f32.mrf.mxu2 }
 0x3f8   :  { %v644_v38 = vpop.permute.xlu1 %643 }
 0x3fb   :  { %v395_v31 = vpop.f32.mrf.mxu3 }
 0x3fc   :  { %v446_v32 = vmul.f32 0.35355338, %v395_v31 }
 0x3fe   :  { %v450_v33 = vadd.f32 %v446_v32, %v9185_v44 }
 0x400   :  { %v456_v35 = vsel %vm118_vm1, %v450_v33, -inf  ;;  %v692_v48 = vpop.permute.xlu1 %691 }
 0x401   :  { %v697_v50 = vsel %vm118_vm1, %v692_v48, 0 }
 0x403   :  { %v397_v34 = vpop.f32.mrf.mxu3 }
 0x406   :  { %457 = vmax.xlane.f32.xlu2 %v456_v35 }
 0x408   :  { %v690_v59 = vpop.permute.xlu1 %689 }
 0x410   :  { %v713_v62 = vpop.permute.xlu1 %712 }
 0x438   :  { %v488_v36 = vpop.xlane.xlu2 %487 }
 0x439   :  { %8869 = vrcp.f32 %v488_v36 }
 0x43f   :  { %v8870_v37 = vpop.eup %8869 }
 0x440   :  { %v496_v39 = vmul.f32 %v8870_v37, %v8866_v10  ;;  %v485_v41 = vpop.xlane.xlu0 %484  ;;  %v667_v53 = vpop.permute.xlu2 %666 }
 0x441   :  { %8871 = vrcp.f32 %v485_v41 }
 0x442   :  { %v500_v45 = vpack.c.bf16 %v496_v39, %v496_v39 }
 0x444   :  { %6773 = vmatmul.msk.bf16.vlgmr.msra.gmra.mxu1 %vm118_vm1, %v500_v45 }
 0x447   :  { %v8872_v46 = vpop.eup %8871 }
 0x448   :  { %v495_v47 = vmul.f32 %v8872_v46, %v8868_v13 }
 0x44a   :  { %v499_v49 = vpack.c.bf16 %v495_v47, %v495_v47 }
 0x44c   :  { %6772 = vmatmul.msk.bf16.vlgmr.msrb.gmra.mxu0 %vm118_vm1, %v499_v49 }
 0x44d   :  { %706 = vmatpush.bf16.xpose.msrb.mxu0 %v697_v50 }
 0x453   :  { %v669_v51 = vpop.permute.xlu0 %668 }
 0x454   :  { %v674_v52 = vsel %vm118_vm1, %v669_v51, 0 }
 0x455   :  { %683 = vmatpush.bf16.xpose.msrb.mxu1 %v674_v52 }
 0x45b   :  { %v715_v54 = vpop.permute.xlu0 %714 }
 0x45c   :  { %v720_v55 = vsel %vm118_vm1, %v715_v54, 0  ;;  %v372_v56 = vpop.f32.mrf.mxu2  ;;  %6778 = vmatmul.msk.bf16.vlgmr.msra.gmra.mxu0 %vm118_vm1, %v644_v38  ;;  %6779 = vmatmul.msk.bf16.vlgmr.msrb.gmra.mxu1 %vm118_vm1, %v667_v53 }
 0x45d   :  { %v445_v57 = vmul.f32 0.35355338, %v372_v56  ;;  %729 = vmatpush.bf16.xpose.msra.mxu1 %v720_v55 }
 0x45f   :  { %v449_v58 = vadd.f32 %v445_v57, %v9185_v44 }
 0x461   :  { %v453_v60 = vsel %vm118_vm1, %v449_v58, -inf }
 0x462   :  { %454 = vmax.xlane.f32.xlu0 %v453_v60 }
 0x464   :  { %v374_v61 = vpop.f32.mrf.mxu2 }
 0x46c   :  { %6780 = vmatmul.msk.bf16.vlgmr.msrb.gmra.mxu0 %vm118_vm1, %v690_v59  ;;  %6781 = vmatmul.msk.bf16.vlgmr.msra.gmra.mxu1 %vm118_vm1, %v713_v62  ;;  %v105_v59 = vld [vmem:[%s11527_s4] sm:$0xf] }
 0x476   :  { %501 = vrot.lane.b32.xlu0 %v9162_v22, %s11547_s23 }
 0x479   :  { %v458_v63 = vpop.xlane.xlu2 %457 }
 0x47a   :  { %v466_v0 = vsub.f32 %v450_v33, %v458_v63 }
 0x47c   :  { %v471_v1 = vmul.f32 1.442695, %v466_v0  ;;  %v622_v0 = vsel %vm271_vm2, %v105_v59, 0 }
 0x47e   :  { %8873 = vpow2.f32 %v471_v1 }
 0x484   :  { %v9295_v2 = vpop.eup %8873 }
 0x485   :  { %v480_v3 = vsel %vm118_vm1, %v9295_v2, 0.0 }
 0x486   :  { %481 = vadd.xlane.f32.xlu2 %v480_v3 }
 0x4c1   :  { %v9299_v4 = vpop.f32.mrf.mxu1 }
 0x4c9   :  { %v9301_v5 = vpop.f32.mrf.mxu0  ;;  %v583_v6 = vpop.f32.mrf.mxu1 }
 0x4ca   :  { %v586_v7 = vpack.c.bf16 %v9299_v4, %v9301_v5 }
 0x4d1   :  { %v562_v8 = vpop.f32.mrf.mxu0 }
 0x4d5   :  { %v455_v9 = vpop.xlane.xlu0 %454 }
 0x4d6   :  { %v465_v10 = vsub.f32 %v449_v58, %v455_v9 }
 0x4d8   :  { %v469_v11 = vmul.f32 1.442695, %v465_v10 }
 0x4d9   :  { %v9305_v12 = vpop.f32.mrf.mxu0  ;;  %v685_v13 = vpop.f32.mrf.mxu1 }
 0x4da   :  { %8875 = vpow2.f32 %v469_v11  ;;  %v736_v14 = vmul.f32 0.35355338, %v685_v13 }
 0x4dc   :  { %v740_v15 = vadd.f32 %v736_v14, %v9185_v44 }
 0x4de   :  { %v746_v17 = vsel %vm118_vm1, %v740_v15, -inf }
 0x4df   :  { %747 = vmax.xlane.f32.xlu2 %v746_v17 }
 0x4e0   :  { %v8876_v18 = vpop.eup %8875 }
 0x4e1   :  { %v664_v19 = vpop.f32.mrf.mxu0  ;;  %v687_v20 = vpop.f32.mrf.mxu1  ;;  %v477_v26 = vsel %vm118_vm1, %v8876_v18, 0.0 }
 0x4e2   :  { %478 = vadd.xlane.f32.xlu1 %v477_v26 }
 0x4e8   :  { %v502_v27 = vpop.permute.xlu0 %501 }
 0x4e9   :  { %v507_v29 = vsel %vm271_vm2, %v502_v27, 0  ;;  %v708_v30 = vpop.f32.mrf.mxu0  ;;  %v731_v31 = vpop.f32.mrf.mxu1  ;;  %v735_v27 = vmul.f32 0.35355338, %v9305_v12 }
 0x4ea   :  { %v738_v32 = vmul.f32 0.35355338, %v731_v31  ;;  %516 = vmatpush.bf16.msra.mxu2 %v507_v29  ;;  %v737_v37 = vmul.f32 0.35355338, %v708_v30 }
 0x4ec   :  { %v742_v33 = vadd.f32 %v738_v32, %v9185_v44  ;;  %v741_v38 = vadd.f32 %v737_v37, %v9185_v44 }
 0x4ee   :  { %v752_v34 = vsel %vm118_vm1, %v742_v33, -inf  ;;  %v749_v39 = vsel %vm118_vm1, %v741_v38, -inf }
 0x4ef   :  { %753 = vmax.xlane.f32.xlu0 %v752_v34 }
 0x4f1   :  { %v710_v35 = vpop.f32.mrf.mxu0  ;;  %v733_v36 = vpop.f32.mrf.mxu1 }
 0x4f2   :  { %v739_v35 = vadd.f32 %v735_v27, %v9185_v44 }
 0x4f7   :  { %911 = vrot.lane.b32.xlu2 %v9162_v22, %s11543_s26 }
 0x4f9   :  { %v482_v41 = vpop.xlane.xlu2 %481 }
 0x4fb   :  { %522 = vrot.lane.b32.xlu1 %v9158_v16, %s11547_s23 }
 0x4ff   :  { %854 = vrot.lane.b32.xlu2 %v9170_v28, %s11545_s27 }
 0x503   :  { %909 = vrot.lane.b32.xlu0 %v9162_v22, %s11541_s28  ;;  %812 = vrot.lane.b32.xlu1 %v9158_v16, %s11545_s27 }
 0x507   :  { %934 = vrot.lane.b32.xlu2 %v9158_v16, %s11543_s26 }
 0x50b   :  { %932 = vrot.lane.b32.xlu0 %v9158_v16, %s11541_s28  ;;  %833 = vrot.lane.b32.xlu1 %v9164_v23, %s11545_s27 }
 0x513   :  { %955 = vrot.lane.b32.xlu0 %v9164_v23, %s11541_s28 }
 0x530   :  { %750 = vmax.xlane.f32.xlu2 %v749_v39  ;;  %v743_v39 = vsel %vm118_vm1, %v739_v35, -inf }
 0x548   :  { %980 = vrot.lane.b32.xlu2 %v9170_v28, %s11543_s26 }
 0x552   :  { %v748_v45 = vpop.xlane.xlu2 %747 }
 0x553   :  { %v756_v50 = vsub.f32 %v740_v15, %v748_v45 }
 0x555   :  { %v479_v46 = vpop.xlane.xlu1 %478  ;;  %v761_v52 = vmul.f32 1.442695, %v756_v50 }
 0x556   :  { %8877 = vrcp.f32 %v479_v46 }
 0x557   :  { %8879 = vrcp.f32 %v482_v41 }
 0x558   :  { %8881 = vpow2.f32 %v761_v52 }
 0x55a   :  { %v912_v47 = vpop.permute.xlu2 %911 }
 0x55b   :  { %v917_v15 = vsel %vm118_vm1, %v912_v47, 0 }
 0x55c   :  { %v8878_v48 = vpop.eup %8877 }
 0x55d   :  { %v493_v49 = vmul.f32 %v8878_v48, %v8876_v18  ;;  %v8880_v58 = vpop.eup %8879 }
 0x55e   :  { %v8882_v60 = vpop.eup %8881  ;;  %v494_v61 = vmul.f32 %v8880_v58, %v9295_v2 }
 0x55f   :  { %v497_v51 = vpack.c.bf16 %v493_v49, %v493_v49  ;;  %v770_v8 = vsel %vm118_vm1, %v8882_v60, 0.0 }
 0x560   :  { %v498_v6 = vpack.c.bf16 %v494_v61, %v494_v61 }
 0x561   :  { %6770 = vmatmul.msk.bf16.vlgmr.msra.gmra.mxu2 %vm118_vm1, %v497_v51 }
 0x562   :  { %v855_v53 = vpop.permute.xlu2 %854  ;;  %v754_v54 = vpop.xlane.xlu0 %753 }
 0x563   :  { %v860_v55 = vsel %vm271_vm2, %v855_v53, 0  ;;  %v758_v56 = vsub.f32 %v742_v33, %v754_v54 }
 0x564   :  { %869 = vmatpush.bf16.msrb.mxu1 %v860_v55 }
 0x565   :  { %v765_v57 = vmul.f32 1.442695, %v758_v56 }
 0x567   :  { %8883 = vpow2.f32 %v765_v57 }
 0x56a   :  { %v935_v10 = vpop.permute.xlu2 %934 }
 0x56b   :  { %v940_v14 = vsel %vm118_vm1, %v935_v10, 0 }
 0x56d   :  { %v8884_v62 = vpop.eup %8883  ;;  %v523_v63 = vpop.permute.xlu1 %522 }
 0x56e   :  { %v528_v1 = vsel %vm271_vm2, %v523_v63, 0  ;;  %v776_v3 = vsel %vm118_vm1, %v8884_v62, 0.0 }
 0x56f   :  { %537 = vmatpush.bf16.msra.mxu3 %v528_v1  ;;  %777 = vadd.xlane.f32.xlu1 %v776_v3 }
 0x571   :  { %771 = vadd.xlane.f32.xlu2 %v770_v8 }
 0x572   :  { %6771 = vmatmul.msk.bf16.vlgmr.msra.gmra.mxu3 %vm118_vm1, %v498_v6 }
 0x573   :  { %631 = vmatpush.bf16.msrb.mxu3 %v622_v0 }
 0x575   :  { %v813_v9 = vpop.permute.xlu1 %812  ;;  %v910_v36 = vpop.permute.xlu0 %909 }
 0x576   :  { %v818_v2 = vsel %vm271_vm2, %v813_v9, 0 }
 0x577   :  { %827 = vmatpush.bf16.msra.mxu3 %v818_v2 }
 0x57d   :  { %v834_v11 = vpop.permute.xlu1 %833  ;;  %v933_v45 = vpop.permute.xlu0 %932 }
 0x57e   :  { %v839_v13 = vsel %vm271_vm2, %v834_v11, 0 }
 0x57f   :  { %848 = vmatpush.bf16.msra.mxu0 %v839_v13 }
 0x582   :  { %6776 = vmatmul.msk.bf16.vlgmr.msrb.gmra.mxu3 %vm118_vm1, %v351_v25  ;;  %v594_v25 = vsel %vm271_vm2, %v106_v24, 0 }
 0x583   :  { %949 = vmatpush.bf16.xpose.msrb.mxu0 %v940_v14  ;;  %926 = vmatpush.bf16.xpose.msrb.mxu3 %v917_v15 }
 0x584   :  { %603 = vmatpush.bf16.msrb.mxu2 %v594_v25 }
 0x585   :  { %v956_v49 = vpop.permute.xlu0 %955 }
 0x588   :  { %957 = vrot.lane.b32.xlu1 %v9164_v23, %s11543_s26  ;;  %s11556_s26 = smov 40  }
 0x590   :  { %791 = vrot.lane.b32.xlu1 %v9162_v22, %s11545_s27 }
 0x592   :  { %6777 = vmatmul.msk.bf16.gmra.mxu3 %vm118_vm1, %v352_v43 }
 0x5a3   :  { %v751_v17 = vpop.xlane.xlu2 %750 }
 0x5a4   :  { %v757_v18 = vsub.f32 %v741_v38, %v751_v17 }
 0x5a6   :  { %v763_v19 = vmul.f32 1.442695, %v757_v18 }
 0x5a8   :  { %8885 = vpow2.f32 %v763_v19 }
 0x5ab   :  { %v981_v40 = vpop.permute.xlu2 %980 }
 0x5ac   :  { %v986_v38 = vsel %vm118_vm1, %v981_v40, 0 }
 0x5ae   :  { %v8886_v20 = vpop.eup %8885 }
 0x5af   :  { %v773_v21 = vsel %vm118_vm1, %v8886_v20, 0.0 }
 0x5b0   :  { %774 = vadd.xlane.f32.xlu2 %v773_v21 }
 0x5c8   :  { %978 = vrot.lane.b32.xlu2 %v9170_v28, %s11541_s28 }
 0x5e2   :  { %v778_v42 = vpop.xlane.xlu1 %777 }
 0x5e3   :  { %8887 = vrcp.f32 %v778_v42 }
 0x5e4   :  { %v772_v43 = vpop.xlane.xlu2 %771  ;;  %v518_v26 = vpop.f32.mrf.mxu2 }
 0x5e5   :  { %8889 = vrcp.f32 %v772_v43 }
 0x5e9   :  { %v8888_v29 = vpop.eup %8887 }
 0x5ea   :  { %v786_v30 = vmul.f32 %v8888_v29, %v8884_v62 }
 0x5eb   :  { %v8890_v31 = vpop.eup %8889 }
 0x5ec   :  { %v790_v32 = vpack.c.bf16 %v786_v30, %v786_v30  ;;  %v784_v33 = vmul.f32 %v8890_v31, %v8882_v60  ;;  %v520_v34 = vpop.f32.mrf.mxu2 }
 0x5ee   :  { %v788_v37 = vpack.c.bf16 %v784_v33, %v784_v33  ;;  %6785 = vmatmul.msk.bf16.vlgmr.msrb.gmra.mxu1 %vm118_vm1, %v790_v32 }
 0x5f0   :  { %6783 = vmatmul.msk.bf16.vlgmr.msra.gmra.mxu3 %vm118_vm1, %v788_v37 }
 0x5f1   :  { %995 = vmatpush.bf16.xpose.msra.mxu3 %v986_v38  ;;  %744 = vmax.xlane.f32.xlu2 %v743_v39 }
 0x5f5   :  { %v539_v12 = vpop.f32.mrf.mxu3 }
 0x5f6   :  { %v585_v41 = vpack.c.bf16 %v539_v12, %v518_v26 }
 0x5f8   :  { %6774 = vmatmul.msk.bf16.vlgmr.msrb.gmra.mxu2 %vm118_vm1, %v585_v41 }
 0x5fa   :  { %v958_v46 = vpop.permute.xlu1 %957 }
 0x5fb   :  { %v963_v47 = vsel %vm118_vm1, %v958_v46, 0 }
 0x5fc   :  { %972 = vmatpush.bf16.xpose.msra.mxu1 %v963_v47 }
 0x5fd   :  { %v541_v48 = vpop.f32.mrf.mxu3 }
 0x600   :  { %6788 = vmatmul.msk.bf16.vlgmr.msrb.gmra.mxu3 %vm118_vm1, %v910_v36 }
 0x602   :  { %v792_v50 = vpop.permute.xlu1 %791 }
 0x603   :  { %v797_v51 = vsel %vm271_vm2, %v792_v50, 0  ;;  %6790 = vmatmul.msk.bf16.vlgmr.msra.gmra.mxu1 %vm118_vm1, %v956_v49 }
 0x604   :  { %806 = vmatpush.bf16.msra.mxu2 %v797_v51 }
 0x605   :  { %v9387_v57 = vpop.f32.mrf.mxu3 }
 0x608   :  { %6775 = vmatmul.msk.bf16.gmra.mxu2 %vm118_vm1, %v586_v7 }
 0x60d   :  { %v9389_v58 = vpop.f32.mrf.mxu3 }
 0x615   :  { %v9391_v59 = vpop.f32.mrf.mxu3 }
 0x61d   :  { %v9393_v60 = vpop.f32.mrf.mxu3 }
 0x623   :  { %v775_v52 = vpop.xlane.xlu2 %774 }
 0x624   :  { %8891 = vrcp.f32 %v775_v52 }
 0x62a   :  { %v8892_v53 = vpop.eup %8891 }
 0x62b   :  { %v785_v54 = vmul.f32 %v8892_v53, %v8886_v20  ;;  %v979_v55 = vpop.permute.xlu2 %978 }
 0x62c   :  { %6791 = vmatmul.msk.bf16.vlgmr.msra.gmra.mxu3 %vm118_vm1, %v979_v55 }
 0x62d   :  { %v789_v56 = vpack.c.bf16 %v785_v54, %v785_v54 }
 0x62f   :  { %6784 = vmatmul.msk.bf16.vlgmr.msra.gmra.mxu0 %vm118_vm1, %v789_v56 }
 0x63f   :  { %6789 = vmatmul.msk.bf16.vlgmr.msrb.gmra.mxu0 %vm118_vm1, %v933_v45 }
 0x664   :  { %v745_v4 = vpop.xlane.xlu2 %744 }
 0x665   :  { %v755_v5 = vsub.f32 %v739_v35, %v745_v4 }
 0x667   :  { %v759_v7 = vmul.f32 1.442695, %v755_v5 }
 0x669   :  { %8893 = vpow2.f32 %v759_v7 }
 0x66b   :  { %v9395_v61 = vpop.f32.mrf.mxu1 }
 0x66f   :  { %v8894_v62 = vpop.eup %8893 }
 0x670   :  { %v767_v63 = vsel %vm118_vm1, %v8894_v62, 0.0 }
 0x671   :  { %768 = vadd.xlane.f32.xlu0 %v767_v63 }
 0x673   :  { %v9398_v0 = vpop.f32.mrf.mxu3  ;;  %v873_v1 = vpop.f32.mrf.mxu1 }
 0x67b   :  { %v831_v3 = vpop.f32.mrf.mxu3  ;;  %v605_v5 = vpop.f32.mrf.mxu2 }
 0x680   :  { %v974_v6 = vpop.f32.mrf.mxu1 }
 0x681   :  { %v1003_v8 = vmul.f32 0.35355338, %v974_v6 }
 0x683   :  { %v928_v9 = vpop.f32.mrf.mxu3  ;;  %v1007_v2 = vadd.f32 %v1003_v8, %v9185_v44 }
 0x684   :  { %v1001_v10 = vmul.f32 0.35355338, %v928_v9 }
 0x685   :  { %v1015_v11 = vsel %vm118_vm1, %v1007_v2, -inf }
 0x686   :  { %1016 = vmax.xlane.f32.xlu0 %v1015_v11  ;;  %v1005_v13 = vadd.f32 %v1001_v10, %v9185_v44 }
 0x688   :  { %v976_v14 = vpop.f32.mrf.mxu1  ;;  %v1009_v15 = vsel %vm118_vm1, %v1005_v13, -inf }
 0x689   :  { %1010 = vmax.xlane.f32.xlu1 %v1009_v15 }
 0x68b   :  { %v930_v17 = vpop.f32.mrf.mxu3 }
 0x69a   :  { %1057 = vrot.lane.b32.xlu0 %v9162_v22, %s11539_s19 }
 0x6ac   :  { %v9406_v18 = vpop.f32.mrf.mxu0 }
 0x6ad   :  { %v876_v19 = vpack.c.bf16 %v9395_v61, %v9406_v18 }
 0x6af   :  { %v997_v20 = vpop.f32.mrf.mxu3 }
 0x6b0   :  { %v1004_v43 = vmul.f32 0.35355338, %v997_v20 }
 0x6b2   :  { %v1008_v29 = vadd.f32 %v1004_v43, %v9185_v44 }
 0x6b4   :  { %v852_v21 = vpop.f32.mrf.mxu0  ;;  %v1018_v22 = vsel %vm118_vm1, %v1008_v29, -inf }
 0x6b7   :  { %v999_v24 = vpop.f32.mrf.mxu3 }
 0x6bc   :  { %v951_v25 = vpop.f32.mrf.mxu0 }
 0x6bd   :  { %v1002_v40 = vmul.f32 0.35355338, %v951_v25 }
 0x6bf   :  { %v1006_v42 = vadd.f32 %v1002_v40, %v9185_v44 }
 0x6c1   :  { %v1012_v26 = vsel %vm118_vm1, %v1006_v42, -inf }
 0x6c2   :  { %1013 = vmax.xlane.f32.xlu2 %v1012_v26 }
 0x6c4   :  { %v953_v27 = vpop.f32.mrf.mxu0 }
 0x6c5   :  { %v634_v27 = vadd.f32 %v9387_v57, %v605_v5 }
 0x6ca   :  { %1019 = vmax.xlane.f32.xlu2 %v1018_v22 }
 0x6e4   :  { %v769_v30 = vpop.xlane.xlu0 %768 }
 0x6e5   :  { %8895 = vrcp.f32 %v769_v30 }
 0x6eb   :  { %v8896_v31 = vpop.eup %8895 }
 0x6ec   :  { %v783_v32 = vmul.f32 %v8896_v31, %v8894_v62  ;;  %v9426_v62 = vpop.f32.mrf.mxu2 }
 0x6ee   :  { %v787_v33 = vpack.c.bf16 %v783_v32, %v783_v32 }
 0x6f0   :  { %6782 = vmatmul.msk.bf16.vlgmr.msra.gmra.mxu2 %vm118_vm1, %v787_v33 }
 0x6f4   :  { %v610_v63 = vpop.f32.mrf.mxu2 }
 0x6f5   :  { %v639_v32 = vadd.f32 %v9391_v59, %v610_v63 }
 0x6f9   :  { %v1017_v34 = vpop.xlane.xlu0 %1016 }
 0x6fa   :  { %v1023_v35 = vsub.f32 %v1007_v2, %v1017_v34 }
 0x6fc   :  { %v1029_v36 = vmul.f32 1.442695, %v1023_v35  ;;  %v1011_v37 = vpop.xlane.xlu1 %1010  ;;  %v9432_v1 = vpop.f32.mrf.mxu2 }
 0x6fd   :  { %v1021_v38 = vsub.f32 %v1005_v13, %v1011_v37 }
 0x6fe   :  { %8897 = vpow2.f32 %v1029_v36 }
 0x6ff   :  { %v1025_v39 = vmul.f32 1.442695, %v1021_v38  ;;  %v108_v38 = vld [vmem:[%s11527_s4 + $0xc] sm:$0xf] }
 0x701   :  { %8899 = vpow2.f32 %v1025_v39  ;;  %v1150_v39 = vsel %vm271_vm2, %v108_v38, 0 }
 0x704   :  { %v8898_v12 = vpop.eup %8897 }
 0x705   :  { %v1039_v44 = vsel %vm118_vm1, %v8898_v12, 0.0 }
 0x706   :  { %1040 = vadd.xlane.f32.xlu1 %v1039_v44 }
 0x707   :  { %v8900_v41 = vpop.eup %8899 }
 0x708   :  { %v1033_v45 = vsel %vm118_vm1, %v8900_v41, 0.0 }
 0x709   :  { %1034 = vadd.xlane.f32.xlu0 %v1033_v45 }
 0x70c   :  { %v1058_v46 = vpop.permute.xlu0 %1057 }
 0x70d   :  { %v1063_v47 = vsel %vm271_vm2, %v1058_v46, 0 }
 0x70e   :  { %1072 = vmatpush.bf16.msra.mxu0 %v1063_v47  ;;  %v8835_v47 = vld [vmem:[%s11528_s5] ss:$0 sm:$0xff] }
 0x712   :  { %1159 = vmatpush.bf16.msrb.mxu0 %v1150_v39  ;;  %v6864_v39 = vld [vmem:[%s11531_s8 + $0x80] sm:$0xf] }
 0x71d   :  { %1099 = vrot.lane.b32.xlu0 %v9164_v23, %s11539_s19  ;;  %v107_v23 = vld [vmem:[%s11527_s4 + $0x8] sm:$0xf] }
 0x71e   :  { %v884_v7 = vsel %vm271_vm2, %v107_v23, 0  ;;  %v9012_v23 = vld [vmem:[%s11523_s0 + $0x8] sm:$0xff] }
 0x71f   :  { %893 = vmatpush.bf16.msrb.mxu2 %v884_v7 }
 0x735   :  { %v1014_v48 = vpop.xlane.xlu2 %1013 }
 0x736   :  { %v1022_v49 = vsub.f32 %v1006_v42, %v1014_v48 }
 0x738   :  { %v1027_v50 = vmul.f32 1.442695, %v1022_v49 }
 0x73a   :  { %8901 = vpow2.f32 %v1027_v50 }
 0x73d   :  { %v1020_v51 = vpop.xlane.xlu2 %1019 }
 0x73e   :  { %v1024_v52 = vsub.f32 %v1008_v29, %v1020_v51  ;;  %v636_v51 = vadd.f32 %v9389_v58, %v9426_v62 }
 0x740   :  { %v8902_v53 = vpop.eup %8901  ;;  %v1031_v54 = vmul.f32 1.442695, %v1024_v52  ;;  %v9011_v52 = vld [vmem:[%s11523_s0] sm:$0xff] }
 0x741   :  { %v1036_v55 = vsel %vm118_vm1, %v8902_v53, 0.0 }
 0x742   :  { %8903 = vpow2.f32 %v1031_v54  ;;  %1037 = vadd.xlane.f32.xlu2 %v1036_v55 }
 0x748   :  { %v8904_v56 = vpop.eup %8903 }
 0x749   :  { %v1042_v4 = vsel %vm118_vm1, %v8904_v56, 0.0 }
 0x74a   :  { %1043 = vadd.xlane.f32.xlu1 %v1042_v4 }
 0x75a   :  { %1078 = vrot.lane.b32.xlu2 %v9158_v16, %s11539_s19 }
 0x763   :  { %1120 = vrot.lane.b32.xlu1 %v9170_v28, %s11539_s19 }
 0x773   :  { %v808_v3 = vpop.f32.mrf.mxu2 }
 0x774   :  { %v875_v6 = vpack.c.bf16 %v9398_v0, %v808_v3 }
 0x776   :  { %6786 = vmatmul.msk.bf16.vlgmr.msrb.gmra.mxu2 %vm118_vm1, %v875_v6  ;;  %v641_v6 = vadd.f32 %v9393_v60, %v9432_v1  ;;  %v9053_v60 = vmov 32.0  }
 0x779   :  { %v1041_v10 = vpop.xlane.xlu1 %1040 }
 0x77b   :  { %v810_v8 = vpop.f32.mrf.mxu2 }
 0x77c   :  { %v1035_v9 = vpop.xlane.xlu0 %1034  ;;  %v9013_v8 = vld [vmem:[%s11523_s0 + $0x10] sm:$0xff] }
 0x77d   :  { %8905 = vrcp.f32 %v1035_v9 }
 0x77e   :  { %8907 = vrcp.f32 %v1041_v10 }
 0x783   :  { %v8906_v2 = vpop.eup %8905 }
 0x784   :  { %v1049_v11 = vmul.f32 %v8906_v2, %v8900_v41  ;;  %v8908_v16 = vpop.eup %8907 }
 0x785   :  { %v1051_v0 = vmul.f32 %v8908_v16, %v8898_v12 }
 0x786   :  { %v1053_v13 = vpack.c.bf16 %v1049_v11, %v1049_v11  ;;  %6787 = vmatmul.msk.bf16.gmra.mxu2 %vm118_vm1, %v876_v19 }
 0x787   :  { %v1055_v15 = vpack.c.bf16 %v1051_v0, %v1051_v0 }
 0x788   :  { %6792 = vmatmul.msk.bf16.vlgmr.msra.gmra.mxu0 %vm118_vm1, %v1053_v13 }
 0x78f   :  { %v1100_v28 = vpop.permute.xlu0 %1099 }
 0x790   :  { %v1105_v14 = vsel %vm271_vm2, %v1100_v28, 0  ;;  %v9014_v28 = vld [vmem:[%s11523_s0 + $0x18] sm:$0xff] }
 0x791   :  { %1114 = vmatpush.bf16.msra.mxu2 %v1105_v14 }
 0x796   :  { %6794 = vmatmul.msk.bf16.vlgmr.msra.gmra.mxu2 %vm118_vm1, %v1055_v15 }
 0x7b5   :  { %v1038_v17 = vpop.xlane.xlu2 %1037 }
 0x7b6   :  { %8909 = vrcp.f32 %v1038_v17 }
 0x7bc   :  { %v8910_v20 = vpop.eup %8909 }
 0x7bd   :  { %v1050_v21 = vmul.f32 %v8910_v20, %v8902_v53  ;;  %v1079_v24 = vpop.permute.xlu2 %1078  ;;  %v1044_v19 = vpop.xlane.xlu1 %1043 }
 0x7be   :  { %v1084_v61 = vsel %vm271_vm2, %v1079_v24, 0  ;;  %8911 = vrcp.f32 %v1044_v19 }
 0x7bf   :  { %v1054_v18 = vpack.c.bf16 %v1050_v21, %v1050_v21  ;;  %1093 = vmatpush.bf16.msrb.mxu1 %v1084_v61  ;;  %8913 = vrcp.f32 %v9053_v60 }
 0x7c2   :  { %6793 = vmatmul.msk.bf16.vlgmr.msrb.gmra.mxu1 %vm118_vm1, %v1054_v18 }
 0x7c4   :  { %v8912_v25 = vpop.eup %8911 }
 0x7c5   :  { %v1052_v40 = vmul.f32 %v8912_v25, %v8904_v56  ;;  %v8914_v1 = vpop.eup %8913 }
 0x7c6   :  { %v1202_v15 = vmul.f32 32.0, %v8914_v1  ;;  %vm1206_vm3 = vweird.f32 %v8914_v1 }
 0x7c7   :  { %v1056_v26 = vpack.c.bf16 %v1052_v40, %v1052_v40 }
 0x7c8   :  { %v1203_v17 = vsub.f32 1.0, %v1202_v15 }
 0x7ca   :  { %v1204_v20 = vmul.f32 %v8914_v1, %v1203_v17 }
 0x7cc   :  { %v1205_v21 = vadd.f32 %v8914_v1, %v1204_v20 }
 0x7ce   :  { %v9478_v24 = vsel %vm1206_vm3, %v8914_v1, %v1205_v21  ;;  %v9557_v21 = vld [vmem:[%s11529_s6] ss:$0 sm:$0xff] }
 0x7d5   :  { %v1121_v42 = vpop.permute.xlu1 %1120 }
 0x7d6   :  { %v1126_v43 = vsel %vm271_vm2, %v1121_v42, 0 }
 0x7d7   :  { %1135 = vmatpush.bf16.msrb.mxu3 %v1126_v43 }
 0x7da   :  { %6795 = vmatmul.msk.bf16.vlgmr.msrb.gmra.mxu3 %vm118_vm1, %v1056_v26 }
 0x7f9   :  { %v895_v29 = vpop.f32.mrf.mxu2 }
 0x7fa   :  { %v905_v22 = vadd.f32 %v895_v29, %v634_v27 }
 0x801   :  { %v897_v30 = vpop.f32.mrf.mxu2 }
 0x802   :  { %v906_v54 = vadd.f32 %v897_v30, %v636_v51 }
 0x805   :  { %v1074_v31 = vpop.f32.mrf.mxu0 }
 0x809   :  { %v900_v33 = vpop.f32.mrf.mxu2 }
 0x80a   :  { %v907_v34 = vadd.f32 %v900_v33, %v639_v32 }
 0x80d   :  { %v1076_v35 = vpop.f32.mrf.mxu0 }
 0x811   :  { %v902_v36 = vpop.f32.mrf.mxu2 }
 0x812   :  { %v908_v2 = vadd.f32 %v902_v36, %v641_v6 }
 0x819   :  { %v1116_v37 = vpop.f32.mrf.mxu2 }
 0x821   :  { %v1118_v12 = vpop.f32.mrf.mxu2 }
 0x822   :  { %v8523_v12 = vld [vmem:[%s11531_s8 + $0xbc] sm:$0xf0] }
 0x83f   :  { %v1095_v57 = vpop.f32.mrf.mxu1 }
 0x840   :  { %v1141_v44 = vpack.c.bf16 %v1095_v57, %v1074_v31  ;;  %v8515_v57 = vld [vmem:[%s11531_s8 + $0x84] sm:$0xf] }
 0x842   :  { %6796 = vmatmul.msk.bf16.vlgmr.msrb.gmra.mxu0 %vm118_vm1, %v1141_v44  ;;  %v6865_v44 = vor.u32 %v8523_v12, %v6864_v39  ;;  %v6882_v12 = vld [vmem:[%s11531_s8 + $0xd0] sm:$0xf0] }
 0x844   :  { %1540 = vmatpush.bf16.msra.mxu1 %v6865_v44  ;;  %v8526_v44 = vld [vmem:[%s11531_s8 + $0xd4] sm:$0xf0] }
 0x847   :  { %v1097_v41 = vpop.f32.mrf.mxu1 }
 0x848   :  { %v6866_v41 = vld [vmem:[%s11531_s8 + $0xc0] sm:$0xf0] }
 0x85d   :  { %v1137_v45 = vpop.f32.mrf.mxu3 }
 0x85e   :  { %v1142_v59 = vpack.c.bf16 %v1137_v45, %v1116_v37  ;;  %v6872_v45 = vld [vmem:[%s11531_s8 + $0x88] sm:$0xf] }
 0x860   :  { %6797 = vmatmul.msk.bf16.gmra.mxu0 %vm118_vm1, %v1142_v59  ;;  %v8524_v59 = vld [vmem:[%s11531_s8 + $0xc4] sm:$0xf0] }
 0x865   :  { %v1139_v46 = vpop.f32.mrf.mxu3 }
 0x8bf   :  { %v1161_v48 = vpop.f32.mrf.mxu0 }
 0x8c0   :  { %v1171_v49 = vadd.f32 %v1161_v48, %v905_v22  ;;  %v6873_v48 = vor.u32 %v8524_v59, %v6872_v45  ;;  %v8518_v59 = vld [vmem:[%s11531_s8 + $0x9c] sm:$0xf] }
 0x8c2   :  { %v1179_v50 = vadd.f32 %v8835_v47, %v1171_v49  ;;  %v8516_v49 = vld [vmem:[%s11531_s8 + $0x8c] sm:$0xf]  ;;  %1578 = vmatpush.bf16.msra.mxu3 %v6873_v48 }
 0x8c4   :  { %v1183_v53 = vadd.f32 %v9011_v52, %v1179_v50  ;;  %v6874_v50 = vld [vmem:[%s11531_s8 + $0xc8] sm:$0xf0] }
 0x8c5   :  { %v6877_v52 = vor.u32 %v8516_v49, %v6874_v50 }
 0x8c6   :  { %v1189_v55 = vsel %vm79_vm0, %v1183_v53, 0.0 }
 0x8c7   :  { %1190 = vadd.xlane.f32.xlu0 %v1189_v55  ;;  %v1163_v56 = vpop.f32.mrf.mxu0  ;;  %v8499_v55 = vld [vmem:[%s11531_s8 + $0x4] sm:$0xf]  ;;  %1597 = vmatpush.bf16.msra.mxu0 %v6877_v52  ;;  %v8501_v52 = vld [vmem:[%s11531_s8 + $0x14] sm:$0xf] }
 0x8c8   :  { %v1172_v4 = vadd.f32 %v1163_v56, %v906_v54  ;;  %v8507_v54 = vld [vmem:[%s11531_s8 + $0x3c] sm:$0xf0] }
 0x8ca   :  { %v1180_v5 = vadd.f32 %v8835_v47, %v1172_v4 }
 0x8cc   :  { %v1184_v7 = vadd.f32 %v9012_v23, %v1180_v5  ;;  %v6802_v5 = vld [vmem:[%s11531_s8 + $0x40] sm:$0xf0]  ;;  %v6808_v23 = vld [vmem:[%s11531_s8 + $0x8] sm:$0xf] }
 0x8ce   :  { %v1192_v63 = vsel %vm79_vm0, %v1184_v7, 0.0 }
 0x8cf   :  { %1193 = vadd.xlane.f32.xlu2 %v1192_v63  ;;  %v8508_v63 = vld [vmem:[%s11531_s8 + $0x44] sm:$0xf0] }
 0x8dd   :  { %v1166_v58 = vpop.f32.mrf.mxu0 }
 0x8de   :  { %v1173_v62 = vadd.f32 %v1166_v58, %v907_v34  ;;  %v8500_v58 = vld [vmem:[%s11531_s8 + $0xc] sm:$0xf] }
 0x8e0   :  { %v1181_v3 = vadd.f32 %v8835_v47, %v1173_v62  ;;  %v6810_v62 = vld [vmem:[%s11531_s8 + $0x48] sm:$0xf0] }
 0x8e1   :  { %v6813_v6 = vor.u32 %v8500_v58, %v6810_v62 }
 0x8e2   :  { %v1185_v9 = vadd.f32 %v9013_v8, %v1181_v3  ;;  %v6809_v3 = vor.u32 %v8508_v63, %v6808_v23  ;;  %v6826_v63 = vld [vmem:[%s11531_s8 + $0x58] sm:$0xf0] }
 0x8e3   :  { %1598 = vmatpush.bf16.msra.mxu0 %v6813_v6 }
 0x8e4   :  { %v1195_v10 = vsel %vm79_vm0, %v1185_v9, 0.0  ;;  %1579 = vmatpush.bf16.msra.mxu3 %v6809_v3 }
 0x8e5   :  { %1196 = vadd.xlane.f32.xlu1 %v1195_v10  ;;  %v1168_v11 = vpop.f32.mrf.mxu0 }
 0x8e6   :  { %v1174_v13 = vadd.f32 %v1168_v11, %v908_v2 }
 0x8e8   :  { %v1182_v16 = vadd.f32 %v8835_v47, %v1174_v13  ;;  %v6869_v47 = vor.u32 %v8515_v57, %v6866_v41  ;;  %v6888_v57 = vld [vmem:[%s11531_s8 + $0x98] sm:$0xf] }
 0x8e9   :  { %v6889_v45 = vor.u32 %v8526_v44, %v6888_v57  ;;  %v8512_v57 = vld [vmem:[%s11531_s8 + $0x64] sm:$0xf0]  ;;  %v8504_v44 = vld [vmem:[%s11531_s8 + $0x2c] sm:$0xf] }
 0x8ea   :  { %v1186_v0 = vadd.f32 %v9014_v28, %v1182_v16  ;;  %1559 = vmatpush.bf16.msrb.mxu2 %v6869_v47  ;;  %v6816_v47 = vld [vmem:[%s11531_s8 + $0x10] sm:$0xf] }
 0x8eb   :  { %1654 = vmatpush.bf16.msrb.mxu3 %v6889_v45  ;;  %v6842_v45 = vld [vmem:[%s11531_s8 + $0x68] sm:$0xf0] }
 0x8ec   :  { %v1198_v14 = vsel %vm79_vm0, %v1186_v0, 0.0 }
 0x8ed   :  { %1199 = vadd.xlane.f32.xlu2 %v1198_v14 }
 0x93a   :  { %v1191_v61 = vpop.xlane.xlu0 %1190 }
 0x93b   :  { %v1208_v18 = vmul.f32 %v9478_v24, %v1191_v61 }
 0x93d   :  { %v9481_v19 = vsub.f32 %v1183_v53, %v1208_v18  ;;  %v6800_v53 = vld [vmem:[%s11531_s8] sm:$0xf] }
 0x93e   :  { %v6801_v4 = vor.u32 %v8507_v54, %v6800_v53 }
 0x93f   :  { %v1216_v25 = vmul.f32 %v9481_v19, %v9481_v19 }
 0x940   :  { %1541 = vmatpush.bf16.msra.mxu1 %v6801_v4  ;;  %v8510_v4 = vld [vmem:[%s11531_s8 + $0x54] sm:$0xf0] }
 0x941   :  { %v1220_v40 = vsel %vm79_vm0, %v1216_v25, 0.0 }
 0x942   :  { %v1194_v42 = vpop.xlane.xlu2 %1193  ;;  %1221 = vadd.xlane.f32.xlu0 %v1220_v40 }
 0x943   :  { %v1209_v43 = vmul.f32 %v9478_v24, %v1194_v42  ;;  %v9563_v42 = vld [vmem:[%s11530_s7] ss:$0 sm:$0xff] }
 0x945   :  { %v9487_v26 = vsub.f32 %v1184_v7, %v1209_v43  ;;  %v6805_v7 = vor.u32 %v8499_v55, %v6802_v5  ;;  %v6818_v55 = vld [vmem:[%s11531_s8 + $0x50] sm:$0xf0] }
 0x946   :  { %v6821_v5 = vor.u32 %v8501_v52, %v6818_v55  ;;  %v8530_v52 = vld [vmem:[%s11531_s8 + $0xf4] sm:$0xf0]  ;;  %v8522_v55 = vld [vmem:[%s11531_s8 + $0xbc] sm:$0xf] }
 0x947   :  { %v1217_v27 = vmul.f32 %v9487_v26, %v9487_v26  ;;  %1560 = vmatpush.bf16.msrb.mxu2 %v6805_v7  ;;  %v8502_v7 = vld [vmem:[%s11531_s8 + $0x1c] sm:$0xf] }
 0x948   :  { %v6829_v62 = vor.u32 %v8502_v7, %v6826_v63  ;;  %v8505_v7 = vld [vmem:[%s11531_s8 + $0x34] sm:$0xf] }
 0x949   :  { %v1223_v29 = vsel %vm79_vm0, %v1217_v27, 0.0  ;;  %v6850_v63 = vld [vmem:[%s11531_s8 + $0x70] sm:$0xf0] }
 0x94a   :  { %1224 = vadd.xlane.f32.xlu2 %v1223_v29 }
 0x958   :  { %v1197_v22 = vpop.xlane.xlu1 %1196 }
 0x959   :  { %v1210_v30 = vmul.f32 %v9478_v24, %v1197_v22 }
 0x95b   :  { %v9493_v31 = vsub.f32 %v1185_v9, %v1210_v30 }
 0x95d   :  { %v1218_v32 = vmul.f32 %v9493_v31, %v9493_v31 }
 0x95f   :  { %v1226_v33 = vsel %vm79_vm0, %v1218_v32, 0.0 }
 0x960   :  { %v1200_v34 = vpop.xlane.xlu2 %1199  ;;  %1227 = vadd.xlane.f32.xlu0 %v1226_v33 }
 0x961   :  { %v1211_v35 = vmul.f32 %v9478_v24, %v1200_v34 }
 0x963   :  { %v9499_v36 = vsub.f32 %v1186_v0, %v1211_v35  ;;  %v8525_v35 = vld [vmem:[%s11531_s8 + $0xcc] sm:$0xf0] }
 0x965   :  { %v1219_v37 = vmul.f32 %v9499_v36, %v9499_v36 }
 0x967   :  { %v1229_v38 = vsel %vm79_vm0, %v1219_v37, 0.0  ;;  %v8517_v37 = vld [vmem:[%s11531_s8 + $0x94] sm:$0xf] }
 0x968   :  { %1230 = vadd.xlane.f32.xlu2 %v1229_v38  ;;  %v6885_v41 = vor.u32 %v8517_v37, %v6882_v12  ;;  %v6834_v37 = vld [vmem:[%s11531_s8 + $0x60] sm:$0xf0]  ;;  %v6840_v12 = vld [vmem:[%s11531_s8 + $0x28] sm:$0xf] }
 0x96a   :  { %1635 = vmatpush.bf16.msra.mxu2 %v6885_v41  ;;  %v6841_v41 = vor.u32 %v8512_v57, %v6840_v12  ;;  %v8540_v12 = vld [vmem:[%s11533_s10 + $0x48] sm:$0xff] }
 0x96b   :  { %v8548_v57 = vld [vmem:[%s11533_s10 + $0x88] sm:$0xff] }
 0x96e   :  { %1636 = vmatpush.bf16.msra.mxu2 %v6821_v5 }
 0x9b5   :  { %v1222_v46 = vpop.xlane.xlu0 %1221 }
 0x9b6   :  { %v1232_v51 = vmul.f32 %v1222_v46, %v9478_v24  ;;  %v6890_v46 = vld [vmem:[%s11531_s8 + $0xd8] sm:$0xf0] }
 0x9b7   :  { %v6893_v50 = vor.u32 %v8518_v59, %v6890_v46  ;;  %v6845_v59 = vor.u32 %v8504_v44, %v6842_v45  ;;  %v6912_v46 = vld [vmem:[%s11531_s8 + $0xb0] sm:$0xf]  ;;  %v8555_v44 = vld [vmem:[%s11533_s10 + $0xc0] sm:$0xff] }
 0x9b8   :  { %v1236_v56 = vadd.f32 1e-05, %v1232_v51  ;;  %v8509_v51 = vld [vmem:[%s11531_s8 + $0x4c] sm:$0xf0]  ;;  %v8547_v45 = vld [vmem:[%s11533_s10 + $0x80] sm:$0xff] }
 0x9b9   :  { %v6817_v54 = vor.u32 %v8509_v51, %v6816_v47  ;;  %1673 = vmatpush.bf16.msrb.mxu0 %v6893_v50  ;;  %v8529_v47 = vld [vmem:[%s11531_s8 + $0xec] sm:$0xf0]  ;;  %v6914_v50 = vld [vmem:[%s11531_s8 + $0xf0] sm:$0xf0]  ;;  %v6920_v51 = vld [vmem:[%s11531_s8 + $0xb8] sm:$0xf] }
 0x9ba   :  { %8915 = vrsqrt.f32 %v1236_v56  ;;  %vm1246_vm5 = vweird.f32 %v1236_v56 }
 0x9bd   :  { %v1225_v8 = vpop.xlane.xlu2 %1224  ;;  %1674 = vmatpush.bf16.msrb.mxu0 %v6829_v62  ;;  %v6853_v62 = vor.u32 %v8505_v7, %v6850_v63 }
 0x9be   :  { %v1233_v9 = vmul.f32 %v1225_v8, %v9478_v24 }
 0x9c0   :  { %v8916_v2 = vpop.eup %8915  ;;  %v1237_v10 = vadd.f32 1e-05, %v1233_v9 }
 0x9c1   :  { %v1241_v11 = vmul.f32 %v8916_v2, %v1236_v56  ;;  %vm1247_vm4 = vweird.f32 %v8916_v2  ;;  %v6824_v56 = vld [vmem:[%s11531_s8 + $0x18] sm:$0xf] }
 0x9c2   :  { %8917 = vrsqrt.f32 %v1237_v10  ;;  %vm1248_vm6 = vmor %vm1246_vm5, %vm1247_vm4  ;;  %vm1256_vm8 = vweird.f32 %v1237_v10  ;;  %v6825_v23 = vor.u32 %v8510_v4, %v6824_v56  ;;  %v6922_v56 = vld [vmem:[%s11531_s8 + $0xf8] sm:$0xf0]  ;;  %v6848_v4 = vld [vmem:[%s11531_s8 + $0x30] sm:$0xf] }
 0x9c3   :  { %v1242_v13 = vmul.f32 %v8916_v2, %v1241_v11  ;;  %v6925_v5 = vor.u32 %v8522_v55, %v6922_v56 }
 0x9c4   :  { %1655 = vmatpush.bf16.msrb.mxu3 %v6825_v23  ;;  %v8513_v23 = vld [vmem:[%s11531_s8 + $0x6c] sm:$0xf0] }
 0x9c5   :  { %v1243_v16 = vmul.f32 0.5, %v1242_v13 }
 0x9c7   :  { %v1244_v28 = vsub.f32 1.5, %v1243_v16 }
 0x9c8   :  { %v8918_v0 = vpop.eup %8917 }
 0x9c9   :  { %v1245_v14 = vmul.f32 %v8916_v2, %v1244_v28  ;;  %v1251_v60 = vmul.f32 %v8918_v0, %v1237_v10  ;;  %vm1257_vm7 = vweird.f32 %v8918_v0 }
 0x9ca   :  { %vm1258_vm9 = vmor %vm1256_vm8, %vm1257_vm7 }
 0x9cb   :  { %v1252_v1 = vmul.f32 %v8918_v0, %v1251_v60  ;;  %v1249_v15 = vsel %vm1248_vm6, %v8916_v2, %v1245_v14 }
 0x9cc   :  { %v1280_v61 = vmul.f32 %v1249_v15, %v9481_v19 }
 0x9cd   :  { %v1253_v17 = vmul.f32 0.5, %v1252_v1 }
 0x9ce   :  { %v1287_v43 = vmul.f32 %v9557_v21, %v1280_v61 }
 0x9cf   :  { %v1254_v20 = vsub.f32 1.5, %v1253_v17 }
 0x9d0   :  { %v9570_v19 = vadd.f32 %v9563_v42, %v1287_v43 }
 0x9d1   :  { %v1255_v18 = vmul.f32 %v8918_v0, %v1254_v20 }
 0x9d3   :  { %v1259_v25 = vsel %vm1258_vm9, %v8918_v0, %v1255_v18  ;;  %v1228_v40 = vpop.xlane.xlu0 %1227 }
 0x9d4   :  { %v1281_v27 = vmul.f32 %v1259_v25, %v9487_v26  ;;  %v1234_v29 = vmul.f32 %v1228_v40, %v9478_v24  ;;  %v6880_v26 = vld [vmem:[%s11531_s8 + $0x90] sm:$0xf]  ;;  %v6898_v25 = vld [vmem:[%s11531_s8 + $0xe0] sm:$0xf0]  ;;  %v6904_v40 = vld [vmem:[%s11531_s8 + $0xa8] sm:$0xf] }
 0x9d5   :  { %v6881_v39 = vor.u32 %v8525_v35, %v6880_v26  ;;  %v8511_v26 = vld [vmem:[%s11531_s8 + $0x5c] sm:$0xf0]  ;;  %v8503_v35 = vld [vmem:[%s11531_s8 + $0x24] sm:$0xf] }
 0x9d6   :  { %v1288_v22 = vmul.f32 %v9557_v21, %v1281_v27  ;;  %v1238_v30 = vadd.f32 1e-05, %v1234_v29  ;;  %v8520_v29 = vld [vmem:[%s11531_s8 + $0xac] sm:$0xf] }
 0x9d7   :  { %1616 = vmatpush.bf16.msrb.mxu1 %v6881_v39  ;;  %v6837_v39 = vor.u32 %v8503_v35, %v6834_v37  ;;  %v8541_v35 = vld [vmem:[%s11533_s10 + $0x50] sm:$0xff] }
 0x9d8   :  { %v9573_v32 = vadd.f32 %v9563_v42, %v1288_v22  ;;  %8919 = vrsqrt.f32 %v1238_v30  ;;  %vm1266_vm11 = vweird.f32 %v1238_v30  ;;  %v6906_v22 = vld [vmem:[%s11531_s8 + $0xe8] sm:$0xf0]  ;;  %v8549_v37 = vld [vmem:[%s11533_s10 + $0x90] sm:$0xff] }
 0x9da   :  { %v9577_v33 = vpack.c.bf16 %v9573_v32, %v9570_v19 }
 0x9db   :  { %v1231_v34 = vpop.xlane.xlu2 %1230  ;;  %1617 = vmatpush.bf16.msrb.mxu1 %v6817_v54  ;;  %v6921_v54 = vor.u32 %v8530_v52, %v6920_v51  ;;  %v8578_v51 = vld [vmem:[%s11533_s10 + $0x178] sm:$0xff] }
 0x9dc   :  { %v1235_v38 = vmul.f32 %v1231_v34, %v9478_v24  ;;  %6926 = vmatmul.msk.bf16.vlgmr.msra.gmra.mxu1 %vm79_vm0, %v9577_v33  ;;  %6928 = vmatmul.msk.bf16.vlgmr.msrb.gmra.mxu2 %vm79_vm0, %v9577_v33  ;;  %v6909_v34 = vor.u32 %v8520_v29, %v6906_v22  ;;  %v8533_v29 = vld [vmem:[%s11533_s10 + $0x10] sm:$0xff]  ;;  %v8542_v22 = vld [vmem:[%s11533_s10 + $0x58] sm:$0xff] }
 0x9dd   :  { %6930 = vmatmul.msk.bf16.vlgmr.msra.gmra.mxu3 %vm79_vm0, %v9577_v33  ;;  %6932 = vmatmul.msk.bf16.vlgmr.msra.gmra.mxu0 %vm79_vm0, %v9577_v33  ;;  %v8586_v52 = vld [vmem:[%s11533_s10 + $0x1b8] sm:$0xff] }
 0x9de   :  { %v8920_v48 = vpop.eup %8919  ;;  %v1239_v49 = vadd.f32 1e-05, %v1235_v38  ;;  %1749 = vmatpush.bf16.msra.mxu0 %v6909_v34  ;;  %v8557_v34 = vld [vmem:[%s11533_s10 + $0xd0] sm:$0xff] }
 0x9df   :  { %v1261_v53 = vmul.f32 %v8920_v48, %v1238_v30  ;;  %vm1267_vm10 = vweird.f32 %v8920_v48  ;;  %v6832_v30 = vld [vmem:[%s11531_s8 + $0x20] sm:$0xf] }
 0x9e0   :  { %8921 = vrsqrt.f32 %v1239_v49  ;;  %vm1268_vm12 = vmor %vm1266_vm11, %vm1267_vm10  ;;  %vm1276_vm14 = vweird.f32 %v1239_v49  ;;  %v6833_v38 = vor.u32 %v8511_v26, %v6832_v30  ;;  %v8550_v30 = vld [vmem:[%s11533_s10 + $0x98] sm:$0xff]  ;;  %v8532_v26 = vld [vmem:[%s11533_s10 + $0x8] sm:$0xff] }
 0x9e1   :  { %v1262_v58 = vmul.f32 %v8920_v48, %v1261_v53 }
 0x9e2   :  { %1750 = vmatpush.bf16.msra.mxu0 %v6845_v59  ;;  %v8570_v59 = vld [vmem:[%s11533_s10 + $0x138] sm:$0xff] }
 0x9e3   :  { %v1263_v3 = vmul.f32 0.5, %v1262_v58  ;;  %v6849_v58 = vor.u32 %v8513_v23, %v6848_v4  ;;  %v8585_v23 = vld [vmem:[%s11533_s10 + $0x1b0] sm:$0xff] }
 0x9e5   :  { %v1264_v6 = vsub.f32 1.5, %v1263_v3  ;;  %v6856_v3 = vld [vmem:[%s11531_s8 + $0x38] sm:$0xf] }
 0x9e6   :  { %v8922_v8 = vpop.eup %8921 }
 0x9e7   :  { %v1265_v9 = vmul.f32 %v8920_v48, %v1264_v6  ;;  %v1271_v2 = vmul.f32 %v8922_v8, %v1239_v49  ;;  %vm1277_vm13 = vweird.f32 %v8922_v8  ;;  %v6913_v49 = vor.u32 %v8529_v47, %v6912_v46  ;;  %v8514_v6 = vld [vmem:[%s11531_s8 + $0x74] sm:$0xf0] }
 0x9e8   :  { %vm1278_vm15 = vmor %vm1276_vm14, %vm1277_vm13  ;;  %v8594_v46 = vld [vmem:[%s11533_s10 + $0x1f8] sm:$0xff] }
 0x9e9   :  { %v1272_v10 = vmul.f32 %v8922_v8, %v1271_v2  ;;  %v1269_v11 = vsel %vm1268_vm12, %v8920_v48, %v1265_v9  ;;  %v8521_v48 = vld [vmem:[%s11531_s8 + $0xb4] sm:$0xf]  ;;  %v6857_v9 = vor.u32 %v8514_v6, %v6856_v3  ;;  %v6858_v2 = vld [vmem:[%s11531_s8 + $0x78] sm:$0xf0]  ;;  %v8567_v6 = vld [vmem:[%s11533_s10 + $0x120] sm:$0xff] }
 0x9ea   :  { %v1282_v28 = vmul.f32 %v1269_v11, %v9493_v31  ;;  %v6896_v31 = vld [vmem:[%s11531_s8 + $0xa0] sm:$0xf]  ;;  %v6917_v53 = vor.u32 %v8521_v48, %v6914_v50  ;;  %v8538_v11 = vld [vmem:[%s11533_s10 + $0x38] sm:$0xff] }
 0x9eb   :  { %v1273_v13 = vmul.f32 0.5, %v1272_v10  ;;  %v9909_v50 = vld [vmem:[%s11532_s9] sm:$0xff] }
 0x9ec   :  { %v1289_v60 = vmul.f32 %v9557_v21, %v1282_v28  ;;  %v8554_v28 = vld [vmem:[%s11533_s10 + $0xb8] sm:$0xff]  ;;  %v9931_v55 = vperm.slane %v9909_v50, 3 }
 0x9ed   :  { %v1274_v16 = vsub.f32 1.5, %v1273_v13  ;;  %v8562_v13 = vld [vmem:[%s11533_s10 + $0xf8] sm:$0xff] }
 0x9ee   :  { %v9641_v17 = vadd.f32 %v9563_v42, %v1289_v60  ;;  %v8545_v60 = vld [vmem:[%s11533_s10 + $0x70] sm:$0xff] }
 0x9ef   :  { %v1275_v0 = vmul.f32 %v8922_v8, %v1274_v16  ;;  %v8546_v16 = vld [vmem:[%s11533_s10 + $0x78] sm:$0xff] }
 0x9f1   :  { %v1279_v14 = vsel %vm1278_vm15, %v8922_v8, %v1275_v0  ;;  %v8506_v8 = vld [vmem:[%s11531_s8 + $0x3c] sm:$0xf]  ;;  %v8537_v0 = vld [vmem:[%s11533_s10 + $0x30] sm:$0xff] }
 0x9f2   :  { %v1283_v1 = vmul.f32 %v1279_v14, %v9499_v36  ;;  %v8527_v36 = vld [vmem:[%s11531_s8 + $0xdc] sm:$0xf0]  ;;  %v6861_v10 = vor.u32 %v8506_v8, %v6858_v2  ;;  %v8561_v14 = vld [vmem:[%s11533_s10 + $0xf0] sm:$0xff]  ;;  %v9952_v2 = vperm.slane %v9909_v50, 2 }
 0x9f3   :  { %v6897_v18 = vor.u32 %v8527_v36, %v6896_v31  ;;  %v8560_v31 = vld [vmem:[%s11533_s10 + $0xe8] sm:$0xff]  ;;  %v8591_v8 = vld [vmem:[%s11533_s10 + $0x1e0] sm:$0xff] }
 0x9f4   :  { %v1290_v15 = vmul.f32 %v9557_v21, %v1283_v1  ;;  %v8519_v21 = vld [vmem:[%s11531_s8 + $0xa4] sm:$0xf]  ;;  %v8553_v1 = vld [vmem:[%s11533_s10 + $0xb0] sm:$0xff]  ;;  %v8544_v36 = vld [vmem:[%s11533_s10 + $0x68] sm:$0xff] }
 0x9f5   :  { %v6901_v43 = vor.u32 %v8519_v21, %v6898_v25  ;;  %1692 = vmatpush.bf16.msra.mxu1 %v6897_v18  ;;  %v8552_v21 = vld [vmem:[%s11533_s10 + $0xa8] sm:$0xff]  ;;  %v8535_v18 = vld [vmem:[%s11533_s10 + $0x20] sm:$0xff] }
 0x9f6   :  { %v9644_v20 = vadd.f32 %v9563_v42, %v1290_v15  ;;  %v8528_v42 = vld [vmem:[%s11531_s8 + $0xe4] sm:$0xf0]  ;;  %v8559_v25 = vld [vmem:[%s11533_s10 + $0xe0] sm:$0xff] }
 0x9f7   :  { %v6905_v27 = vor.u32 %v8528_v42, %v6904_v40  ;;  %1711 = vmatpush.bf16.msrb.mxu2 %v6901_v43  ;;  %v8536_v15 = vld [vmem:[%s11533_s10 + $0x28] sm:$0xff]  ;;  %v8534_v40 = vld [vmem:[%s11533_s10 + $0x18] sm:$0xff]  ;;  %v8543_v42 = vld [vmem:[%s11533_s10 + $0x60] sm:$0xff] }
 0x9f8   :  { %v9648_v61 = vpack.c.bf16 %v9644_v20, %v9641_v17  ;;  %v8551_v43 = vld [vmem:[%s11533_s10 + $0xa0] sm:$0xff] }
 0x9f9   :  { %1730 = vmatpush.bf16.msra.mxu3 %v6905_v27  ;;  %1693 = vmatpush.bf16.msra.mxu1 %v6833_v38  ;;  %v8558_v27 = vld [vmem:[%s11533_s10 + $0xd8] sm:$0xff]  ;;  %v8556_v38 = vld [vmem:[%s11533_s10 + $0xc8] sm:$0xff] }
 0x9fa   :  { %6927 = vmatmul.msk.bf16.gmra.mxu1 %vm79_vm0, %v9648_v61  ;;  %6929 = vmatmul.msk.bf16.gmra.mxu2 %vm79_vm0, %v9648_v61 }
 0x9fb   :  { %6931 = vmatmul.msk.bf16.gmra.mxu3 %vm79_vm0, %v9648_v61  ;;  %6933 = vmatmul.msk.bf16.gmra.mxu0 %vm79_vm0, %v9648_v61 }
 0x9fc   :  { %1712 = vmatpush.bf16.msrb.mxu2 %v6837_v39  ;;  %v8531_v39 = vld [vmem:[%s11533_s10] sm:$0xff] }
 0x9fd   :  { %1731 = vmatpush.bf16.msra.mxu3 %v6841_v41  ;;  %v8539_v41 = vld [vmem:[%s11533_s10 + $0x40] sm:$0xff] }
 0xa0a   :  { %6934 = vmatmul.msk.bf16.vlgmr.msrb.gmra.mxu1 %vm79_vm0, %v9577_v33  ;;  %6936 = vmatmul.msk.bf16.vlgmr.msra.gmra.mxu2 %vm79_vm0, %v9577_v33 }
 0xa0b   :  { %6938 = vmatmul.msk.bf16.vlgmr.msrb.gmra.mxu3 %vm79_vm0, %v9577_v33  ;;  %6940 = vmatmul.msk.bf16.vlgmr.msrb.gmra.mxu0 %vm79_vm0, %v9577_v33 }
 0xa0c   :  { %1768 = vmatpush.bf16.msrb.mxu1 %v6913_v49  ;;  %1787 = vmatpush.bf16.msra.mxu2 %v6917_v53  ;;  %v8593_v49 = vld [vmem:[%s11533_s10 + $0x1f0] sm:$0xff]  ;;  %v9922_v53 = vperm.slane %v9909_v50, 0 }
 0xa0d   :  { %1806 = vmatpush.bf16.msrb.mxu3 %v6921_v54  ;;  %1825 = vmatpush.bf16.msrb.mxu0 %v6925_v5  ;;  %v8568_v54 = vld [vmem:[%s11533_s10 + $0x128] sm:$0xff]  ;;  %v8577_v5 = vld [vmem:[%s11533_s10 + $0x170] sm:$0xff] }
 0xa10   :  { %1769 = vmatpush.bf16.msrb.mxu1 %v6849_v58  ;;  %1788 = vmatpush.bf16.msra.mxu2 %v6853_v62  ;;  %v9941_v58 = vperm.slane %v9909_v50, 1 }
 0xa11   :  { %1807 = vmatpush.bf16.msrb.mxu3 %v6857_v9  ;;  %1826 = vmatpush.bf16.msrb.mxu0 %v6861_v10 }
 0xa1a   :  { %6935 = vmatmul.msk.bf16.gmra.mxu1 %vm79_vm0, %v9648_v61  ;;  %6937 = vmatmul.msk.bf16.gmra.mxu2 %vm79_vm0, %v9648_v61 }
 0xa1b   :  { %6939 = vmatmul.msk.bf16.gmra.mxu3 %vm79_vm0, %v9648_v61  ;;  %6941 = vmatmul.msk.bf16.gmra.mxu0 %vm79_vm0, %v9648_v61 }
 0xa2a   :  { %6942 = vmatmul.msk.bf16.vlgmr.msra.gmra.mxu1 %vm79_vm0, %v9577_v33  ;;  %6944 = vmatmul.msk.bf16.vlgmr.msrb.gmra.mxu2 %vm79_vm0, %v9577_v33 }
 0xa2b   :  { %6946 = vmatmul.msk.bf16.vlgmr.msra.gmra.mxu3 %vm79_vm0, %v9577_v33  ;;  %6948 = vmatmul.msk.bf16.vlgmr.msra.gmra.mxu0 %vm79_vm0, %v9577_v33 }
 0xa2c   :  { %2962 = vmatpush.bf16.msra.mxu1 %v8538_v11  ;;  %3019 = vmatpush.bf16.msra.mxu0 %v8562_v13  ;;  %v8576_v13 = vld [vmem:[%s11533_s10 + $0x168] sm:$0xff] }
 0xa2d   :  { %2981 = vmatpush.bf16.msrb.mxu2 %v8546_v16  ;;  %3000 = vmatpush.bf16.msra.mxu3 %v8554_v28  ;;  %v8584_v16 = vld [vmem:[%s11533_s10 + $0x1a8] sm:$0xff] }
 0xa30   :  { %2963 = vmatpush.bf16.msra.mxu1 %v8537_v0  ;;  %3020 = vmatpush.bf16.msra.mxu0 %v8561_v14 }
 0xa31   :  { %2982 = vmatpush.bf16.msrb.mxu2 %v8545_v60  ;;  %3001 = vmatpush.bf16.msra.mxu3 %v8553_v1  ;;  %v8566_v60 = vld [vmem:[%s11533_s10 + $0x118] sm:$0xff] }
 0xa32   :  { %v8590_v1 = vld [vmem:[%s11533_s10 + $0x1d8] sm:$0xff] }
 0xa34   :  { %2964 = vmatpush.bf16.msra.mxu1 %v8536_v15  ;;  %3021 = vmatpush.bf16.msra.mxu0 %v8560_v31 }
 0xa35   :  { %2983 = vmatpush.bf16.msrb.mxu2 %v8544_v36  ;;  %3002 = vmatpush.bf16.msra.mxu3 %v8552_v21 }
 0xa38   :  { %2965 = vmatpush.bf16.msra.mxu1 %v8535_v18  ;;  %3022 = vmatpush.bf16.msra.mxu0 %v8559_v25 }
 0xa39   :  { %2984 = vmatpush.bf16.msrb.mxu2 %v8543_v42  ;;  %3003 = vmatpush.bf16.msra.mxu3 %v8551_v43  ;;  %v8583_v42 = vld [vmem:[%s11533_s10 + $0x1a0] sm:$0xff] }
 0xa3a   :  { %6943 = vmatmul.msk.bf16.gmra.mxu1 %vm79_vm0, %v9648_v61  ;;  %6945 = vmatmul.msk.bf16.gmra.mxu2 %vm79_vm0, %v9648_v61 }
 0xa3b   :  { %6947 = vmatmul.msk.bf16.gmra.mxu3 %vm79_vm0, %v9648_v61  ;;  %6949 = vmatmul.msk.bf16.gmra.mxu0 %vm79_vm0, %v9648_v61 }
 0xa3c   :  { %2966 = vmatpush.bf16.msra.mxu1 %v8534_v40  ;;  %3023 = vmatpush.bf16.msra.mxu0 %v8558_v27  ;;  %v8575_v40 = vld [vmem:[%s11533_s10 + $0x160] sm:$0xff] }
 0xa3d   :  { %2985 = vmatpush.bf16.msrb.mxu2 %v8542_v22  ;;  %3004 = vmatpush.bf16.msra.mxu3 %v8550_v30  ;;  %v8565_v30 = vld [vmem:[%s11533_s10 + $0x110] sm:$0xff] }
 0xa40   :  { %2967 = vmatpush.bf16.msra.mxu1 %v8533_v29  ;;  %3024 = vmatpush.bf16.msra.mxu0 %v8557_v34  ;;  %v8589_v34 = vld [vmem:[%s11533_s10 + $0x1d0] sm:$0xff] }
 0xa41   :  { %2986 = vmatpush.bf16.msrb.mxu2 %v8541_v35  ;;  %3005 = vmatpush.bf16.msra.mxu3 %v8549_v37 }
 0xa44   :  { %2968 = vmatpush.bf16.msra.mxu1 %v8532_v26  ;;  %3025 = vmatpush.bf16.msra.mxu0 %v8556_v38  ;;  %v8574_v38 = vld [vmem:[%s11533_s10 + $0x158] sm:$0xff] }
 0xa45   :  { %2987 = vmatpush.bf16.msrb.mxu2 %v8540_v12  ;;  %3006 = vmatpush.bf16.msra.mxu3 %v8548_v57  ;;  %v8564_v57 = vld [vmem:[%s11533_s10 + $0x108] sm:$0xff] }
 0xa48   :  { %2969 = vmatpush.bf16.msra.mxu1 %v8531_v39  ;;  %3026 = vmatpush.bf16.msra.mxu0 %v8555_v44  ;;  %v8582_v39 = vld [vmem:[%s11533_s10 + $0x198] sm:$0xff]  ;;  %v8588_v44 = vld [vmem:[%s11533_s10 + $0x1c8] sm:$0xff] }
 0xa49   :  { %2988 = vmatpush.bf16.msrb.mxu2 %v8539_v41  ;;  %3007 = vmatpush.bf16.msra.mxu3 %v8547_v45  ;;  %v8573_v41 = vld [vmem:[%s11533_s10 + $0x150] sm:$0xff] }
 0xa4a   :  { %6950 = vmatmul.msk.bf16.vlgmr.msrb.gmra.mxu1 %vm79_vm0, %v9577_v33  ;;  %6952 = vmatmul.msk.bf16.vlgmr.msra.gmra.mxu2 %vm79_vm0, %v9577_v33  ;;  %v8581_v45 = vld [vmem:[%s11533_s10 + $0x190] sm:$0xff] }
 0xa4b   :  { %6954 = vmatmul.msk.bf16.vlgmr.msrb.gmra.mxu3 %vm79_vm0, %v9577_v33  ;;  %6956 = vmatmul.msk.bf16.vlgmr.msrb.gmra.mxu0 %vm79_vm0, %v9577_v33  ;;  %v8569_v33 = vld [vmem:[%s11533_s10 + $0x130] sm:$0xff] }
 0xa4c   :  { %3038 = vmatpush.bf16.msrb.mxu1 %v8570_v59  ;;  %3095 = vmatpush.bf16.msrb.mxu0 %v8594_v46  ;;  %v8563_v59 = vld [vmem:[%s11533_s10 + $0x100] sm:$0xff] }
 0xa4d   :  { %3057 = vmatpush.bf16.msra.mxu2 %v8578_v51  ;;  %3076 = vmatpush.bf16.msrb.mxu3 %v8586_v52  ;;  %v8587_v46 = vld [vmem:[%s11533_s10 + $0x1c0] sm:$0xff] }
 0xa50   :  { %3039 = vmatpush.bf16.msrb.mxu1 %v8569_v33  ;;  %3096 = vmatpush.bf16.msrb.mxu0 %v8593_v49  ;;  %v8602_v33 = vld [vmem:[%s11533_s10 + $0x238] sm:$0xff] }
 0xa51   :  { %3058 = vmatpush.bf16.msra.mxu2 %v8577_v5  ;;  %3077 = vmatpush.bf16.msrb.mxu3 %v8585_v23  ;;  %v8626_v49 = vld [vmem:[%s11533_s10 + $0x2f8] sm:$0xff] }
 0xa52   :  { %v8610_v5 = vld [vmem:[%s11533_s10 + $0x278] sm:$0xff] }
 0xa53   :  { %v8618_v23 = vld [vmem:[%s11533_s10 + $0x2b8] sm:$0xff] }
 0xa54   :  { %3040 = vmatpush.bf16.msrb.mxu1 %v8568_v54  ;;  %v8571_v54 = vld [vmem:[%s11533_s10 + $0x140] sm:$0xff] }
 0xa55   :  { %3059 = vmatpush.bf16.msra.mxu2 %v8576_v13  ;;  %3078 = vmatpush.bf16.msrb.mxu3 %v8584_v16  ;;  %v8609_v13 = vld [vmem:[%s11533_s10 + $0x270] sm:$0xff] }
 0xa56   :  { %v8617_v16 = vld [vmem:[%s11533_s10 + $0x2b0] sm:$0xff] }
 0xa58   :  { %3041 = vmatpush.bf16.msrb.mxu1 %v8567_v6  ;;  %v8624_v6 = vld [vmem:[%s11533_s10 + $0x2e8] sm:$0xff] }
 0xa59   :  { %v1543_v47 = vpop.f32.mrf.mxu1  ;;  %3060 = vmatpush.bf16.msra.mxu2 %v8575_v40  ;;  %3079 = vmatpush.bf16.msrb.mxu3 %v8583_v42 }
 0xa5a   :  { %v1600_v48 = vpop.f32.mrf.mxu0  ;;  %6951 = vmatmul.msk.bf16.gmra.mxu1 %vm79_vm0, %v9648_v61  ;;  %6953 = vmatmul.msk.bf16.gmra.mxu2 %vm79_vm0, %v9648_v61  ;;  %v1544_v63 = vadd.f32 %v1543_v47, %v9922_v53  ;;  %v8572_v47 = vld [vmem:[%s11533_s10 + $0x148] sm:$0xff] }
 0xa5b   :  { %6955 = vmatmul.msk.bf16.gmra.mxu3 %vm79_vm0, %v9648_v61  ;;  %6957 = vmatmul.msk.bf16.gmra.mxu0 %vm79_vm0, %v9648_v61  ;;  %v8592_v61 = vld [vmem:[%s11533_s10 + $0x1e8] sm:$0xff]  ;;  %v1601_v9 = vadd.f32 %v1600_v48, %v9931_v55 }
 0xa5c   :  { %3097 = vmatpush.bf16.msrb.mxu0 %v8592_v61  ;;  %v1838_v0 = vmax.f32 %v1544_v63, 0.0  ;;  %3042 = vmatpush.bf16.msrb.mxu1 %v8566_v60  ;;  %v8580_v48 = vld [vmem:[%s11533_s10 + $0x188] sm:$0xff]  ;;  %v8579_v61 = vld [vmem:[%s11533_s10 + $0x180] sm:$0xff] }
 0xa5d   :  { %v1841_v15 = vmax.f32 %v1601_v9, 0.0  ;;  %3061 = vmatpush.bf16.msra.mxu2 %v8574_v38  ;;  %3080 = vmatpush.bf16.msrb.mxu3 %v8582_v39  ;;  %v8623_v60 = vld [vmem:[%s11533_s10 + $0x2e0] sm:$0xff] }
 0xa5f   :  { %v1562_v56 = vpop.f32.mrf.mxu2 }
 0xa60   :  { %v1581_v4 = vpop.f32.mrf.mxu3  ;;  %3098 = vmatpush.bf16.msrb.mxu0 %v8591_v8  ;;  %v1563_v14 = vadd.f32 %v1562_v56, %v9941_v58  ;;  %3043 = vmatpush.bf16.msrb.mxu1 %v8565_v30  ;;  %v8601_v56 = vld [vmem:[%s11533_s10 + $0x230] sm:$0xff] }
 0xa61   :  { %v1545_v7 = vpop.f32.mrf.mxu1  ;;  %v1582_v31 = vadd.f32 %v1581_v4, %v9952_v2  ;;  %3062 = vmatpush.bf16.msra.mxu2 %v8573_v41  ;;  %3081 = vmatpush.bf16.msrb.mxu3 %v8581_v45  ;;  %v8625_v4 = vld [vmem:[%s11533_s10 + $0x2f0] sm:$0xff]  ;;  %v10091_v41 = vperm.slane %v9909_v50, 7 }
 0xa62   :  { %v1546_v62 = vadd.f32 %v1545_v7, %v9922_v53  ;;  %v1602_v3 = vpop.f32.mrf.mxu0  ;;  %v1839_v29 = vmax.f32 %v1563_v14, 0.0 }
 0xa63   :  { %v1603_v10 = vadd.f32 %v1602_v3, %v9931_v55  ;;  %v1840_v26 = vmax.f32 %v1582_v31, 0.0  ;;  %v8600_v3 = vld [vmem:[%s11533_s10 + $0x228] sm:$0xff] }
 0xa64   :  { %v1854_v11 = vmax.f32 %v1546_v62, 0.0  ;;  %3099 = vmatpush.bf16.msrb.mxu0 %v8590_v1  ;;  %3044 = vmatpush.bf16.msrb.mxu1 %v8564_v57  ;;  %v8597_v57 = vld [vmem:[%s11533_s10 + $0x210] sm:$0xff] }
 0xa65   :  { %v1857_v28 = vmax.f32 %v1603_v10, 0.0  ;;  %3063 = vmatpush.bf16.msra.mxu2 %v8572_v47  ;;  %3082 = vmatpush.bf16.msrb.mxu3 %v8580_v48 }
 0xa66   :  { %v1902_v21 = vpack.c.bf16 %v1854_v11, %v1838_v0 }
 0xa67   :  { %v1564_v36 = vpop.f32.mrf.mxu2  ;;  %v1905_v43 = vpack.c.bf16 %v1857_v28, %v1841_v15 }
 0xa68   :  { %v1565_v18 = vadd.f32 %v1564_v36, %v9941_v58  ;;  %v1583_v25 = vpop.f32.mrf.mxu3  ;;  %3100 = vmatpush.bf16.msrb.mxu0 %v8589_v34  ;;  %3045 = vmatpush.bf16.msrb.mxu1 %v8563_v59  ;;  %v8606_v59 = vld [vmem:[%s11533_s10 + $0x258] sm:$0xff] }
 0xa69   :  { %v1584_v27 = vadd.f32 %v1583_v25, %v9952_v2  ;;  %3064 = vmatpush.bf16.msra.mxu2 %v8571_v54  ;;  %3083 = vmatpush.bf16.msrb.mxu3 %v8579_v61  ;;  %v10108_v61 = vperm.slane %v9909_v50, 5 }
 0xa6a   :  { %v1855_v22 = vmax.f32 %v1565_v18, 0.0  ;;  %2970 = vmatmul.bf16.vlgmr.msra.gmra.mxu1 %v1902_v21  ;;  %v8616_v21 = vld [vmem:[%s11533_s10 + $0x2a8] sm:$0xff] }
 0xa6b   :  { %v1856_v35 = vmax.f32 %v1584_v27, 0.0  ;;  %3027 = vmatmul.bf16.vlgmr.msra.gmra.mxu0 %v1905_v43  ;;  %v8598_v27 = vld [vmem:[%s11533_s10 + $0x218] sm:$0xff] }
 0xa6c   :  { %v1903_v37 = vpack.c.bf16 %v1855_v22, %v1839_v29  ;;  %3101 = vmatpush.bf16.msrb.mxu0 %v8588_v44  ;;  %3114 = vmatpush.bf16.msra.mxu1 %v8602_v33  ;;  %v8622_v29 = vld [vmem:[%s11533_s10 + $0x2d8] sm:$0xff]  ;;  %v8621_v44 = vld [vmem:[%s11533_s10 + $0x2d0] sm:$0xff] }
 0xa6d   :  { %v1904_v12 = vpack.c.bf16 %v1856_v35, %v1840_v26 }
 0xa6e   :  { %2989 = vmatmul.bf16.vlgmr.msrb.gmra.mxu2 %v1903_v37  ;;  %v8615_v37 = vld [vmem:[%s11533_s10 + $0x2a0] sm:$0xff] }
 0xa6f   :  { %3008 = vmatmul.bf16.vlgmr.msra.gmra.mxu3 %v1904_v12  ;;  %3133 = vmatpush.bf16.msrb.mxu2 %v8610_v5  ;;  %v8605_v5 = vld [vmem:[%s11533_s10 + $0x250] sm:$0xff] }
 0xa70   :  { %3102 = vmatpush.bf16.msrb.mxu0 %v8587_v46  ;;  %3115 = vmatpush.bf16.msra.mxu1 %v8601_v56  ;;  %v8614_v46 = vld [vmem:[%s11533_s10 + $0x298] sm:$0xff] }
 0xa71   :  { %3152 = vmatpush.bf16.msra.mxu3 %v8618_v23  ;;  %v8613_v23 = vld [vmem:[%s11533_s10 + $0x290] sm:$0xff] }
 0xa73   :  { %3134 = vmatpush.bf16.msrb.mxu2 %v8609_v13  ;;  %v8604_v13 = vld [vmem:[%s11533_s10 + $0x248] sm:$0xff] }
 0xa74   :  { %3171 = vmatpush.bf16.msra.mxu0 %v8626_v49  ;;  %3116 = vmatpush.bf16.msra.mxu1 %v8600_v3  ;;  %v8596_v49 = vld [vmem:[%s11533_s10 + $0x208] sm:$0xff] }
 0xa75   :  { %3153 = vmatpush.bf16.msra.mxu3 %v8617_v16  ;;  %v8612_v16 = vld [vmem:[%s11533_s10 + $0x288] sm:$0xff] }
 0xa77   :  { %v1548_v51 = vpop.f32.mrf.mxu1 }
 0xa78   :  { %v1605_v52 = vpop.f32.mrf.mxu0  ;;  %3172 = vmatpush.bf16.msra.mxu0 %v8625_v4  ;;  %v1549_v63 = vadd.f32 %v1548_v51, %v9922_v53  ;;  %v8620_v51 = vld [vmem:[%s11533_s10 + $0x2c8] sm:$0xff] }
 0xa79   :  { %v1606_v8 = vadd.f32 %v1605_v52, %v9931_v55  ;;  %3154 = vmatpush.bf16.msra.mxu3 %v8616_v21 }
 0xa7a   :  { %v1870_v0 = vmax.f32 %v1549_v63, 0.0 }
 0xa7b   :  { %v1873_v1 = vmax.f32 %v1606_v8, 0.0  ;;  %v8619_v8 = vld [vmem:[%s11533_s10 + $0x2c0] sm:$0xff] }
 0xa7c   :  { %3173 = vmatpush.bf16.msra.mxu0 %v8624_v6  ;;  %v8595_v6 = vld [vmem:[%s11533_s10 + $0x200] sm:$0xff] }
 0xa7d   :  { %v1567_v7 = vpop.f32.mrf.mxu2  ;;  %3155 = vmatpush.bf16.msra.mxu3 %v8615_v37 }
 0xa7e   :  { %v1586_v62 = vpop.f32.mrf.mxu3  ;;  %v1568_v31 = vadd.f32 %v1567_v7, %v9941_v58  ;;  %v10118_v7 = vperm.slane %v9909_v50, 6 }
 0xa7f   :  { %v1550_v9 = vpop.f32.mrf.mxu1  ;;  %v1587_v18 = vadd.f32 %v1586_v62, %v9952_v2 }
 0xa80   :  { %v1551_v10 = vadd.f32 %v1550_v9, %v9922_v53  ;;  %v1607_v11 = vpop.f32.mrf.mxu0  ;;  %v8599_v53 = vld [vmem:[%s11533_s10 + $0x220] sm:$0xff]  ;;  %3174 = vmatpush.bf16.msra.mxu0 %v8623_v60  ;;  %v1871_v34 = vmax.f32 %v1568_v31, 0.0 }
 0xa81   :  { %v1608_v28 = vadd.f32 %v1607_v11, %v9931_v55  ;;  %3117 = vmatpush.bf16.msra.mxu1 %v8599_v53  ;;  %v8608_v55 = vld [vmem:[%s11533_s10 + $0x268] sm:$0xff]  ;;  %v1872_v38 = vmax.f32 %v1587_v18, 0.0  ;;  %3156 = vmatpush.bf16.msra.mxu3 %v8614_v46  ;;  %v8649_v46 = vld [vmem:[%s11533_s10 + $0x3b0] sm:$0xff] }
 0xa82   :  { %v1886_v14 = vmax.f32 %v1551_v10, 0.0  ;;  %3135 = vmatpush.bf16.msrb.mxu2 %v8608_v55 }
 0xa83   :  { %v1889_v15 = vmax.f32 %v1608_v28, 0.0 }
 0xa84   :  { %v1918_v36 = vpack.c.bf16 %v1886_v14, %v1870_v0  ;;  %3175 = vmatpush.bf16.msra.mxu0 %v8622_v29  ;;  %v8633_v29 = vld [vmem:[%s11533_s10 + $0x330] sm:$0xff] }
 0xa85   :  { %v1569_v25 = vpop.f32.mrf.mxu2  ;;  %v1921_v40 = vpack.c.bf16 %v1889_v15, %v1873_v1  ;;  %3118 = vmatpush.bf16.msra.mxu1 %v8598_v27  ;;  %3157 = vmatpush.bf16.msra.mxu3 %v8613_v23  ;;  %v8634_v1 = vld [vmem:[%s11533_s10 + $0x338] sm:$0xff] }
 0xa86   :  { %v1570_v42 = vadd.f32 %v1569_v25, %v9941_v58  ;;  %v1588_v43 = vpop.f32.mrf.mxu3  ;;  %2975 = vmatmul.bf16.gmra.mxu1 %v1918_v36  ;;  %v8607_v58 = vld [vmem:[%s11533_s10 + $0x260] sm:$0xff]  ;;  %v8658_v15 = vld [vmem:[%s11533_s10 + $0x3f8] sm:$0xff] }
 0xa87   :  { %v1589_v22 = vadd.f32 %v1588_v43, %v9952_v2  ;;  %3032 = vmatmul.bf16.gmra.mxu0 %v1921_v40  ;;  %v1619_v30 = vpop.f32.mrf.mxu1  ;;  %v10082_v2 = vperm.slane %v9909_v50, 4  ;;  %3136 = vmatpush.bf16.msrb.mxu2 %v8607_v58  ;;  %v8603_v25 = vld [vmem:[%s11533_s10 + $0x240] sm:$0xff] }
 0xa88   :  { %v1887_v26 = vmax.f32 %v1570_v42, 0.0  ;;  %v1676_v35 = vpop.f32.mrf.mxu0  ;;  %3176 = vmatpush.bf16.msra.mxu0 %v8621_v44  ;;  %v8611_v40 = vld [vmem:[%s11533_s10 + $0x280] sm:$0xff] }
 0xa89   :  { %v1888_v39 = vmax.f32 %v1589_v22, 0.0  ;;  %3119 = vmatpush.bf16.msra.mxu1 %v8597_v57  ;;  %v1620_v48 = vadd.f32 %v1619_v30, %v10082_v2  ;;  %v1677_v52 = vadd.f32 %v1676_v35, %v10091_v41  ;;  %3158 = vmatpush.bf16.msra.mxu3 %v8612_v16  ;;  %v8657_v22 = vld [vmem:[%s11533_s10 + $0x3f0] sm:$0xff]  ;;  %v8639_v16 = vld [vmem:[%s11533_s10 + $0x360] sm:$0xff] }
 0xa8a   :  { %v1919_v12 = vpack.c.bf16 %v1887_v26, %v1871_v34  ;;  %v8642_v34 = vld [vmem:[%s11533_s10 + $0x378] sm:$0xff] }
 0xa8b   :  { %v1920_v45 = vpack.c.bf16 %v1888_v39, %v1872_v38  ;;  %3137 = vmatpush.bf16.msrb.mxu2 %v8606_v59  ;;  %v1842_v62 = vmax.f32 %v1620_v48, 0.0  ;;  %v1845_v9 = vmax.f32 %v1677_v52, 0.0  ;;  %v8650_v26 = vld [vmem:[%s11533_s10 + $0x3b8] sm:$0xff]  ;;  %v8632_v38 = vld [vmem:[%s11533_s10 + $0x328] sm:$0xff]  ;;  %v8641_v59 = vld [vmem:[%s11533_s10 + $0x370] sm:$0xff] }
 0xa8c   :  { %2994 = vmatmul.bf16.gmra.mxu2 %v1919_v12  ;;  %3177 = vmatpush.bf16.msra.mxu0 %v8620_v51  ;;  %v8656_v39 = vld [vmem:[%s11533_s10 + $0x3e8] sm:$0xff] }
 0xa8d   :  { %3013 = vmatmul.bf16.gmra.mxu3 %v1920_v45  ;;  %v1638_v47 = vpop.f32.mrf.mxu2  ;;  %3120 = vmatpush.bf16.msra.mxu1 %v8596_v49  ;;  %v8655_v49 = vld [vmem:[%s11533_s10 + $0x3e0] sm:$0xff] }
 0xa8e   :  { %v1657_v33 = vpop.f32.mrf.mxu3  ;;  %v1639_v50 = vadd.f32 %v1638_v47, %v10108_v61  ;;  %3159 = vmatpush.bf16.msra.mxu3 %v8611_v40  ;;  %v8628_v40 = vld [vmem:[%s11533_s10 + $0x308] sm:$0xff] }
 0xa8f   :  { %v1621_v54 = vpop.f32.mrf.mxu1  ;;  %3138 = vmatpush.bf16.msrb.mxu2 %v8605_v5  ;;  %v1658_v28 = vadd.f32 %v1657_v33, %v10118_v7 }
 0xa90   :  { %v1622_v56 = vadd.f32 %v1621_v54, %v10082_v2  ;;  %v1678_v4 = vpop.f32.mrf.mxu0  ;;  %3178 = vmatpush.bf16.msra.mxu0 %v8619_v8  ;;  %v1843_v55 = vmax.f32 %v1639_v50, 0.0  ;;  %v8654_v8 = vld [vmem:[%s11533_s10 + $0x3d8] sm:$0xff] }
 0xa91   :  { %v1679_v63 = vadd.f32 %v1678_v4, %v10091_v41  ;;  %3121 = vmatpush.bf16.msra.mxu1 %v8595_v6  ;;  %v1844_v42 = vmax.f32 %v1658_v28, 0.0  ;;  %v8648_v4 = vld [vmem:[%s11533_s10 + $0x3a8] sm:$0xff]  ;;  %v8630_v6 = vld [vmem:[%s11533_s10 + $0x318] sm:$0xff] }
 0xa92   :  { %v1858_v3 = vmax.f32 %v1622_v56, 0.0 }
 0xa93   :  { %v1861_v10 = vmax.f32 %v1679_v63, 0.0  ;;  %3139 = vmatpush.bf16.msrb.mxu2 %v8604_v13 }
 0xa94   :  { %v1906_v11 = vpack.c.bf16 %v1858_v3, %v1842_v62 }
 0xa95   :  { %v1909_v0 = vpack.c.bf16 %v1861_v10, %v1845_v9  ;;  %v1640_v14 = vpop.f32.mrf.mxu2  ;;  %v10202_v10 = vld [vmem:[%s11532_s9 + $0x8] sm:$0xff] }
 0xa96   :  { %v1641_v53 = vadd.f32 %v1640_v14, %v10108_v61  ;;  %v1659_v60 = vpop.f32.mrf.mxu3  ;;  %3046 = vmatmul.bf16.vlgmr.msrb.gmra.mxu1 %v1906_v11  ;;  %v10211_v14 = vperm.slane %v10202_v10, 0 }
 0xa97   :  { %v1660_v31 = vadd.f32 %v1659_v60, %v10118_v7  ;;  %3103 = vmatmul.bf16.vlgmr.msrb.gmra.mxu0 %v1909_v0  ;;  %v1624_v36 = vpop.f32.mrf.mxu1  ;;  %3190 = vmatpush.bf16.msrb.mxu1 %v8634_v1  ;;  %v8629_v60 = vld [vmem:[%s11533_s10 + $0x310] sm:$0xff] }
 0xa98   :  { %v1859_v21 = vmax.f32 %v1641_v53, 0.0  ;;  %v1681_v18 = vpop.f32.mrf.mxu0  ;;  %3247 = vmatpush.bf16.msrb.mxu0 %v8658_v15  ;;  %3140 = vmatpush.bf16.msrb.mxu2 %v8603_v25  ;;  %v1625_v58 = vadd.f32 %v1624_v36, %v10082_v2  ;;  %v8653_v1 = vld [vmem:[%s11533_s10 + $0x3d0] sm:$0xff]  ;;  %v10220_v15 = vperm.slane %v10202_v10, 3  ;;  %v8638_v36 = vld [vmem:[%s11533_s10 + $0x358] sm:$0xff] }
 0xa99   :  { %v1860_v43 = vmax.f32 %v1660_v31, 0.0  ;;  %v1682_v12 = vadd.f32 %v1681_v18, %v10091_v41 }
 0xa9a   :  { %v1907_v27 = vpack.c.bf16 %v1859_v21, %v1843_v55  ;;  %v1874_v48 = vmax.f32 %v1625_v58, 0.0  ;;  %v8646_v55 = vld [vmem:[%s11533_s10 + $0x398] sm:$0xff] }
 0xa9b   :  { %v1908_v30 = vpack.c.bf16 %v1860_v43, %v1844_v42  ;;  %3191 = vmatpush.bf16.msrb.mxu1 %v8633_v29  ;;  %v1877_v51 = vmax.f32 %v1682_v12, 0.0  ;;  %v8652_v42 = vld [vmem:[%s11533_s10 + $0x3c8] sm:$0xff]  ;;  %v10237_v29 = vperm.slane %v10202_v10, 1  ;;  %v8651_v12 = vld [vmem:[%s11533_s10 + $0x3c0] sm:$0xff] }
 0xa9c   :  { %3065 = vmatmul.bf16.vlgmr.msra.gmra.mxu2 %v1907_v27  ;;  %3248 = vmatpush.bf16.msrb.mxu0 %v8657_v22 }
 0xa9d   :  { %3084 = vmatmul.bf16.vlgmr.msrb.gmra.mxu3 %v1908_v30  ;;  %v1643_v35 = vpop.f32.mrf.mxu2  ;;  %3209 = vmatpush.bf16.msra.mxu2 %v8642_v34  ;;  %v8637_v34 = vld [vmem:[%s11533_s10 + $0x350] sm:$0xff] }
 0xa9e   :  { %v1662_v37 = vpop.f32.mrf.mxu3  ;;  %3228 = vmatpush.bf16.msrb.mxu3 %v8650_v26  ;;  %v1644_v54 = vadd.f32 %v1643_v35, %v10108_v61  ;;  %v8645_v26 = vld [vmem:[%s11533_s10 + $0x390] sm:$0xff]  ;;  %v1346_v35 = vperm.slane %v10202_v10, 2 }
 0xa9f   :  { %v1626_v57 = vpop.f32.mrf.mxu1  ;;  %3192 = vmatpush.bf16.msrb.mxu1 %v8632_v38  ;;  %v1663_v5 = vadd.f32 %v1662_v37, %v10118_v7 }
 0xaa0   :  { %v1627_v44 = vadd.f32 %v1626_v57, %v10082_v2  ;;  %v1683_v45 = vpop.f32.mrf.mxu0  ;;  %3249 = vmatpush.bf16.msrb.mxu0 %v8656_v39  ;;  %v8631_v2 = vld [vmem:[%s11533_s10 + $0x320] sm:$0xff]  ;;  %v1875_v50 = vmax.f32 %v1644_v54, 0.0 }
 0xaa1   :  { %v1684_v47 = vadd.f32 %v1683_v45, %v10091_v41  ;;  %3210 = vmatpush.bf16.msra.mxu2 %v8641_v59  ;;  %v8640_v41 = vld [vmem:[%s11533_s10 + $0x368] sm:$0xff]  ;;  %v1876_v28 = vmax.f32 %v1663_v5, 0.0  ;;  %v8627_v39 = vld [vmem:[%s11533_s10 + $0x300] sm:$0xff] }
 0xaa2   :  { %v1890_v33 = vmax.f32 %v1627_v44, 0.0  ;;  %3229 = vmatpush.bf16.msrb.mxu3 %v8649_v46  ;;  %v8636_v46 = vld [vmem:[%s11533_s10 + $0x348] sm:$0xff]  ;;  %v8635_v5 = vld [vmem:[%s11533_s10 + $0x340] sm:$0xff] }
 0xaa3   :  { %v1893_v52 = vmax.f32 %v1684_v47, 0.0  ;;  %3193 = vmatpush.bf16.msrb.mxu1 %v8631_v2  ;;  %v8644_v47 = vld [vmem:[%s11533_s10 + $0x388] sm:$0xff] }
 0xaa4   :  { %v1922_v56 = vpack.c.bf16 %v1890_v33, %v1874_v48  ;;  %3250 = vmatpush.bf16.msrb.mxu0 %v8655_v49 }
 0xaa5   :  { %v1645_v23 = vpop.f32.mrf.mxu2  ;;  %v1925_v63 = vpack.c.bf16 %v1893_v52, %v1877_v51  ;;  %3211 = vmatpush.bf16.msra.mxu2 %v8640_v41 }
 0xaa6   :  { %v1646_v62 = vadd.f32 %v1645_v23, %v10108_v61  ;;  %v1664_v3 = vpop.f32.mrf.mxu3  ;;  %3051 = vmatmul.bf16.gmra.mxu1 %v1922_v56  ;;  %3230 = vmatpush.bf16.msrb.mxu3 %v8648_v4  ;;  %v8643_v23 = vld [vmem:[%s11533_s10 + $0x380] sm:$0xff] }
 0xaa7   :  { %v1665_v9 = vadd.f32 %v1664_v3, %v10118_v7  ;;  %3108 = vmatmul.bf16.gmra.mxu0 %v1925_v63  ;;  %v1695_v61 = vpop.f32.mrf.mxu1  ;;  %3194 = vmatpush.bf16.msrb.mxu1 %v8630_v6  ;;  %v8647_v7 = vld [vmem:[%s11533_s10 + $0x3a0] sm:$0xff] }
 0xaa8   :  { %v1891_v11 = vmax.f32 %v1646_v62, 0.0  ;;  %v1752_v13 = vpop.f32.mrf.mxu0  ;;  %3251 = vmatpush.bf16.msrb.mxu0 %v8654_v8  ;;  %v1696_v18 = vadd.f32 %v1695_v61, %v10211_v14 }
 0xaa9   :  { %v1892_v0 = vmax.f32 %v1665_v9, 0.0  ;;  %3212 = vmatpush.bf16.msra.mxu2 %v8639_v16  ;;  %v1753_v43 = vadd.f32 %v1752_v13, %v10220_v15 }
 0xaaa   :  { %v1923_v53 = vpack.c.bf16 %v1891_v11, %v1875_v50  ;;  %3231 = vmatpush.bf16.msrb.mxu3 %v8647_v7  ;;  %v1846_v37 = vmax.f32 %v1696_v18, 0.0 }
 0xaab   :  { %v1924_v31 = vpack.c.bf16 %v1892_v0, %v1876_v28  ;;  %3195 = vmatpush.bf16.msrb.mxu1 %v8629_v60  ;;  %v1849_v57 = vmax.f32 %v1753_v43, 0.0 }
 0xaac   :  { %3070 = vmatmul.bf16.gmra.mxu2 %v1923_v53  ;;  %3252 = vmatpush.bf16.msrb.mxu0 %v8653_v1 }
 0xaad   :  { %3089 = vmatmul.bf16.gmra.mxu3 %v1924_v31  ;;  %v1714_v21 = vpop.f32.mrf.mxu2  ;;  %3213 = vmatpush.bf16.msra.mxu2 %v8638_v36 }
 0xaae   :  { %v1733_v25 = vpop.f32.mrf.mxu3  ;;  %3232 = vmatpush.bf16.msrb.mxu3 %v8646_v55  ;;  %v1715_v45 = vadd.f32 %v1714_v21, %v10237_v29 }
 0xaaf   :  { %v1697_v27 = vpop.f32.mrf.mxu1  ;;  %3196 = vmatpush.bf16.msrb.mxu1 %v8628_v40  ;;  %v1734_v48 = vadd.f32 %v1733_v25, %v1346_v35 }
 0xab0   :  { %v1698_v22 = vadd.f32 %v1697_v27, %v10211_v14  ;;  %v1754_v30 = vpop.f32.mrf.mxu0  ;;  %3253 = vmatpush.bf16.msrb.mxu0 %v8652_v42  ;;  %v1847_v56 = vmax.f32 %v1715_v45, 0.0  ;;  %v1350_v45 = vperm.slane %v10202_v10, 6 }
 0xab1   :  { %v1755_v58 = vadd.f32 %v1754_v30, %v10220_v15  ;;  %3214 = vmatpush.bf16.msra.mxu2 %v8637_v34  ;;  %v1848_v63 = vmax.f32 %v1734_v48, 0.0  ;;  %v1348_v30 = vperm.slane %v10202_v10, 4 }
 0xab2   :  { %v1862_v38 = vmax.f32 %v1698_v22, 0.0  ;;  %3233 = vmatpush.bf16.msrb.mxu3 %v8645_v26  ;;  %v1351_v26 = vperm.slane %v10202_v10, 7 }
 0xab3   :  { %v1865_v44 = vmax.f32 %v1755_v58, 0.0  ;;  %3197 = vmatpush.bf16.msrb.mxu1 %v8627_v39 }
 0xab4   :  { %v1910_v59 = vpack.c.bf16 %v1862_v38, %v1846_v37  ;;  %3254 = vmatpush.bf16.msrb.mxu0 %v8651_v12  ;;  %v1349_v12 = vperm.slane %v10202_v10, 5 }
 0xab5   :  { %v1913_v33 = vpack.c.bf16 %v1865_v44, %v1849_v57  ;;  %v1716_v2 = vpop.f32.mrf.mxu2  ;;  %3215 = vmatpush.bf16.msra.mxu2 %v8636_v46 }
 0xab6   :  { %v1717_v49 = vadd.f32 %v1716_v2, %v10237_v29  ;;  %v1735_v51 = vpop.f32.mrf.mxu3  ;;  %3122 = vmatmul.bf16.vlgmr.msra.gmra.mxu1 %v1910_v59  ;;  %3234 = vmatpush.bf16.msrb.mxu3 %v8644_v47 }
 0xab7   :  { %v1736_v52 = vadd.f32 %v1735_v51, %v1346_v35  ;;  %3179 = vmatmul.bf16.vlgmr.msra.gmra.mxu0 %v1913_v33  ;;  %v1700_v54 = vpop.f32.mrf.mxu1 }
 0xab8   :  { %v1863_v41 = vmax.f32 %v1717_v49, 0.0  ;;  %v1757_v4 = vpop.f32.mrf.mxu0  ;;  %v1701_v9 = vadd.f32 %v1700_v54, %v10211_v14 }
 0xab9   :  { %v1864_v62 = vmax.f32 %v1736_v52, 0.0  ;;  %3216 = vmatpush.bf16.msra.mxu2 %v8635_v5  ;;  %v1758_v50 = vadd.f32 %v1757_v4, %v10220_v15 }
 0xaba   :  { %v1911_v3 = vpack.c.bf16 %v1863_v41, %v1847_v56  ;;  %3235 = vmatpush.bf16.msrb.mxu3 %v8643_v23  ;;  %v1878_v28 = vmax.f32 %v1701_v9, 0.0 }
 0xabb   :  { %v1912_v6 = vpack.c.bf16 %v1864_v62, %v1848_v63  ;;  %v1881_v53 = vmax.f32 %v1758_v50, 0.0 }
 0xabc   :  { %3141 = vmatmul.bf16.vlgmr.msrb.gmra.mxu2 %v1911_v3 }
 0xabd   :  { %3160 = vmatmul.bf16.vlgmr.msra.gmra.mxu3 %v1912_v6  ;;  %v1719_v8 = vpop.f32.mrf.mxu2 }
 0xabe   :  { %v1738_v61 = vpop.f32.mrf.mxu3  ;;  %v1720_v1 = vadd.f32 %v1719_v8, %v10237_v29 }
 0xabf   :  { %v1702_v11 = vpop.f32.mrf.mxu1  ;;  %v1739_v36 = vadd.f32 %v1738_v61, %v1346_v35 }
 0xac0   :  { %v1703_v13 = vadd.f32 %v1702_v11, %v10211_v14  ;;  %v1759_v16 = vpop.f32.mrf.mxu0  ;;  %v1879_v42 = vmax.f32 %v1720_v1, 0.0 }
 0xac1   :  { %v1760_v7 = vadd.f32 %v1759_v16, %v10220_v15  ;;  %v1880_v27 = vmax.f32 %v1739_v36, 0.0 }
 0xac2   :  { %v1894_v0 = vmax.f32 %v1703_v13, 0.0 }
 0xac3   :  { %v1897_v60 = vmax.f32 %v1760_v7, 0.0 }
 0xac4   :  { %v1926_v31 = vpack.c.bf16 %v1894_v0, %v1878_v28 }
 0xac5   :  { %v1721_v55 = vpop.f32.mrf.mxu2  ;;  %v1929_v21 = vpack.c.bf16 %v1897_v60, %v1881_v53 }
 0xac6   :  { %v1722_v18 = vadd.f32 %v1721_v55, %v10237_v29  ;;  %v1740_v25 = vpop.f32.mrf.mxu3  ;;  %3127 = vmatmul.bf16.gmra.mxu1 %v1926_v31 }
 0xac7   :  { %v1741_v40 = vadd.f32 %v1740_v25, %v1346_v35  ;;  %3184 = vmatmul.bf16.gmra.mxu0 %v1929_v21  ;;  %v1771_v14 = vpop.f32.mrf.mxu1 }
 0xac8   :  { %v1895_v43 = vmax.f32 %v1722_v18, 0.0  ;;  %v1828_v15 = vpop.f32.mrf.mxu0  ;;  %v1772_v29 = vadd.f32 %v1771_v14, %v1348_v30 }
 0xac9   :  { %v1896_v22 = vmax.f32 %v1741_v40, 0.0  ;;  %v1829_v39 = vadd.f32 %v1828_v15, %v1351_v26 }
 0xaca   :  { %v1927_v34 = vpack.c.bf16 %v1895_v43, %v1879_v42  ;;  %v1850_v46 = vmax.f32 %v1772_v29, 0.0 }
 0xacb   :  { %v1928_v58 = vpack.c.bf16 %v1896_v22, %v1880_v27  ;;  %v1853_v48 = vmax.f32 %v1829_v39, 0.0 }
 0xacc   :  { %3146 = vmatmul.bf16.gmra.mxu2 %v1927_v34  ;;  %v10281_v34 = vld [vmem:[%s11534_s11] ss:$0 sm:$0xff] }
 0xacd   :  { %3165 = vmatmul.bf16.gmra.mxu3 %v1928_v58  ;;  %v1790_v37 = vpop.f32.mrf.mxu2 }
 0xace   :  { %v1809_v38 = vpop.f32.mrf.mxu3  ;;  %v1791_v2 = vadd.f32 %v1790_v37, %v1349_v12 }
 0xacf   :  { %v1773_v35 = vpop.f32.mrf.mxu1  ;;  %v1810_v51 = vadd.f32 %v1809_v38, %v1350_v45 }
 0xad0   :  { %v1774_v57 = vadd.f32 %v1773_v35, %v1348_v30  ;;  %v1830_v44 = vpop.f32.mrf.mxu0  ;;  %v1851_v23 = vmax.f32 %v1791_v2, 0.0 }
 0xad1   :  { %v1831_v59 = vadd.f32 %v1830_v44, %v1351_v26  ;;  %v1852_v10 = vmax.f32 %v1810_v51, 0.0 }
 0xad2   :  { %v1866_v47 = vmax.f32 %v1774_v57, 0.0 }
 0xad3   :  { %v1869_v33 = vmax.f32 %v1831_v59, 0.0 }
 0xad4   :  { %v1914_v49 = vpack.c.bf16 %v1866_v47, %v1850_v46 }
 0xad5   :  { %v1917_v52 = vpack.c.bf16 %v1869_v33, %v1853_v48  ;;  %v1792_v54 = vpop.f32.mrf.mxu2 }
 0xad6   :  { %v1793_v56 = vadd.f32 %v1792_v54, %v1349_v12  ;;  %v1811_v41 = vpop.f32.mrf.mxu3  ;;  %3198 = vmatmul.bf16.vlgmr.msrb.gmra.mxu1 %v1914_v49 }
 0xad7   :  { %v1812_v4 = vadd.f32 %v1811_v41, %v1350_v45  ;;  %3255 = vmatmul.bf16.vlgmr.msrb.gmra.mxu0 %v1917_v52  ;;  %v1776_v5 = vpop.f32.mrf.mxu1 }
 0xad8   :  { %v1867_v63 = vmax.f32 %v1793_v56, 0.0  ;;  %v1833_v62 = vpop.f32.mrf.mxu0  ;;  %v1777_v61 = vadd.f32 %v1776_v5, %v1348_v30 }
 0xad9   :  { %v1868_v3 = vmax.f32 %v1812_v4, 0.0  ;;  %v1834_v11 = vadd.f32 %v1833_v62, %v1351_v26 }
 0xada   :  { %v1915_v6 = vpack.c.bf16 %v1867_v63, %v1851_v23  ;;  %v1882_v0 = vmax.f32 %v1777_v61, 0.0 }
 0xadb   :  { %v1916_v8 = vpack.c.bf16 %v1868_v3, %v1852_v10  ;;  %v1885_v60 = vmax.f32 %v1834_v11, 0.0 }
 0xadc   :  { %3217 = vmatmul.bf16.vlgmr.msra.gmra.mxu2 %v1915_v6 }
 0xadd   :  { %3236 = vmatmul.bf16.vlgmr.msrb.gmra.mxu3 %v1916_v8  ;;  %v1795_v9 = vpop.f32.mrf.mxu2 }
 0xade   :  { %v1814_v50 = vpop.f32.mrf.mxu3  ;;  %v1796_v31 = vadd.f32 %v1795_v9, %v1349_v12 }
 0xadf   :  { %v1778_v13 = vpop.f32.mrf.mxu1  ;;  %v1815_v55 = vadd.f32 %v1814_v50, %v1350_v45 }
 0xae0   :  { %v1779_v16 = vadd.f32 %v1778_v13, %v1348_v30  ;;  %v1835_v7 = vpop.f32.mrf.mxu0  ;;  %v1883_v42 = vmax.f32 %v1796_v31, 0.0 }
 0xae1   :  { %v1836_v28 = vadd.f32 %v1835_v7, %v1351_v26  ;;  %v1884_v15 = vmax.f32 %v1815_v55, 0.0 }
 0xae2   :  { %v1898_v53 = vmax.f32 %v1779_v16, 0.0 }
 0xae3   :  { %v1901_v1 = vmax.f32 %v1836_v28, 0.0 }
 0xae4   :  { %v1930_v36 = vpack.c.bf16 %v1898_v53, %v1882_v0 }
 0xae5   :  { %v1797_v21 = vpop.f32.mrf.mxu2  ;;  %v1933_v18 = vpack.c.bf16 %v1901_v1, %v1885_v60 }
 0xae6   :  { %v1798_v25 = vadd.f32 %v1797_v21, %v1349_v12  ;;  %v1816_v40 = vpop.f32.mrf.mxu3  ;;  %3203 = vmatmul.bf16.gmra.mxu1 %v1930_v36 }
 0xae7   :  { %v1817_v14 = vadd.f32 %v1816_v40, %v1350_v45  ;;  %3260 = vmatmul.bf16.gmra.mxu0 %v1933_v18  ;;  %v2971_v26 = vpop.f32.mrf.mxu1 }
 0xae8   :  { %v1899_v43 = vmax.f32 %v1798_v25, 0.0  ;;  %v2972_v58 = vadd.f32 %v10281_v34, %v2971_v26  ;;  %v3028_v29 = vpop.f32.mrf.mxu0 }
 0xae9   :  { %v1900_v27 = vmax.f32 %v1817_v14, 0.0 }
 0xaea   :  { %v1931_v22 = vpack.c.bf16 %v1899_v43, %v1883_v42 }
 0xaeb   :  { %v1932_v30 = vpack.c.bf16 %v1900_v27, %v1884_v15 }
 0xaec   :  { %3222 = vmatmul.bf16.gmra.mxu2 %v1931_v22 }
 0xaed   :  { %3241 = vmatmul.bf16.gmra.mxu3 %v1932_v30 }
 0xaef   :  { %v2973_v57 = vpop.f32.mrf.mxu1 }
 0xaf0   :  { %v3030_v44 = vpop.f32.mrf.mxu0  ;;  %v2974_v55 = vadd.f32 %v10281_v34, %v2973_v57 }
 0xaf1   :  { %v2990_v37 = vpop.f32.mrf.mxu2 }
 0xaf2   :  { %v2991_v38 = vadd.f32 %v2990_v37, %v2972_v58  ;;  %v3009_v39 = vpop.f32.mrf.mxu3 }
 0xaf4   :  { %v3010_v35 = vadd.f32 %v3009_v39, %v2991_v38 }
 0xaf6   :  { %v3029_v12 = vadd.f32 %v3028_v29, %v3010_v35 }
 0xaf9   :  { %v2992_v46 = vpop.f32.mrf.mxu2 }
 0xafa   :  { %v3011_v47 = vpop.f32.mrf.mxu3  ;;  %v2993_v18 = vadd.f32 %v2992_v46, %v2974_v55 }
 0xafc   :  { %v3012_v14 = vadd.f32 %v3011_v47, %v2993_v18 }
 0xafe   :  { %v3031_v22 = vadd.f32 %v3030_v44, %v3012_v14 }
 0xb03   :  { %v2976_v45 = vpop.f32.mrf.mxu1 }
 0xb04   :  { %v3033_v59 = vpop.f32.mrf.mxu0  ;;  %v2977_v2 = vadd.f32 %v10281_v34, %v2976_v45 }
 0xb0b   :  { %v2978_v48 = vpop.f32.mrf.mxu1 }
 0xb0c   :  { %v10284_v33 = vpop.f32.mrf.mxu0  ;;  %v2979_v39 = vadd.f32 %v10281_v34, %v2978_v48 }
 0xb0f   :  { %v2995_v49 = vpop.f32.mrf.mxu2 }
 0xb10   :  { %v2996_v51 = vadd.f32 %v2995_v49, %v2977_v2  ;;  %v3014_v52 = vpop.f32.mrf.mxu3 }
 0xb12   :  { %v3015_v54 = vadd.f32 %v3014_v52, %v2996_v51 }
 0xb13   :  { %v3047_v56 = vpop.f32.mrf.mxu1 }
 0xb14   :  { %v3104_v41 = vpop.f32.mrf.mxu0  ;;  %v3034_v4 = vadd.f32 %v3033_v59, %v3015_v54  ;;  %v3048_v25 = vadd.f32 %v3047_v56, %v3029_v12 }
 0xb17   :  { %v2997_v5 = vpop.f32.mrf.mxu2 }
 0xb18   :  { %v3016_v23 = vpop.f32.mrf.mxu3  ;;  %v2998_v45 = vadd.f32 %v2997_v5, %v2979_v39 }
 0xb1a   :  { %v3017_v49 = vadd.f32 %v3016_v23, %v2998_v45 }
 0xb1b   :  { %v3049_v63 = vpop.f32.mrf.mxu1 }
 0xb1c   :  { %v3106_v62 = vpop.f32.mrf.mxu0  ;;  %v3050_v26 = vadd.f32 %v3049_v63, %v3031_v22  ;;  %v3036_v63 = vadd.f32 %v10284_v33, %v3017_v49 }
 0xb1f   :  { %v3066_v10 = vpop.f32.mrf.mxu2 }
 0xb20   :  { %v3085_v3 = vpop.f32.mrf.mxu3  ;;  %v3067_v42 = vadd.f32 %v3066_v10, %v3048_v25 }
 0xb22   :  { %v3086_v30 = vadd.f32 %v3085_v3, %v3067_v42 }
 0xb23   :  { %v3052_v6 = vpop.f32.mrf.mxu1 }
 0xb24   :  { %v3109_v8 = vpop.f32.mrf.mxu0  ;;  %v3105_v29 = vadd.f32 %v3104_v41, %v3086_v30  ;;  %v3053_v47 = vadd.f32 %v3052_v6, %v3034_v4 }
 0xb27   :  { %v3068_v9 = vpop.f32.mrf.mxu2 }
 0xb28   :  { %v3087_v61 = vpop.f32.mrf.mxu3  ;;  %v3069_v37 = vadd.f32 %v3068_v9, %v3050_v26 }
 0xb2a   :  { %v3088_v59 = vadd.f32 %v3087_v61, %v3069_v37 }
 0xb2b   :  { %v3054_v50 = vpop.f32.mrf.mxu1 }
 0xb2c   :  { %v10287_v11 = vpop.f32.mrf.mxu0  ;;  %v3107_v52 = vadd.f32 %v3106_v62, %v3088_v59  ;;  %v3055_v48 = vadd.f32 %v3054_v50, %v3036_v63 }
 0xb2f   :  { %v3071_v13 = vpop.f32.mrf.mxu2 }
 0xb30   :  { %v3090_v16 = vpop.f32.mrf.mxu3  ;;  %v3072_v51 = vadd.f32 %v3071_v13, %v3053_v47 }
 0xb32   :  { %v3091_v41 = vadd.f32 %v3090_v16, %v3072_v51 }
 0xb33   :  { %v3123_v7 = vpop.f32.mrf.mxu1 }
 0xb34   :  { %v3180_v28 = vpop.f32.mrf.mxu0  ;;  %v3124_v35 = vadd.f32 %v3123_v7, %v3105_v29 }
 0xb37   :  { %v3073_v0 = vpop.f32.mrf.mxu2 }
 0xb38   :  { %v3092_v53 = vpop.f32.mrf.mxu3  ;;  %v3074_v7 = vadd.f32 %v3073_v0, %v3055_v48 }
 0xb3b   :  { %v3125_v60 = vpop.f32.mrf.mxu1 }
 0xb3c   :  { %v3182_v1 = vpop.f32.mrf.mxu0  ;;  %v3126_v56 = vadd.f32 %v3125_v60, %v3107_v52 }
 0xb3f   :  { %v3142_v31 = vpop.f32.mrf.mxu2 }
 0xb40   :  { %v3161_v36 = vpop.f32.mrf.mxu3  ;;  %v3143_v12 = vadd.f32 %v3142_v31, %v3124_v35  ;;  %v3110_v31 = vadd.f32 %v3109_v8, %v3091_v41 }
 0xb42   :  { %v3162_v44 = vadd.f32 %v3161_v36, %v3143_v12  ;;  %v3093_v36 = vadd.f32 %v3092_v53, %v3074_v7 }
 0xb43   :  { %v3128_v21 = vpop.f32.mrf.mxu1 }
 0xb44   :  { %v3185_v15 = vpop.f32.mrf.mxu0  ;;  %v3181_v3 = vadd.f32 %v3180_v28, %v3162_v44  ;;  %v3129_v13 = vadd.f32 %v3128_v21, %v3110_v31  ;;  %v3112_v50 = vadd.f32 %v10287_v11, %v3093_v36 }
 0xb47   :  { %v3144_v40 = vpop.f32.mrf.mxu2 }
 0xb48   :  { %v3163_v43 = vpop.f32.mrf.mxu3  ;;  %v3145_v10 = vadd.f32 %v3144_v40, %v3126_v56 }
 0xb4a   :  { %v3164_v4 = vadd.f32 %v3163_v43, %v3145_v10 }
 0xb4b   :  { %v3130_v27 = vpop.f32.mrf.mxu1 }
 0xb4c   :  { %v3187_v57 = vpop.f32.mrf.mxu0  ;;  %v3183_v60 = vadd.f32 %v3182_v1, %v3164_v4  ;;  %v3131_v21 = vadd.f32 %v3130_v27, %v3112_v50 }
 0xb4f   :  { %v3147_v58 = vpop.f32.mrf.mxu2 }
 0xb50   :  { %v3166_v38 = vpop.f32.mrf.mxu3  ;;  %v3148_v55 = vadd.f32 %v3147_v58, %v3129_v13 }
 0xb52   :  { %v3167_v40 = vadd.f32 %v3166_v38, %v3148_v55 }
 0xb53   :  { %v3199_v46 = vpop.f32.mrf.mxu1 }
 0xb54   :  { %v3256_v34 = vpop.f32.mrf.mxu0  ;;  %v3200_v9 = vadd.f32 %v3199_v46, %v3181_v3  ;;  %v3186_v22 = vadd.f32 %v3185_v15, %v3167_v40 }
 0xb57   :  { %v3149_v2 = vpop.f32.mrf.mxu2 }
 0xb58   :  { %v3168_v54 = vpop.f32.mrf.mxu3  ;;  %v3150_v53 = vadd.f32 %v3149_v2, %v3131_v21 }
 0xb5a   :  { %v3169_v58 = vadd.f32 %v3168_v54, %v3150_v53 }
 0xb5b   :  { %v3201_v5 = vpop.f32.mrf.mxu1 }
 0xb5c   :  { %v3202_v33 = vadd.f32 %v3201_v5, %v3183_v60  ;;  %v3258_v28 = vpop.f32.mrf.mxu0  ;;  %v3188_v45 = vadd.f32 %v3187_v57, %v3169_v58 }
 0xb5f   :  { %v3218_v61 = vpop.f32.mrf.mxu2 }
 0xb60   :  { %v3219_v6 = vadd.f32 %v3218_v61, %v3200_v9  ;;  %v3237_v23 = vpop.f32.mrf.mxu3 }
 0xb62   :  { %v3238_v62 = vadd.f32 %v3237_v23, %v3219_v6 }
 0xb63   :  { %v3204_v42 = vpop.f32.mrf.mxu1 }
 0xb64   :  { %v3257_v18 = vadd.f32 %v3256_v34, %v3238_v62  ;;  %v3205_v30 = vadd.f32 %v3204_v42, %v3186_v22  ;;  %v3261_v38 = vpop.f32.mrf.mxu0  ;;  %v8660_v62 = vld [vmem:[%s11525_s2 + $0x18] sm:$0xff] }
 0xb65   :  { %3410 = vmatpush.bf16.msra.mxu1 %v8660_v62 }
 0xb66   :  { %v3266_v16 = vadd.f32 %v3257_v18, %v9570_v19  ;;  %v8659_v18 = vld [vmem:[%s11525_s2 + $0x10] sm:$0xff] }
 0xb67   :  { %v3220_v25 = vpop.f32.mrf.mxu2 }
 0xb68   :  { %v3221_v14 = vadd.f32 %v3220_v25, %v3202_v33  ;;  %v3239_v0 = vpop.f32.mrf.mxu3  ;;  %v3272_v8 = vsel %vm79_vm0, %v3266_v16, 0.0 }
 0xb69   :  { %3273 = vadd.xlane.f32.xlu0 %v3272_v8  ;;  %3411 = vmatpush.bf16.msra.mxu1 %v8659_v18 }
 0xb6a   :  { %v3240_v43 = vadd.f32 %v3239_v0, %v3221_v14 }
 0xb6b   :  { %v3206_v35 = vpop.f32.mrf.mxu1 }
 0xb6c   :  { %v3259_v1 = vadd.f32 %v3258_v28, %v3240_v43  ;;  %v3207_v27 = vadd.f32 %v3206_v35, %v3188_v45  ;;  %v3263_v49 = vpop.f32.mrf.mxu0 }
 0xb6e   :  { %v3267_v26 = vadd.f32 %v3259_v1, %v9573_v32 }
 0xb6f   :  { %v3223_v19 = vpop.f32.mrf.mxu2 }
 0xb70   :  { %v3224_v37 = vadd.f32 %v3223_v19, %v3205_v30  ;;  %v3242_v29 = vpop.f32.mrf.mxu3  ;;  %v3275_v11 = vsel %vm79_vm0, %v3267_v26, 0.0 }
 0xb71   :  { %3276 = vadd.xlane.f32.xlu1 %v3275_v11  ;;  %v8839_v11 = vld [vmem:[%s11535_s12] ss:$0 sm:$0xff] }
 0xb72   :  { %v3243_v39 = vadd.f32 %v3242_v29, %v3224_v37 }
 0xb74   :  { %v3262_v59 = vadd.f32 %v3261_v38, %v3243_v39 }
 0xb76   :  { %v3268_v12 = vadd.f32 %v3262_v59, %v9641_v17 }
 0xb77   :  { %v3225_v15 = vpop.f32.mrf.mxu2 }
 0xb78   :  { %v3226_v46 = vadd.f32 %v3225_v15, %v3207_v27  ;;  %v3278_v47 = vsel %vm79_vm0, %v3268_v12, 0.0  ;;  %v3244_v32 = vpop.f32.mrf.mxu3 }
 0xb79   :  { %3279 = vadd.xlane.f32.xlu2 %v3278_v47 }
 0xb7a   :  { %v3245_v2 = vadd.f32 %v3244_v32, %v3226_v46 }
 0xb7c   :  { %v3264_v51 = vadd.f32 %v3263_v49, %v3245_v2 }
 0xb7e   :  { %v3269_v52 = vadd.f32 %v3264_v51, %v9644_v20 }
 0xb80   :  { %v3281_v44 = vsel %vm79_vm0, %v3269_v52, 0.0 }
 0xb81   :  { %3282 = vadd.xlane.f32.xlu0 %v3281_v44 }
 0xbdc   :  { %v3274_v54 = vpop.xlane.xlu0 %3273 }
 0xbdd   :  { %v3284_v57 = vmul.f32 %v3274_v54, %v9478_v24 }
 0xbdf   :  { %v3288_v56 = vsub.f32 %v3266_v16, %v3284_v57 }
 0xbe1   :  { %v3292_v63 = vmul.f32 %v3288_v56, %v3288_v56 }
 0xbe3   :  { %v3296_v17 = vsel %vm79_vm0, %v3292_v63, 0.0 }
 0xbe4   :  { %v3277_v41 = vpop.xlane.xlu1 %3276  ;;  %3297 = vadd.xlane.f32.xlu1 %v3296_v17 }
 0xbe5   :  { %v3285_v10 = vmul.f32 %v3277_v41, %v9478_v24 }
 0xbe7   :  { %v10304_v3 = vsub.f32 %v3267_v26, %v3285_v10 }
 0xbe9   :  { %v3293_v34 = vmul.f32 %v10304_v3, %v10304_v3 }
 0xbeb   :  { %v3299_v20 = vsel %vm79_vm0, %v3293_v34, 0.0 }
 0xbec   :  { %3300 = vadd.xlane.f32.xlu2 %v3299_v20  ;;  %v3280_v48 = vpop.xlane.xlu2 %3279 }
 0xbed   :  { %v3286_v9 = vmul.f32 %v3280_v48, %v9478_v24 }
 0xbef   :  { %v10310_v5 = vsub.f32 %v3268_v12, %v3286_v9  ;;  %v8840_v12 = vld [vmem:[%s11536_s13] ss:$0 sm:$0xff] }
 0xbf1   :  { %v3294_v61 = vmul.f32 %v10310_v5, %v10310_v5 }
 0xbf3   :  { %v3302_v7 = vsel %vm79_vm0, %v3294_v61, 0.0 }
 0xbf4   :  { %v3283_v31 = vpop.xlane.xlu0 %3282  ;;  %3303 = vadd.xlane.f32.xlu0 %v3302_v7 }
 0xbf5   :  { %v3287_v4 = vmul.f32 %v3283_v31, %v9478_v24 }
 0xbf7   :  { %v10316_v6 = vsub.f32 %v3269_v52, %v3287_v4 }
 0xbf9   :  { %v3295_v23 = vmul.f32 %v10316_v6, %v10316_v6 }
 0xbfb   :  { %v3305_v13 = vsel %vm79_vm0, %v3295_v23, 0.0 }
 0xbfc   :  { %3306 = vadd.xlane.f32.xlu1 %v3305_v13 }
 0xc57   :  { %v3298_v36 = vpop.xlane.xlu1 %3297 }
 0xc58   :  { %v3308_v55 = vmul.f32 %v3298_v36, %v9478_v24 }
 0xc5a   :  { %v3312_v60 = vadd.f32 1e-05, %v3308_v55 }
 0xc5c   :  { %8923 = vrsqrt.f32 %v3312_v60  ;;  %vm3322_vm4 = vweird.f32 %v3312_v60 }
 0xc5f   :  { %v3301_v33 = vpop.xlane.xlu2 %3300 }
 0xc60   :  { %v3309_v16 = vmul.f32 %v3301_v33, %v9478_v24 }
 0xc62   :  { %v8924_v28 = vpop.eup %8923  ;;  %v3313_v25 = vadd.f32 1e-05, %v3309_v16 }
 0xc63   :  { %v3317_v50 = vmul.f32 %v8924_v28, %v3312_v60  ;;  %vm3323_vm3 = vweird.f32 %v8924_v28 }
 0xc64   :  { %8925 = vrsqrt.f32 %v3313_v25  ;;  %vm3324_vm5 = vmor %vm3322_vm4, %vm3323_vm3  ;;  %vm3332_vm7 = vweird.f32 %v3313_v25 }
 0xc65   :  { %v3318_v40 = vmul.f32 %v8924_v28, %v3317_v50 }
 0xc67   :  { %v3319_v14 = vmul.f32 0.5, %v3318_v40  ;;  %v3304_v0 = vpop.xlane.xlu0 %3303 }
 0xc68   :  { %v3310_v8 = vmul.f32 %v3304_v0, %v9478_v24 }
 0xc69   :  { %v3320_v42 = vsub.f32 1.5, %v3319_v14 }
 0xc6a   :  { %v8926_v21 = vpop.eup %8925  ;;  %v3314_v43 = vadd.f32 1e-05, %v3310_v8 }
 0xc6b   :  { %v3321_v53 = vmul.f32 %v8924_v28, %v3320_v42  ;;  %v3327_v22 = vmul.f32 %v8926_v21, %v3313_v25  ;;  %vm3333_vm6 = vweird.f32 %v8926_v21 }
 0xc6c   :  { %8927 = vrsqrt.f32 %v3314_v43  ;;  %vm3334_vm8 = vmor %vm3332_vm7, %vm3333_vm6  ;;  %vm3342_vm10 = vweird.f32 %v3314_v43 }
 0xc6d   :  { %v3328_v1 = vmul.f32 %v8926_v21, %v3327_v22  ;;  %v3325_v30 = vsel %vm3324_vm5, %v8924_v28, %v3321_v53 }
 0xc6e   :  { %v3356_v38 = vmul.f32 %v3325_v30, %v3288_v56 }
 0xc6f   :  { %v3329_v26 = vmul.f32 0.5, %v3328_v1  ;;  %v3307_v19 = vpop.xlane.xlu1 %3306 }
 0xc70   :  { %v3311_v58 = vmul.f32 %v3307_v19, %v9478_v24  ;;  %v3363_v15 = vmul.f32 %v8839_v11, %v3356_v38 }
 0xc71   :  { %v3330_v37 = vsub.f32 1.5, %v3329_v26 }
 0xc72   :  { %v8928_v29 = vpop.eup %8927  ;;  %v3315_v39 = vadd.f32 1e-05, %v3311_v58  ;;  %v10338_v51 = vadd.f32 %v8840_v12, %v3363_v15 }
 0xc73   :  { %v3331_v35 = vmul.f32 %v8926_v21, %v3330_v37  ;;  %v3337_v45 = vmul.f32 %v8928_v29, %v3314_v43  ;;  %vm3343_vm9 = vweird.f32 %v8928_v29 }
 0xc74   :  { %8929 = vrsqrt.f32 %v3315_v39  ;;  %vm3344_vm11 = vmor %vm3342_vm10, %vm3343_vm9  ;;  %vm3352_vm13 = vweird.f32 %v3315_v39 }
 0xc75   :  { %v3335_v59 = vsel %vm3334_vm8, %v8926_v21, %v3331_v35  ;;  %v3338_v27 = vmul.f32 %v8928_v29, %v3337_v45  ;;  %v10384_v45 = vld [vmem:[%s11524_s1] sm:$0xff]  ;;  %s11551_s1 = smov 112  }
 0xc76   :  { %v3357_v46 = vmul.f32 %v3335_v59, %v10304_v3 }
 0xc77   :  { %v3339_v47 = vmul.f32 0.5, %v3338_v27 }
 0xc78   :  { %v3364_v32 = vmul.f32 %v8839_v11, %v3357_v46 }
 0xc79   :  { %v3340_v2 = vsub.f32 1.5, %v3339_v47 }
 0xc7a   :  { %v8930_v49 = vpop.eup %8929  ;;  %v10340_v52 = vadd.f32 %v8840_v12, %v3364_v32 }
 0xc7b   :  { %v3341_v44 = vmul.f32 %v8928_v29, %v3340_v2  ;;  %v3347_v54 = vmul.f32 %v8930_v49, %v3315_v39  ;;  %vm3353_vm12 = vweird.f32 %v8930_v49 }
 0xc7c   :  { %v3374_v57 = vpack.c.bf16 %v10340_v52, %v10338_v51  ;;  %vm3354_vm14 = vmor %vm3352_vm13, %vm3353_vm12 }
 0xc7d   :  { %v3348_v56 = vmul.f32 %v8930_v49, %v3347_v54  ;;  %v3345_v63 = vsel %vm3344_vm11, %v8928_v29, %v3341_v44 }
 0xc7e   :  { %7483 = vmatmul.msk.bf16.vlgmr.msra.gmra.mxu1 %vm79_vm0, %v3374_v57  ;;  %v3358_v10 = vmul.f32 %v3345_v63, %v10310_v5  ;;  %v8841_v5 = vld [vmem:[%s11526_s3 + $0x1] ss:$0 sm:$0xff] }
 0xc7f   :  { %v3349_v17 = vmul.f32 0.5, %v3348_v56 }
 0xc80   :  { %v3365_v48 = vmul.f32 %v8839_v11, %v3358_v10 }
 0xc81   :  { %v3350_v41 = vsub.f32 1.5, %v3349_v17 }
 0xc82   :  { %v10347_v61 = vadd.f32 %v8840_v12, %v3365_v48 }
 0xc83   :  { %v3351_v3 = vmul.f32 %v8930_v49, %v3350_v41 }
 0xc85   :  { %v3355_v34 = vsel %vm3354_vm14, %v8930_v49, %v3351_v3 }
 0xc86   :  { %v3359_v20 = vmul.f32 %v3355_v34, %v10316_v6 }
 0xc88   :  { %v3366_v9 = vmul.f32 %v8839_v11, %v3359_v20 }
 0xc8a   :  { %v10349_v7 = vadd.f32 %v8840_v12, %v3366_v9 }
 0xc8c   :  { %v3375_v31 = vpack.c.bf16 %v10349_v7, %v10347_v61 }
 0xc8e   :  { %7484 = vmatmul.msk.bf16.gmra.mxu1 %vm79_vm0, %v3375_v31 }
 0xcfb   :  { %v3413_v4 = vpop.f32.mrf.mxu1 }
 0xcfc   :  { %v3414_v23 = vadd.f32 %v8841_v5, %v3413_v4 }
 0xcfe   :  { %v3428_v13 = vpack.c.bf16 %v3414_v23, %v3414_v23 }
 0xd00   :  { %v3433_v62 = vunpack.c.l.b16 %v3428_v13 }
 0xd02   :  { %v10357_v6 = vpack.c.b16 %v3433_v62, %v3433_v62 }
 0xd03   :  { %v3415_v36 = vpop.f32.mrf.mxu1 }
 0xd04   :  { %v3416_v55 = vadd.f32 %v8841_v5, %v3415_v36  ;;  %3435 = vrot.lane.b32.xlu2 %v10357_v6, %s9042_s17 }
 0xd06   :  { %v3429_v60 = vpack.c.bf16 %v3416_v55, %v3416_v55 }
 0xd08   :  { %v3457_v18 = vunpack.c.l.b16 %v3429_v60 }
 0xd0a   :  { %v10361_v33 = vpack.c.b16 %v3457_v18, %v3457_v18 }
 0xd0b   :  { %v3418_v16 = vpop.f32.mrf.mxu1 }
 0xd0c   :  { %v3419_v28 = vadd.f32 %v8841_v5, %v3418_v16  ;;  %3459 = vrot.lane.b32.xlu1 %v10361_v33, %s9042_s17 }
 0xd0e   :  { %v3430_v25 = vpack.c.bf16 %v3419_v28, %v3419_v28 }
 0xd10   :  { %v3481_v50 = vunpack.c.l.b16 %v3430_v25 }
 0xd12   :  { %v10365_v40 = vpack.c.b16 %v3481_v50, %v3481_v50 }
 0xd13   :  { %v3420_v14 = vpop.f32.mrf.mxu1 }
 0xd14   :  { %v3421_v0 = vadd.f32 %v8841_v5, %v3420_v14  ;;  %3483 = vrot.lane.b32.xlu0 %v10365_v40, %s9042_s17 }
 0xd16   :  { %v3431_v8 = vpack.c.bf16 %v3421_v0, %v3421_v0 }
 0xd18   :  { %v3505_v42 = vunpack.c.l.b16 %v3431_v8 }
 0xd1a   :  { %v10369_v21 = vpack.c.b16 %v3505_v42, %v3505_v42 }
 0xd1c   :  { %3507 = vrot.lane.b32.xlu0 %v10369_v21, %s9042_s17 }
 0xd5e   :  { %v3436_v43 = vpop.permute.xlu2 %3435 }
 0xd5f   :  { %v3441_v53 = vsel %vm118_vm1, %v3436_v43, 0 }
 0xd60   :  { %3450 = vmatpush.bf16.xpose.msrb.mxu2 %v3441_v53 }
 0xd67   :  { %7489 = vmatmul.msk.bf16.vlgmr.msrb.gmra.mxu2 %vm118_vm1, %v3428_v13 }
 0xd7e   :  { %v3460_v22 = vpop.permute.xlu1 %3459 }
 0xd7f   :  { %v3465_v1 = vsel %vm118_vm1, %v3460_v22, 0 }
 0xd80   :  { %3474 = vmatpush.bf16.xpose.msra.mxu3 %v3465_v1 }
 0xd86   :  { %v3484_v30 = vpop.permute.xlu0 %3483 }
 0xd87   :  { %v3489_v26 = vsel %vm118_vm1, %v3484_v30, 0  ;;  %7490 = vmatmul.msk.bf16.vlgmr.msra.gmra.mxu3 %vm118_vm1, %v3429_v60 }
 0xd88   :  { %3498 = vmatpush.bf16.xpose.msra.mxu2 %v3489_v26 }
 0xd8e   :  { %v3508_v19 = vpop.permute.xlu0 %3507 }
 0xd8f   :  { %v3513_v58 = vsel %vm118_vm1, %v3508_v19, 0  ;;  %7491 = vmatmul.msk.bf16.vlgmr.msra.gmra.mxu2 %vm118_vm1, %v3430_v25 }
 0xd90   :  { %3522 = vmatpush.bf16.xpose.msrb.mxu3 %v3513_v58 }
 0xd97   :  { %7492 = vmatmul.msk.bf16.vlgmr.msrb.gmra.mxu3 %vm118_vm1, %v3431_v8 }
 0xdea   :  { %v3452_v37 = vpop.f32.mrf.mxu2 }
 0xdeb   :  { %v3528_v49 = vmul.f32 0.35355338, %v3452_v37 }
 0xded   :  { %v3532_v44 = vadd.f32 %v10384_v45, %v3528_v49 }
 0xdef   :  { %v3536_v54 = vsel %vm118_vm1, %v3532_v44, -inf }
 0xdf2   :  { %v3454_v29 = vpop.f32.mrf.mxu2 }
 0xe0a   :  { %v3476_v11 = vpop.f32.mrf.mxu3 }
 0xe0b   :  { %v3529_v60 = vmul.f32 0.35355338, %v3476_v11 }
 0xe0d   :  { %v3533_v28 = vadd.f32 %v10384_v45, %v3529_v60 }
 0xe0f   :  { %v3539_v25 = vsel %vm118_vm1, %v3533_v28, -inf }
 0xe12   :  { %v3478_v38 = vpop.f32.mrf.mxu3  ;;  %v3500_v39 = vpop.f32.mrf.mxu2 }
 0xe13   :  { %v3530_v35 = vmul.f32 0.35355338, %v3500_v39 }
 0xe15   :  { %v3534_v59 = vadd.f32 %v10384_v45, %v3530_v35 }
 0xe17   :  { %v3542_v27 = vsel %vm118_vm1, %v3534_v59, -inf }
 0xe18   :  { %3543 = vmax.xlane.f32.xlu2 %v3542_v27 }
 0xe1a   :  { %v3502_v12 = vpop.f32.mrf.mxu2  ;;  %v3524_v15 = vpop.f32.mrf.mxu3 }
 0xe1b   :  { %v3531_v46 = vmul.f32 0.35355338, %v3524_v15 }
 0xe1d   :  { %v3535_v47 = vadd.f32 %v10384_v45, %v3531_v46 }
 0xe1f   :  { %v3545_v32 = vsel %vm118_vm1, %v3535_v47, -inf }
 0xe20   :  { %3546 = vmax.xlane.f32.xlu0 %v3545_v32 }
 0xe22   :  { %v3526_v2 = vpop.f32.mrf.mxu3 }
 0xe30   :  { %3626 = vrot.lane.b32.xlu2 %v10365_v40, %s9043_s20 }
 0xe34   :  { %3718 = vrot.lane.b32.xlu0 %v10365_v40, %s9044_s21 }
 0xe38   :  { %3647 = vrot.lane.b32.xlu2 %v10369_v21, %s9043_s20 }
 0xe3c   :  { %3741 = vrot.lane.b32.xlu0 %v10369_v21, %s9044_s21 }
 0xe40   :  { %3739 = vrot.lane.b32.xlu2 %v10369_v21, %s9045_s22 }
 0xe66   :  { %3537 = vmax.xlane.f32.xlu0 %v3536_v54 }
 0xe7a   :  { %3584 = vrot.lane.b32.xlu0 %v10357_v6, %s9043_s20 }
 0xe8b   :  { %v3544_v57 = vpop.xlane.xlu2 %3543 }
 0xe8c   :  { %v3550_v56 = vsub.f32 %v3534_v59, %v3544_v57 }
 0xe8e   :  { %v3556_v63 = vmul.f32 1.442695, %v3550_v56 }
 0xe90   :  { %8931 = vpow2.f32 %v3556_v63 }
 0xe93   :  { %v3547_v17 = vpop.xlane.xlu0 %3546  ;;  %v3627_v41 = vpop.permute.xlu2 %3626 }
 0xe94   :  { %v3551_v10 = vsub.f32 %v3535_v47, %v3547_v17  ;;  %v3632_v3 = vsel %vm271_vm2, %v3627_v41, 0 }
 0xe95   :  { %3641 = vmatpush.bf16.msrb.mxu2 %v3632_v3 }
 0xe96   :  { %v8932_v34 = vpop.eup %8931  ;;  %v3558_v20 = vmul.f32 1.442695, %v3551_v10 }
 0xe97   :  { %v3566_v48 = vsel %vm118_vm1, %v8932_v34, 0.0 }
 0xe98   :  { %8933 = vpow2.f32 %v3558_v20  ;;  %3567 = vadd.xlane.f32.xlu1 %v3566_v48 }
 0xe9b   :  { %v3648_v9 = vpop.permute.xlu2 %3647 }
 0xe9c   :  { %v3653_v31 = vsel %vm271_vm2, %v3648_v9, 0 }
 0xe9d   :  { %3662 = vmatpush.bf16.msra.mxu3 %v3653_v31 }
 0xe9e   :  { %v8934_v5 = vpop.eup %8933 }
 0xe9f   :  { %v3569_v4 = vsel %vm118_vm1, %v8934_v5, 0.0 }
 0xea0   :  { %3570 = vadd.xlane.f32.xlu1 %v3569_v4 }
 0xea3   :  { %v3740_v37 = vpop.permute.xlu2 %3739 }
 0xea6   :  { %v3719_v23 = vpop.permute.xlu0 %3718 }
 0xea7   :  { %v3724_v13 = vsel %vm118_vm1, %v3719_v23, 0 }
 0xea8   :  { %3733 = vmatpush.bf16.xpose.msra.mxu2 %v3724_v13 }
 0xeae   :  { %v3742_v62 = vpop.permute.xlu0 %3741 }
 0xeaf   :  { %v3747_v36 = vsel %vm118_vm1, %v3742_v62, 0 }
 0xeb0   :  { %3756 = vmatpush.bf16.xpose.msrb.mxu3 %v3747_v36 }
 0xeb9   :  { %3716 = vrot.lane.b32.xlu1 %v10365_v40, %s9045_s22 }
 0xed9   :  { %v3538_v55 = vpop.xlane.xlu0 %3537 }
 0xeda   :  { %v3548_v18 = vsub.f32 %v3532_v44, %v3538_v55 }
 0xedc   :  { %v3552_v16 = vmul.f32 1.442695, %v3548_v18 }
 0xede   :  { %8935 = vpow2.f32 %v3552_v16 }
 0xee3   :  { %3540 = vmax.xlane.f32.xlu1 %v3539_v25 }
 0xee4   :  { %v8936_v50 = vpop.eup %8935 }
 0xee5   :  { %v3560_v14 = vsel %vm118_vm1, %v8936_v50, 0.0 }
 0xeeb   :  { %3561 = vadd.xlane.f32.xlu1 %v3560_v14 }
 0xeec   :  { %v3585_v0 = vpop.permute.xlu0 %3584 }
 0xeed   :  { %v3590_v8 = vsel %vm271_vm2, %v3585_v0, 0 }
 0xeee   :  { %3599 = vmatpush.bf16.msra.mxu0 %v3590_v8 }
 0xf04   :  { %3605 = vrot.lane.b32.xlu1 %v10361_v33, %s9043_s20  ;;  %s11552_s20 = smov 56  }
 0xf0b   :  { %v3568_v42 = vpop.xlane.xlu1 %3567 }
 0xf0c   :  { %8937 = vrcp.f32 %v3568_v42  ;;  %3693 = vrot.lane.b32.xlu1 %v10361_v33, %s9045_s22 }
 0xf12   :  { %v8938_v43 = vpop.eup %8937 }
 0xf13   :  { %v3578_v53 = vmul.f32 %v8938_v43, %v8932_v34  ;;  %v3571_v22 = vpop.xlane.xlu1 %3570 }
 0xf14   :  { %8939 = vrcp.f32 %v3571_v22  ;;  %3962 = vrot.lane.b32.xlu1 %v10357_v6, %s9047_s24 }
 0xf15   :  { %v3582_v1 = vpack.c.bf16 %v3578_v53, %v3578_v53 }
 0xf17   :  { %7495 = vmatmul.msk.bf16.vlgmr.msrb.gmra.mxu2 %vm118_vm1, %v3582_v1 }
 0xf1a   :  { %v8940_v30 = vpop.eup %8939 }
 0xf1b   :  { %v3579_v26 = vmul.f32 %v8940_v30, %v8934_v5 }
 0xf1c   :  { %3960 = vrot.lane.b32.xlu1 %v10357_v6, %s11551_s1 }
 0xf1d   :  { %v3583_v19 = vpack.c.bf16 %v3579_v26, %v3579_v26 }
 0xf1f   :  { %7496 = vmatmul.msk.bf16.vlgmr.msra.gmra.mxu3 %vm118_vm1, %v3583_v19 }
 0xf24   :  { %3881 = vrot.lane.b32.xlu1 %v10369_v21, %s11552_s20 }
 0xf2b   :  { %v3717_v58 = vpop.permute.xlu1 %3716 }
 0xf2c   :  { %4008 = vrot.lane.b32.xlu1 %v10365_v40, %s9047_s24  ;;  %7499 = vmatmul.msk.bf16.vlgmr.msra.gmra.mxu2 %vm118_vm1, %v3717_v58 }
 0xf2f   :  { %7500 = vmatmul.msk.bf16.vlgmr.msrb.gmra.mxu3 %vm118_vm1, %v3740_v37 }
 0xf34   :  { %4006 = vrot.lane.b32.xlu1 %v10365_v40, %s11551_s1 }
 0xf3c   :  { %3983 = vrot.lane.b32.xlu1 %v10361_v33, %s11551_s1 }
 0xf44   :  { %4031 = vrot.lane.b32.xlu1 %v10369_v21, %s9047_s24 }
 0xf56   :  { %v3541_v29 = vpop.xlane.xlu1 %3540 }
 0xf57   :  { %v3549_v11 = vsub.f32 %v3533_v28, %v3541_v29 }
 0xf59   :  { %v3554_v38 = vmul.f32 1.442695, %v3549_v11 }
 0xf5b   :  { %8941 = vpow2.f32 %v3554_v38 }
 0xf5e   :  { %v3562_v39 = vpop.xlane.xlu1 %3561 }
 0xf5f   :  { %8943 = vrcp.f32 %v3562_v39 }
 0xf61   :  { %v8942_v35 = vpop.eup %8941 }
 0xf62   :  { %v3563_v59 = vsel %vm118_vm1, %v8942_v35, 0.0 }
 0xf63   :  { %3564 = vadd.xlane.f32.xlu2 %v3563_v59 }
 0xf65   :  { %v8944_v27 = vpop.eup %8943 }
 0xf66   :  { %v3576_v12 = vmul.f32 %v8944_v27, %v8936_v50 }
 0xf68   :  { %v3580_v15 = vpack.c.bf16 %v3576_v12, %v3576_v12 }
 0xf6a   :  { %7493 = vmatmul.msk.bf16.vlgmr.msra.gmra.mxu0 %vm118_vm1, %v3580_v15 }
 0xf76   :  { %v3606_v46 = vpop.permute.xlu1 %3605 }
 0xf77   :  { %v3611_v47 = vsel %vm271_vm2, %v3606_v46, 0 }
 0xf78   :  { %3620 = vmatpush.bf16.msrb.mxu1 %v3611_v47 }
 0xf7e   :  { %v3694_v32 = vpop.permute.xlu1 %3693 }
 0xf86   :  { %v3963_v2 = vpop.permute.xlu1 %3962 }
 0xf87   :  { %v3968_v29 = vsel %vm118_vm1, %v3963_v2, 0 }
 0xf8e   :  { %v10441_v49 = vpop.permute.xlu1 %3960 }
 0xf96   :  { %v3882_v44 = vpop.permute.xlu1 %3881 }
 0xf97   :  { %v3887_v54 = vsel %vm271_vm2, %v3882_v44, 0 }
 0xf98   :  { %3896 = vmatpush.bf16.msra.mxu3 %v3887_v54 }
 0xf9a   :  { %v10444_v57 = vpop.f32.mrf.mxu2 }
 0xf9e   :  { %v4009_v39 = vpop.permute.xlu1 %4008 }
 0xf9f   :  { %v4014_v44 = vsel %vm118_vm1, %v4009_v39, 0 }
 0xfa2   :  { %v3645_v56 = vpop.f32.mrf.mxu2  ;;  %v10446_v63 = vpop.f32.mrf.mxu3 }
 0xfa3   :  { %v3669_v17 = vpack.c.bf16 %v10446_v63, %v10444_v57  ;;  %v7486_v63 = vld [vmem:[%s11527_s4 + $0x14] sm:$0xf] }
 0xfaa   :  { %v3666_v41 = vpop.f32.mrf.mxu3 }
 0xfaf   :  { %v3735_v10 = vpop.f32.mrf.mxu2 }
 0xfb0   :  { %v3764_v3 = vmul.f32 0.35355338, %v3735_v10 }
 0xfb2   :  { %v3758_v34 = vpop.f32.mrf.mxu3  ;;  %v3768_v20 = vadd.f32 %v10384_v45, %v3764_v3 }
 0xfb3   :  { %v3765_v48 = vmul.f32 0.35355338, %v3758_v34 }
 0xfb4   :  { %v3776_v9 = vsel %vm118_vm1, %v3768_v20, -inf }
 0xfb5   :  { %3777 = vmax.xlane.f32.xlu2 %v3776_v9  ;;  %v3769_v31 = vadd.f32 %v10384_v45, %v3765_v48 }
 0xfb7   :  { %v3737_v5 = vpop.f32.mrf.mxu2  ;;  %v3779_v4 = vsel %vm118_vm1, %v3769_v31, -inf }
 0xfb8   :  { %3780 = vmax.xlane.f32.xlu0 %v3779_v4 }
 0xfba   :  { %v3760_v23 = vpop.f32.mrf.mxu3 }
 0xfcc   :  { %3695 = vrot.lane.b32.xlu0 %v10361_v33, %s9044_s21 }
 0xfcd   :  { %3672 = vrot.lane.b32.xlu2 %v10357_v6, %s9044_s21  ;;  %s11553_s21 = smov 48  }
 0xfd5   :  { %3670 = vrot.lane.b32.xlu2 %v10357_v6, %s9045_s22  ;;  %s11554_s22 = smov 72  }
 0xfd6   :  { %v3565_v13 = vpop.xlane.xlu2 %3564 }
 0xfd7   :  { %8945 = vrcp.f32 %v3565_v13 }
 0xfdd   :  { %v8946_v62 = vpop.eup %8945  ;;  %3860 = vrot.lane.b32.xlu2 %v10365_v40, %s11552_s20 }
 0xfde   :  { %v3577_v36 = vmul.f32 %v8946_v62, %v8942_v35  ;;  %v4007_v35 = vpop.permute.xlu1 %4006 }
 0xfe0   :  { %v3581_v55 = vpack.c.bf16 %v3577_v36, %v3577_v36 }
 0xfe2   :  { %7494 = vmatmul.msk.bf16.vlgmr.msrb.gmra.mxu1 %vm118_vm1, %v3581_v55 }
 0xfe6   :  { %v3984_v15 = vpop.permute.xlu1 %3983 }
 0xfe7   :  { %v10463_v60 = vpop.f32.mrf.mxu0 }
 0xfee   :  { %v4032_v3 = vpop.permute.xlu1 %4031 }
 0xfef   :  { %v3603_v18 = vpop.f32.mrf.mxu0  ;;  %v4037_v9 = vsel %vm118_vm1, %v4032_v3, 0 }
0x1028   :  { %v3778_v16 = vpop.xlane.xlu2 %3777 }
0x1029   :  { %v3784_v28 = vsub.f32 %v3768_v20, %v3778_v16 }
0x102b   :  { %v3790_v25 = vmul.f32 1.442695, %v3784_v28  ;;  %v3781_v50 = vpop.xlane.xlu0 %3780 }
0x102c   :  { %v3785_v14 = vsub.f32 %v3769_v31, %v3781_v50 }
0x102d   :  { %8947 = vpow2.f32 %v3790_v25 }
0x102e   :  { %v3792_v0 = vmul.f32 1.442695, %v3785_v14 }
0x1030   :  { %8949 = vpow2.f32 %v3792_v0  ;;  %v3673_v8 = vpop.permute.xlu2 %3672 }
0x1031   :  { %v3678_v42 = vsel %vm118_vm1, %v3673_v8, 0 }
0x1032   :  { %3687 = vmatpush.bf16.xpose.msrb.mxu0 %v3678_v42 }
0x1033   :  { %v8948_v43 = vpop.eup %8947 }
0x1034   :  { %v3800_v53 = vsel %vm118_vm1, %v8948_v43, 0.0 }
0x1035   :  { %3801 = vadd.xlane.f32.xlu0 %v3800_v53 }
0x1036   :  { %v8950_v22 = vpop.eup %8949 }
0x1037   :  { %v3803_v1 = vsel %vm118_vm1, %v8950_v22, 0.0 }
0x1038   :  { %3804 = vadd.xlane.f32.xlu2 %v3803_v1  ;;  %v3671_v30 = vpop.permute.xlu2 %3670 }
0x1039   :  { %7497 = vmatmul.msk.bf16.vlgmr.msrb.gmra.mxu0 %vm118_vm1, %v3671_v30 }
0x103e   :  { %v3696_v26 = vpop.permute.xlu0 %3695 }
0x103f   :  { %v3701_v19 = vsel %vm118_vm1, %v3696_v26, 0 }
0x1040   :  { %3710 = vmatpush.bf16.xpose.msra.mxu1 %v3701_v19  ;;  %v3861_v58 = vpop.permute.xlu2 %3860 }
0x1041   :  { %v3866_v37 = vsel %vm271_vm2, %v3861_v58, 0 }
0x1042   :  { %3875 = vmatpush.bf16.msrb.mxu2 %v3866_v37 }
0x1046   :  { %3977 = vmatpush.bf16.xpose.msra.mxu2 %v3968_v29 }
0x1047   :  { %7498 = vmatmul.msk.bf16.vlgmr.msra.gmra.mxu1 %vm118_vm1, %v3694_v32 }
0x1049   :  { %3985 = vrot.lane.b32.xlu0 %v10361_v33, %s9047_s24  ;;  %s11555_s24 = smov 104  }
0x1050   :  { %4029 = vrot.lane.b32.xlu2 %v10369_v21, %s11551_s1 }
0x105f   :  { %v10477_v11 = vpop.f32.mrf.mxu1 }
0x1067   :  { %v3624_v38 = vpop.f32.mrf.mxu1 }
0x10a8   :  { %v3802_v59 = vpop.xlane.xlu0 %3801 }
0x10a9   :  { %8951 = vrcp.f32 %v3802_v59 }
0x10ab   :  { %v3805_v27 = vpop.xlane.xlu2 %3804 }
0x10ac   :  { %8953 = vrcp.f32 %v3805_v27 }
0x10af   :  { %v8952_v12 = vpop.eup %8951 }
0x10b0   :  { %v3812_v46 = vmul.f32 %v8952_v12, %v8948_v43 }
0x10b2   :  { %v8954_v47 = vpop.eup %8953  ;;  %v3816_v32 = vpack.c.bf16 %v3812_v46, %v3812_v46 }
0x10b3   :  { %v3813_v2 = vmul.f32 %v8954_v47, %v8950_v22  ;;  %v4030_v36 = vpop.permute.xlu2 %4029 }
0x10b4   :  { %7503 = vmatmul.msk.bf16.vlgmr.msrb.gmra.mxu2 %vm118_vm1, %v3816_v32 }
0x10b5   :  { %v3817_v54 = vpack.c.bf16 %v3813_v2, %v3813_v2  ;;  %4023 = vmatpush.bf16.xpose.msrb.mxu2 %v4014_v44 }
0x10b6   :  { %v3689_v56 = vpop.f32.mrf.mxu0 }
0x10b7   :  { %v3762_v41 = vmul.f32 0.35355338, %v3689_v56  ;;  %7504 = vmatmul.msk.bf16.vlgmr.msra.gmra.mxu3 %vm118_vm1, %v3817_v54 }
0x10b9   :  { %v3766_v10 = vadd.f32 %v10384_v45, %v3762_v41 }
0x10bb   :  { %v3986_v34 = vpop.permute.xlu0 %3985  ;;  %v3770_v20 = vsel %vm118_vm1, %v3766_v10, -inf }
0x10bc   :  { %v3991_v48 = vsel %vm118_vm1, %v3986_v34, 0  ;;  %3771 = vmax.xlane.f32.xlu0 %v3770_v20 }
0x10bd   :  { %4000 = vmatpush.bf16.xpose.msrb.mxu3 %v3991_v48 }
0x10be   :  { %v3691_v31 = vpop.f32.mrf.mxu0 }
0x10c4   :  { %v3712_v5 = vpop.f32.mrf.mxu1  ;;  %7509 = vmatmul.msk.bf16.vlgmr.msra.gmra.mxu2 %vm118_vm1, %v10441_v49 }
0x10c5   :  { %4046 = vmatpush.bf16.xpose.msra.mxu3 %v4037_v9  ;;  %v3763_v4 = vmul.f32 0.35355338, %v3712_v5 }
0x10c7   :  { %7510 = vmatmul.msk.bf16.vlgmr.msrb.gmra.mxu3 %vm118_vm1, %v3984_v15  ;;  %v3767_v23 = vadd.f32 %v10384_v45, %v3763_v4 }
0x10c9   :  { %v3773_v13 = vsel %vm118_vm1, %v3767_v23, -inf }
0x10ca   :  { %3774 = vmax.xlane.f32.xlu1 %v3773_v13 }
0x10cc   :  { %v3714_v62 = vpop.f32.mrf.mxu1 }
0x10d4   :  { %7511 = vmatmul.msk.bf16.vlgmr.msrb.gmra.mxu2 %vm118_vm1, %v4007_v35 }
0x10d7   :  { %7512 = vmatmul.msk.bf16.vlgmr.msra.gmra.mxu3 %vm118_vm1, %v4030_v36 }
0x112f   :  { %v3772_v55 = vpop.xlane.xlu0 %3771 }
0x1130   :  { %v3782_v18 = vsub.f32 %v3766_v10, %v3772_v55 }
0x1132   :  { %v3786_v16 = vmul.f32 1.442695, %v3782_v18 }
0x1134   :  { %8955 = vpow2.f32 %v3786_v16 }
0x1137   :  { %v10493_v28 = vpop.f32.mrf.mxu2 }
0x113a   :  { %v8956_v49 = vpop.eup %8955  ;;  %v10495_v25 = vpop.f32.mrf.mxu3 }
0x113b   :  { %v3903_v50 = vpack.c.bf16 %v10495_v25, %v10493_v28  ;;  %v3794_v14 = vsel %vm118_vm1, %v8956_v49, 0.0 }
0x113c   :  { %3795 = vadd.xlane.f32.xlu1 %v3794_v14 }
0x113d   :  { %v3775_v0 = vpop.xlane.xlu1 %3774 }
0x113e   :  { %v3783_v8 = vsub.f32 %v3767_v23, %v3775_v0 }
0x113f   :  { %v3879_v42 = vpop.f32.mrf.mxu2 }
0x1140   :  { %v3788_v43 = vmul.f32 1.442695, %v3783_v8 }
0x1142   :  { %8957 = vpow2.f32 %v3788_v43  ;;  %v3900_v53 = vpop.f32.mrf.mxu3 }
0x1147   :  { %v3979_v22 = vpop.f32.mrf.mxu2 }
0x1148   :  { %v10500_v1 = vpop.eup %8957  ;;  %v4052_v44 = vmul.f32 0.35355338, %v3979_v22 }
0x1149   :  { %v3797_v30 = vsel %vm118_vm1, %v10500_v1, 0.0 }
0x114a   :  { %3798 = vadd.xlane.f32.xlu0 %v3797_v30  ;;  %v4002_v26 = vpop.f32.mrf.mxu3  ;;  %v10531_v54 = vadd.f32 %v10384_v45, %v4052_v44 }
0x114b   :  { %v4053_v19 = vmul.f32 0.35355338, %v4002_v26 }
0x114c   :  { %v4060_v56 = vsel %vm118_vm1, %v10531_v54, -inf }
0x114d   :  { %v4057_v58 = vadd.f32 %v10384_v45, %v4053_v19 }
0x114f   :  { %v3981_v37 = vpop.f32.mrf.mxu2  ;;  %v4063_v29 = vsel %vm118_vm1, %v4057_v58, -inf }
0x1152   :  { %4064 = vmax.xlane.f32.xlu0 %v4063_v29  ;;  %v4004_v38 = vpop.f32.mrf.mxu3 }
0x1155   :  { %3818 = vrot.lane.b32.xlu1 %v10357_v6, %s11552_s20 }
0x1157   :  { %v4025_v39 = vpop.f32.mrf.mxu2 }
0x1158   :  { %v4054_v35 = vmul.f32 0.35355338, %v4025_v39 }
0x115a   :  { %v4048_v59 = vpop.f32.mrf.mxu3  ;;  %v4058_v27 = vadd.f32 %v10384_v45, %v4054_v35 }
0x115b   :  { %v4055_v12 = vmul.f32 0.35355338, %v4048_v59 }
0x115c   :  { %v4066_v15 = vsel %vm118_vm1, %v4058_v27, -inf }
0x115d   :  { %4129 = vrot.lane.b32.xlu1 %v10361_v33, %s11553_s21  ;;  %4067 = vmax.xlane.f32.xlu2 %v4066_v15  ;;  %v4059_v47 = vadd.f32 %v10384_v45, %v4055_v12  ;;  %v3668_v15 = vpack.c.bf16 %v10477_v11, %v10463_v60 }
0x115f   :  { %v4027_v46 = vpop.f32.mrf.mxu2  ;;  %v4069_v2 = vsel %vm118_vm1, %v4059_v47, -inf }
0x1162   :  { %v4050_v32 = vpop.f32.mrf.mxu3 }
0x1165   :  { %4228 = vrot.lane.b32.xlu1 %v10357_v6, %s11554_s22  ;;  %4070 = vmax.xlane.f32.xlu2 %v4069_v2 }
0x1166   :  { %3839 = vrot.lane.b32.xlu0 %v10361_v33, %s11552_s20 }
0x116d   :  { %4249 = vrot.lane.b32.xlu1 %v10361_v33, %s11555_s24 }
0x116e   :  { %4150 = vrot.lane.b32.xlu0 %v10365_v40, %s11553_s21 }
0x1175   :  { %4171 = vrot.lane.b32.xlu1 %v10369_v21, %s11553_s21 }
0x117d   :  { %4274 = vrot.lane.b32.xlu1 %v10365_v40, %s11554_s22  ;;  %4251 = vrot.lane.b32.xlu2 %v10361_v33, %s11554_s22 }
0x1185   :  { %4272 = vrot.lane.b32.xlu1 %v10365_v40, %s11555_s24 }
0x11af   :  { %4061 = vmax.xlane.f32.xlu1 %v4060_v56  ;;  %v3796_v41 = vpop.xlane.xlu1 %3795 }
0x11b0   :  { %8959 = vrcp.f32 %v3796_v41 }
0x11b6   :  { %v8960_v3 = vpop.eup %8959 }
0x11b7   :  { %v3810_v20 = vmul.f32 %v8960_v3, %v8956_v49  ;;  %v7485_v49 = vld [vmem:[%s11527_s4 + $0x10] sm:$0xf] }
0x11b9   :  { %v3814_v4 = vpack.c.bf16 %v3810_v20, %v3810_v20 }
0x11bd   :  { %v3799_v10 = vpop.xlane.xlu0 %3798 }
0x11c5   :  { %v4065_v34 = vpop.xlane.xlu0 %4064 }
0x11c6   :  { %v4073_v48 = vsub.f32 %v4057_v58, %v4065_v34 }
0x11c7   :  { %v3819_v9 = vpop.permute.xlu1 %3818 }
0x11c8   :  { %v4078_v31 = vmul.f32 1.442695, %v4073_v48  ;;  %v3824_v5 = vsel %vm271_vm2, %v3819_v9, 0  ;;  %4374 = vrot.lane.b32.xlu1 %v10357_v6, %s11556_s26 }
0x11c9   :  { %3833 = vmatpush.bf16.msra.mxu0 %v3824_v5 }
0x11ca   :  { %8961 = vpow2.f32 %v4078_v31 }
0x11cb   :  { %8963 = vrcp.f32 %v3799_v10 }
0x11cc   :  { %7501 = vmatmul.msk.bf16.vlgmr.msra.gmra.mxu0 %vm118_vm1, %v3814_v4 }
0x11cf   :  { %v4130_v23 = vpop.permute.xlu1 %4129 }
0x11d0   :  { %v10539_v13 = vpop.eup %8961  ;;  %4416 = vrot.lane.b32.xlu1 %v10365_v40, %s11556_s26  ;;  %v4068_v62 = vpop.xlane.xlu2 %4067  ;;  %v3939_v40 = vsel %vm271_vm2, %v7485_v49, 0  ;;  %v4135_v58 = vsel %vm271_vm2, %v4130_v23, 0 }
0x11d1   :  { %v4074_v36 = vsub.f32 %v4058_v27, %v4068_v62  ;;  %v4087_v55 = vsel %vm118_vm1, %v10539_v13, 0.0  ;;  %v8964_v16 = vpop.eup %8963 }
0x11d2   :  { %4088 = vadd.xlane.f32.xlu2 %v4087_v55  ;;  %v3811_v14 = vmul.f32 %v8964_v16, %v10500_v1 }
0x11d3   :  { %v4080_v18 = vmul.f32 1.442695, %v4074_v36 }
0x11d4   :  { %v3815_v30 = vpack.c.bf16 %v3811_v14, %v3811_v14 }
0x11d5   :  { %8965 = vpow2.f32 %v4080_v18 }
0x11d7   :  { %v4229_v0 = vpop.permute.xlu1 %4228 }
0x11d8   :  { %v3840_v8 = vpop.permute.xlu0 %3839  ;;  %v4071_v42 = vpop.xlane.xlu2 %4070  ;;  %v4234_v46 = vsel %vm118_vm1, %v4229_v0, 0 }
0x11d9   :  { %v3845_v43 = vsel %vm271_vm2, %v3840_v8, 0  ;;  %v4075_v53 = vsub.f32 %v4059_v47, %v4071_v42 }
0x11da   :  { %3854 = vmatpush.bf16.msrb.mxu1 %v3845_v43  ;;  %v7487_v43 = vld [vmem:[%s11527_s4 + $0x18] sm:$0xf] }
0x11db   :  { %v8966_v22 = vpop.eup %8965  ;;  %v4082_v26 = vmul.f32 1.442695, %v4075_v53  ;;  %v4201_v53 = vsel %vm271_vm2, %v7487_v43, 0 }
0x11dc   :  { %v4090_v19 = vsel %vm118_vm1, %v8966_v22, 0.0 }
0x11dd   :  { %8967 = vpow2.f32 %v4082_v26  ;;  %7502 = vmatmul.msk.bf16.vlgmr.msrb.gmra.mxu1 %vm118_vm1, %v3815_v30  ;;  %4091 = vadd.xlane.f32.xlu2 %v4090_v19 }
0x11de   :  { %3948 = vmatpush.bf16.msra.mxu1 %v3939_v40 }
0x11df   :  { %v10554_v1 = vpop.permute.xlu1 %4249 }
0x11e0   :  { %v4151_v37 = vpop.permute.xlu0 %4150  ;;  %v4252_v29 = vpop.permute.xlu2 %4251 }
0x11e1   :  { %v4156_v38 = vsel %vm271_vm2, %v4151_v37, 0  ;;  %v4257_v39 = vsel %vm118_vm1, %v4252_v29, 0 }
0x11e2   :  { %4144 = vmatpush.bf16.msrb.mxu1 %v4135_v58  ;;  %4165 = vmatpush.bf16.msra.mxu2 %v4156_v38 }
0x11e3   :  { %v8968_v35 = vpop.eup %8967 }
0x11e4   :  { %v4093_v59 = vsel %vm118_vm1, %v8968_v35, 0.0 }
0x11e5   :  { %4094 = vadd.xlane.f32.xlu0 %v4093_v59 }
0x11e6   :  { %4266 = vmatpush.bf16.xpose.msrb.mxu2 %v4257_v39 }
0x11e7   :  { %v4172_v27 = vpop.permute.xlu1 %4171 }
0x11e8   :  { %v4177_v12 = vsel %vm271_vm2, %v4172_v27, 0 }
0x11e9   :  { %4186 = vmatpush.bf16.msrb.mxu3 %v4177_v12 }
0x11ed   :  { %7507 = vmatmul.msk.bf16.vlgmr.msra.gmra.mxu1 %vm118_vm1, %v3668_v15 }
0x11ee   :  { %4243 = vmatpush.bf16.xpose.msra.mxu1 %v4234_v46 }
0x11ef   :  { %v4275_v47 = vpop.permute.xlu1 %4274 }
0x11f0   :  { %v4280_v32 = vsel %vm118_vm1, %v4275_v47, 0 }
0x11f1   :  { %4289 = vmatpush.bf16.xpose.msra.mxu3 %v4280_v32 }
0x11f5   :  { %4226 = vrot.lane.b32.xlu2 %v10357_v6, %s11555_s24 }
0x11f7   :  { %v4273_v60 = vpop.permute.xlu1 %4272 }
0x11fd   :  { %7508 = vmatmul.msk.bf16.gmra.mxu1 %vm118_vm1, %v3669_v17  ;;  %4297 = vrot.lane.b32.xlu2 %v10369_v21, %s11554_s22  ;;  %v3911_v17 = vsel %vm271_vm2, %v7486_v63, 0 }
0x11fe   :  { %3920 = vmatpush.bf16.msrb.mxu0 %v3911_v17 }
0x1205   :  { %4295 = vrot.lane.b32.xlu2 %v10369_v21, %s11555_s24 }
0x120d   :  { %4108 = vrot.lane.b32.xlu2 %v10357_v6, %s11553_s21 }
0x1222   :  { %v4062_v11 = vpop.xlane.xlu1 %4061 }
0x1223   :  { %v4072_v2 = vsub.f32 %v10531_v54, %v4062_v11 }
0x1225   :  { %v4076_v44 = vmul.f32 1.442695, %v4072_v2 }
0x1227   :  { %8969 = vpow2.f32 %v4076_v44 }
0x122d   :  { %v8970_v56 = vpop.eup %8969 }
0x122e   :  { %v4084_v57 = vsel %vm118_vm1, %v8970_v56, 0.0 }
0x122f   :  { %4085 = vadd.xlane.f32.xlu0 %v4084_v57 }
0x123a   :  { %v4375_v4 = vpop.permute.xlu1 %4374 }
0x123b   :  { %v4380_v55 = vsel %vm271_vm2, %v4375_v4, 0 }
0x1242   :  { %v4417_v30 = vpop.permute.xlu1 %4416 }
0x1243   :  { %v4422_v19 = vsel %vm271_vm2, %v4417_v30, 0 }
0x1245   :  { %v4089_v41 = vpop.xlane.xlu2 %4088 }
0x1246   :  { %8971 = vrcp.f32 %v4089_v41 }
0x1249   :  { %v3835_v6 = vpop.f32.mrf.mxu0 }
0x124c   :  { %v8972_v10 = vpop.eup %8971 }
0x124d   :  { %v4101_v3 = vmul.f32 %v8972_v10, %v10539_v13 }
0x124f   :  { %v4105_v54 = vpack.c.bf16 %v4101_v3, %v4101_v3 }
0x1250   :  { %v4092_v34 = vpop.xlane.xlu2 %4091 }
0x1251   :  { %8973 = vrcp.f32 %v4092_v34  ;;  %v3837_v20 = vpop.f32.mrf.mxu0  ;;  %7514 = vmatmul.msk.bf16.vlgmr.msrb.gmra.mxu1 %vm118_vm1, %v4105_v54 }
0x1257   :  { %v8974_v48 = vpop.eup %8973 }
0x1258   :  { %v4102_v9 = vmul.f32 %v8974_v48, %v8966_v22  ;;  %v4095_v31 = vpop.xlane.xlu0 %4094  ;;  %v4227_v5 = vpop.permute.xlu2 %4226 }
0x1259   :  { %8975 = vrcp.f32 %v4095_v31 }
0x125a   :  { %v4106_v23 = vpack.c.bf16 %v4102_v9, %v4102_v9  ;;  %v3856_v62 = vpop.f32.mrf.mxu1 }
0x125b   :  { %v3902_v36 = vpack.c.bf16 %v3856_v62, %v3835_v6 }
0x125c   :  { %7515 = vmatmul.msk.bf16.vlgmr.msra.gmra.mxu2 %vm118_vm1, %v4106_v23 }
0x125d   :  { %4389 = vmatpush.bf16.msra.mxu2 %v4380_v55  ;;  %7505 = vmatmul.msk.bf16.vlgmr.msrb.gmra.mxu0 %vm118_vm1, %v3902_v36 }
0x125f   :  { %v8976_v13 = vpop.eup %8975 }
0x1260   :  { %v4103_v18 = vmul.f32 %v8976_v13, %v8968_v35  ;;  %v4298_v16 = vpop.permute.xlu2 %4297 }
0x1261   :  { %v4303_v49 = vsel %vm118_vm1, %v4298_v16, 0  ;;  %7519 = vmatmul.msk.bf16.vlgmr.msra.gmra.mxu1 %vm118_vm1, %v4227_v5 }
0x1262   :  { %v4107_v14 = vpack.c.bf16 %v4103_v18, %v4103_v18  ;;  %v3858_v0 = vpop.f32.mrf.mxu1  ;;  %4312 = vmatpush.bf16.xpose.msrb.mxu1 %v4303_v49 }
0x1264   :  { %7516 = vmatmul.msk.bf16.vlgmr.msrb.gmra.mxu3 %vm118_vm1, %v4107_v14 }
0x1268   :  { %v4296_v8 = vpop.permute.xlu2 %4295 }
0x126a   :  { %v10604_v28 = vpop.f32.mrf.mxu1 }
0x126c   :  { %7520 = vmatmul.msk.bf16.vlgmr.msrb.gmra.mxu2 %vm118_vm1, %v10554_v1 }
0x126d   :  { %7506 = vmatmul.msk.bf16.gmra.mxu0 %vm118_vm1, %v3903_v50 }
0x1270   :  { %v4109_v42 = vpop.permute.xlu2 %4108 }
0x1271   :  { %v4114_v40 = vsel %vm271_vm2, %v4109_v42, 0  ;;  %7522 = vmatmul.msk.bf16.vlgmr.msrb.gmra.mxu1 %vm118_vm1, %v4296_v8 }
0x1272   :  { %4123 = vmatpush.bf16.msra.mxu0 %v4114_v40  ;;  %v10608_v58 = vpop.f32.mrf.mxu1 }
0x1274   :  { %7521 = vmatmul.msk.bf16.vlgmr.msra.gmra.mxu3 %vm118_vm1, %v4273_v60 }
0x1276   :  { %4210 = vmatpush.bf16.msrb.mxu0 %v4201_v53 }
0x127a   :  { %v10610_v1 = vpop.f32.mrf.mxu1 }
0x1282   :  { %v10612_v37 = vpop.f32.mrf.mxu1 }
0x12a2   :  { %v4086_v22 = vpop.xlane.xlu0 %4085 }
0x12a3   :  { %8977 = vrcp.f32 %v4086_v22 }
0x12a9   :  { %v8978_v25 = vpop.eup %8977 }
0x12aa   :  { %v4100_v50 = vmul.f32 %v8978_v25, %v8970_v56 }
0x12ac   :  { %v4104_v26 = vpack.c.bf16 %v4100_v50, %v4100_v50 }
0x12ae   :  { %7513 = vmatmul.msk.bf16.vlgmr.msra.gmra.mxu0 %vm118_vm1, %v4104_v26 }
0x12af   :  { %4431 = vmatpush.bf16.msra.mxu0 %v4422_v19 }
0x12ce   :  { %v4146_v29 = vpop.f32.mrf.mxu1 }
0x12d6   :  { %v4148_v38 = vpop.f32.mrf.mxu1 }
0x12da   :  { %v3922_v9 = vpop.f32.mrf.mxu0 }
0x12de   :  { %v4245_v39 = vpop.f32.mrf.mxu1 }
0x12df   :  { %v4318_v35 = vmul.f32 0.35355338, %v4245_v39  ;;  %v4167_v59 = vpop.f32.mrf.mxu2  ;;  %v3951_v39 = vadd.f32 %v10604_v28, %v3922_v9 }
0x12e1   :  { %v4322_v27 = vadd.f32 %v10384_v45, %v4318_v35 }
0x12e2   :  { %v10622_v31 = vpop.f32.mrf.mxu0 }
0x12e3   :  { %v4326_v12 = vsel %vm118_vm1, %v4322_v27, -inf }
0x12e4   :  { %4327 = vmax.xlane.f32.xlu0 %v4326_v12 }
0x12e6   :  { %v4247_v15 = vpop.f32.mrf.mxu1 }
0x12e7   :  { %v4169_v46 = vpop.f32.mrf.mxu2  ;;  %v4188_v47 = vpop.f32.mrf.mxu3 }
0x12e8   :  { %v4193_v32 = vpack.c.bf16 %v4188_v47, %v4167_v59 }
0x12ea   :  { %v3927_v5 = vpop.f32.mrf.mxu0 }
0x12eb   :  { %v3956_v12 = vadd.f32 %v10610_v1, %v3927_v5 }
0x12ee   :  { %v4314_v60 = vpop.f32.mrf.mxu1 }
0x12ef   :  { %v4321_v11 = vmul.f32 0.35355338, %v4314_v60  ;;  %v4190_v2 = vpop.f32.mrf.mxu3  ;;  %v4268_v44 = vpop.f32.mrf.mxu2 }
0x12f0   :  { %v4319_v56 = vmul.f32 0.35355338, %v4268_v44 }
0x12f1   :  { %v4325_v57 = vadd.f32 %v10384_v45, %v4321_v11 }
0x12f2   :  { %v4323_v63 = vadd.f32 %v10384_v45, %v4319_v56  ;;  %v10626_v4 = vpop.f32.mrf.mxu0 }
0x12f3   :  { %v4335_v17 = vsel %vm118_vm1, %v4325_v57, -inf }
0x12f4   :  { %4336 = vmax.xlane.f32.xlu0 %v4335_v17  ;;  %v4329_v41 = vsel %vm118_vm1, %v4323_v63, -inf }
0x12f5   :  { %4330 = vmax.xlane.f32.xlu2 %v4329_v41 }
0x12f6   :  { %v4316_v6 = vpop.f32.mrf.mxu1 }
0x12f7   :  { %v4270_v10 = vpop.f32.mrf.mxu2  ;;  %v4291_v3 = vpop.f32.mrf.mxu3 }
0x12f8   :  { %v4320_v54 = vmul.f32 0.35355338, %v4291_v3 }
0x12fa   :  { %v4324_v34 = vadd.f32 %v10384_v45, %v4320_v54 }
0x12fc   :  { %v4332_v20 = vsel %vm118_vm1, %v4324_v34, -inf }
0x12fd   :  { %4333 = vmax.xlane.f32.xlu0 %v4332_v20 }
0x12ff   :  { %v4293_v48 = vpop.f32.mrf.mxu3 }
0x1311   :  { %4395 = vrot.lane.b32.xlu0 %v10361_v33, %s11556_s26 }
0x132b   :  { %v4125_v23 = vpop.f32.mrf.mxu0 }
0x132c   :  { %v4192_v62 = vpack.c.bf16 %v4146_v29, %v4125_v23 }
0x132e   :  { %7517 = vmatmul.msk.bf16.vlgmr.msrb.gmra.mxu0 %vm118_vm1, %v4192_v62 }
0x1333   :  { %v4127_v36 = vpop.f32.mrf.mxu0 }
0x133e   :  { %7518 = vmatmul.msk.bf16.gmra.mxu0 %vm118_vm1, %v4193_v32 }
0x1357   :  { %v4328_v45 = vpop.xlane.xlu0 %4327 }
0x1358   :  { %v4338_v55 = vsub.f32 %v4322_v27, %v4328_v45 }
0x135a   :  { %v4342_v13 = vmul.f32 1.442695, %v4338_v55 }
0x135c   :  { %8979 = vpow2.f32 %v4342_v13 }
0x1362   :  { %v8980_v18 = vpop.eup %8979 }
0x1363   :  { %v4350_v16 = vsel %vm118_vm1, %v8980_v18, 0.0 }
0x1364   :  { %4351 = vadd.xlane.f32.xlu0 %v4350_v16 }
0x1367   :  { %v4337_v49 = vpop.xlane.xlu0 %4336 }
0x1368   :  { %v4331_v33 = vpop.xlane.xlu2 %4330  ;;  %v4341_v43 = vsub.f32 %v4325_v57, %v4337_v49  ;;  %v8842_v49 = vld [vmem:[%s11528_s5 + $0x1] ss:$0 sm:$0xff]  ;;  %s6739_s5 = sshll.u32 %s11538_s15, 4  ;;  %s6740_s5 = int_to_ptr.hbm [resolvable:$true] %s6739_s5 }
0x1369   :  { %v4339_v14 = vsub.f32 %v4323_v63, %v4331_v33 }
0x136a   :  { %v4348_v25 = vmul.f32 1.442695, %v4341_v43 }
0x136b   :  { %v4344_v0 = vmul.f32 1.442695, %v4339_v14 }
0x136d   :  { %8981 = vpow2.f32 %v4344_v0 }
0x1370   :  { %v4334_v8 = vpop.xlane.xlu0 %4333 }
0x1371   :  { %v4340_v42 = vsub.f32 %v4324_v34, %v4334_v8  ;;  %v7488_v34 = vld [vmem:[%s11527_s4 + $0x1c] sm:$0xf]  ;;  %v3953_v8 = vadd.f32 %v10608_v58, %v10622_v31  ;;  %v3958_v58 = vadd.f32 %v10612_v37, %v10626_v4 }
0x1372   :  { %v4467_v20 = vsel %vm271_vm2, %v7488_v34, 0  ;;  %v7640_v34 = vld [vmem:[%s11531_s8 + $0x188] sm:$0xf] }
0x1373   :  { %v8982_v40 = vpop.eup %8981  ;;  %v4346_v53 = vmul.f32 1.442695, %v4340_v42  ;;  %4476 = vmatpush.bf16.msrb.mxu2 %v4467_v20  ;;  %v8686_v20 = vld [vmem:[%s11531_s8 + $0x1c4] sm:$0xf0] }
0x1374   :  { %v4353_v22 = vsel %vm118_vm1, %v8982_v40, 0.0 }
0x1375   :  { %8983 = vpow2.f32 %v4346_v53  ;;  %4354 = vadd.xlane.f32.xlu0 %v4353_v22 }
0x1376   :  { %8985 = vpow2.f32 %v4348_v25 }
0x137b   :  { %v8984_v50 = vpop.eup %8983 }
0x137c   :  { %v4356_v30 = vsel %vm118_vm1, %v8984_v50, 0.0  ;;  %v8986_v26 = vpop.eup %8985 }
0x137d   :  { %4357 = vadd.xlane.f32.xlu2 %v4356_v30  ;;  %v4359_v38 = vsel %vm118_vm1, %v8986_v26, 0.0 }
0x1383   :  { %v4396_v19 = vpop.permute.xlu0 %4395 }
0x1384   :  { %v4401_v29 = vsel %vm271_vm2, %v4396_v19, 0 }
0x1385   :  { %4410 = vmatpush.bf16.msrb.mxu3 %v4401_v29  ;;  %4360 = vadd.xlane.f32.xlu2 %v4359_v38 }
0x1389   :  { %4437 = vrot.lane.b32.xlu0 %v10369_v21, %s11556_s26 }
0x13ab   :  { %v4212_v35 = vpop.f32.mrf.mxu0 }
0x13ac   :  { %v4222_v59 = vadd.f32 %v4212_v35, %v3951_v39 }
0x13b3   :  { %v4214_v27 = vpop.f32.mrf.mxu0 }
0x13bb   :  { %v4217_v15 = vpop.f32.mrf.mxu0 }
0x13bc   :  { %v4224_v46 = vadd.f32 %v4217_v15, %v3956_v12 }
0x13c3   :  { %v4219_v5 = vpop.f32.mrf.mxu0 }
0x13c4   :  { %v4225_v31 = vadd.f32 %v4219_v5, %v3958_v58  ;;  %v7641_v5 = vor.u32 %v8686_v20, %v7640_v34 }
0x13d7   :  { %v4352_v47 = vpop.xlane.xlu0 %4351 }
0x13d8   :  { %8987 = vrcp.f32 %v4352_v47 }
0x13de   :  { %v8988_v32 = vpop.eup %8987 }
0x13df   :  { %v4366_v60 = vmul.f32 %v8988_v32, %v8980_v18 }
0x13e1   :  { %v4370_v11 = vpack.c.bf16 %v4366_v60, %v4366_v60 }
0x13e3   :  { %7523 = vmatmul.msk.bf16.vlgmr.msra.gmra.mxu2 %vm118_vm1, %v4370_v11 }
0x13e8   :  { %v4355_v2 = vpop.xlane.xlu0 %4354 }
0x13e9   :  { %8989 = vrcp.f32 %v4355_v2 }
0x13ef   :  { %v8990_v44 = vpop.eup %8989 }
0x13f0   :  { %v4367_v21 = vmul.f32 %v8990_v44, %v8982_v40  ;;  %v4358_v56 = vpop.xlane.xlu2 %4357  ;;  %v4223_v40 = vadd.f32 %v4214_v27, %v3953_v8  ;;  %v8670_v8 = vld [vmem:[%s11531_s8 + $0x144] sm:$0xf0] }
0x13f1   :  { %8991 = vrcp.f32 %v4358_v56 }
0x13f2   :  { %v4371_v28 = vpack.c.bf16 %v4367_v21, %v4367_v21 }
0x13f4   :  { %7524 = vmatmul.msk.bf16.vlgmr.msrb.gmra.mxu3 %vm118_vm1, %v4371_v28 }
0x13f7   :  { %v8992_v57 = vpop.eup %8991 }
0x13f8   :  { %v4368_v1 = vmul.f32 %v8992_v57, %v8984_v50  ;;  %v4361_v63 = vpop.xlane.xlu2 %4360 }
0x13f9   :  { %8993 = vrcp.f32 %v4361_v63 }
0x13fa   :  { %v4372_v17 = vpack.c.bf16 %v4368_v1, %v4368_v1 }
0x13fb   :  { %v4438_v41 = vpop.permute.xlu0 %4437 }
0x13fc   :  { %v4443_v6 = vsel %vm271_vm2, %v4438_v41, 0  ;;  %7525 = vmatmul.msk.bf16.vlgmr.msra.gmra.mxu0 %vm118_vm1, %v4372_v17  ;;  %v7632_v41 = vld [vmem:[%s11531_s8 + $0x180] sm:$0xf] }
0x13fd   :  { %4452 = vmatpush.bf16.msra.mxu1 %v4443_v6  ;;  %v8685_v6 = vld [vmem:[%s11531_s8 + $0x1bc] sm:$0xf0] }
0x13ff   :  { %v8994_v10 = vpop.eup %8993 }
0x1400   :  { %v4369_v3 = vmul.f32 %v8994_v10, %v8986_v26  ;;  %v8677_v10 = vld [vmem:[%s11531_s8 + $0x184] sm:$0xf] }
0x1401   :  { %4893 = vmatpush.bf16.msrb.mxu1 %v7641_v5  ;;  %v7586_v5 = vld [vmem:[%s11531_s8 + $0x150] sm:$0xf0] }
0x1402   :  { %v4373_v54 = vpack.c.bf16 %v4369_v3, %v4369_v3  ;;  %v7633_v3 = vor.u32 %v8685_v6, %v7632_v41 }
0x1404   :  { %7526 = vmatmul.msk.bf16.vlgmr.msra.gmra.mxu1 %vm118_vm1, %v4373_v54  ;;  %v7634_v54 = vld [vmem:[%s11531_s8 + $0x1c0] sm:$0xf0]  ;;  %4855 = vmatpush.bf16.msra.mxu3 %v7633_v3  ;;  %v7658_v3 = vld [vmem:[%s11531_s8 + $0x1d8] sm:$0xf0] }
0x1466   :  { %v4391_v48 = vpop.f32.mrf.mxu2 }
0x146e   :  { %v4393_v9 = vpop.f32.mrf.mxu2 }
0x146f   :  { %v7637_v9 = vor.u32 %v8677_v10, %v7634_v54  ;;  %v7584_v54 = vld [vmem:[%s11531_s8 + $0x110] sm:$0xf] }
0x1471   :  { %4874 = vmatpush.bf16.msrb.mxu0 %v7637_v9  ;;  %v8663_v9 = vld [vmem:[%s11531_s8 + $0x114] sm:$0xf] }
0x1477   :  { %v4412_v23 = vpop.f32.mrf.mxu3 }
0x1478   :  { %v4458_v62 = vpack.c.bf16 %v4412_v23, %v4391_v48  ;;  %v8678_v23 = vld [vmem:[%s11531_s8 + $0x18c] sm:$0xf] }
0x1479   :  { %v4433_v36 = vpop.f32.mrf.mxu0 }
0x147a   :  { %7527 = vmatmul.msk.bf16.vlgmr.msrb.gmra.mxu2 %vm118_vm1, %v4458_v62  ;;  %v7642_v62 = vld [vmem:[%s11531_s8 + $0x1c8] sm:$0xf0] }
0x147f   :  { %v4414_v45 = vpop.f32.mrf.mxu3 }
0x1480   :  { %v7645_v45 = vor.u32 %v8678_v23, %v7642_v62  ;;  %v7589_v62 = vor.u32 %v8663_v9, %v7586_v5  ;;  %v8683_v9 = vld [vmem:[%s11531_s8 + $0x1b4] sm:$0xf] }
0x1481   :  { %v4435_v55 = vpop.f32.mrf.mxu0  ;;  %v4454_v13 = vpop.f32.mrf.mxu1 }
0x1482   :  { %v4459_v18 = vpack.c.bf16 %v4454_v13, %v4433_v36  ;;  %v7568_v55 = vld [vmem:[%s11531_s8 + $0x100] sm:$0xf]  ;;  %4912 = vmatpush.bf16.msra.mxu2 %v7645_v45  ;;  %v8672_v45 = vld [vmem:[%s11531_s8 + $0x154] sm:$0xf0] }
0x1483   :  { %v8669_v13 = vld [vmem:[%s11531_s8 + $0x13c] sm:$0xf0] }
0x1489   :  { %v4456_v16 = vpop.f32.mrf.mxu1 }
0x148a   :  { %7528 = vmatmul.msk.bf16.gmra.mxu2 %vm118_vm1, %v4459_v18  ;;  %v8661_v18 = vld [vmem:[%s11531_s8 + $0x104] sm:$0xf] }
0x14fd   :  { %v4478_v33 = vpop.f32.mrf.mxu2 }
0x14fe   :  { %v4488_v14 = vadd.f32 %v4478_v33, %v4222_v59  ;;  %v7570_v33 = vld [vmem:[%s11531_s8 + $0x140] sm:$0xf0] }
0x1500   :  { %v4497_v0 = vadd.f32 %v8842_v49, %v4488_v14  ;;  %v7576_v14 = vld [vmem:[%s11531_s8 + $0x108] sm:$0xf] }
0x1502   :  { %v4501_v42 = vadd.f32 %v4497_v0, %v10338_v51  ;;  %v7573_v0 = vor.u32 %v8661_v18, %v7570_v33  ;;  %v8844_v33 = vld [vmem:[%s11530_s7 + $0x1] ss:$0 sm:$0xff] }
0x1504   :  { %v4509_v43 = vsel %vm79_vm0, %v4501_v42, 0.0  ;;  %4875 = vmatpush.bf16.msrb.mxu0 %v7573_v0 }
0x1505   :  { %4510 = vadd.xlane.f32.xlu2 %v4509_v43  ;;  %v4480_v53 = vpop.f32.mrf.mxu2  ;;  %v7577_v43 = vor.u32 %v8670_v8, %v7576_v14 }
0x1506   :  { %v4489_v22 = vadd.f32 %v4480_v53, %v4223_v40  ;;  %v7578_v40 = vld [vmem:[%s11531_s8 + $0x148] sm:$0xf0] }
0x1507   :  { %4894 = vmatpush.bf16.msrb.mxu1 %v7577_v43 }
0x1508   :  { %v4498_v25 = vadd.f32 %v8842_v49, %v4489_v22 }
0x150a   :  { %v4502_v50 = vadd.f32 %v4498_v25, %v10340_v52 }
0x150c   :  { %v4512_v30 = vsel %vm79_vm0, %v4502_v50, 0.0 }
0x150d   :  { %4513 = vadd.xlane.f32.xlu1 %v4512_v30  ;;  %v4483_v26 = vpop.f32.mrf.mxu2 }
0x150e   :  { %v4490_v19 = vadd.f32 %v4483_v26, %v4224_v46 }
0x1510   :  { %v4499_v29 = vadd.f32 %v8842_v49, %v4490_v19 }
0x1512   :  { %v4503_v51 = vadd.f32 %v4499_v29, %v10347_v61 }
0x1514   :  { %v4515_v38 = vsel %vm79_vm0, %v4503_v51, 0.0 }
0x1515   :  { %4516 = vadd.xlane.f32.xlu0 %v4515_v38  ;;  %v4485_v39 = vpop.f32.mrf.mxu2 }
0x1516   :  { %v4491_v35 = vadd.f32 %v4485_v39, %v4225_v31 }
0x1518   :  { %v4500_v59 = vadd.f32 %v8842_v49, %v4491_v35  ;;  %v7569_v49 = vor.u32 %v8669_v13, %v7568_v55 }
0x151a   :  { %v4504_v52 = vadd.f32 %v4500_v59, %v10349_v7  ;;  %4856 = vmatpush.bf16.msra.mxu3 %v7569_v49  ;;  %v7594_v49 = vld [vmem:[%s11531_s8 + $0x158] sm:$0xf0] }
0x151c   :  { %v4518_v27 = vsel %vm79_vm0, %v4504_v52, 0.0 }
0x151d   :  { %4519 = vadd.xlane.f32.xlu2 %v4518_v27 }
0x1578   :  { %v4511_v12 = vpop.xlane.xlu2 %4510 }
0x1579   :  { %v4521_v15 = vmul.f32 %v4511_v12, %v9478_v24 }
0x157b   :  { %v10666_v46 = vsub.f32 %v4501_v42, %v4521_v15  ;;  %v8662_v42 = vld [vmem:[%s11531_s8 + $0x10c] sm:$0xf] }
0x157c   :  { %v7581_v53 = vor.u32 %v8662_v42, %v7578_v40 }
0x157d   :  { %v4529_v61 = vmul.f32 %v10666_v46, %v10666_v46 }
0x157e   :  { %4913 = vmatpush.bf16.msra.mxu2 %v7581_v53 }
0x157f   :  { %v4533_v37 = vsel %vm79_vm0, %v4529_v61, 0.0 }
0x1580   :  { %v4514_v4 = vpop.xlane.xlu1 %4513  ;;  %4534 = vadd.xlane.f32.xlu2 %v4533_v37  ;;  %v7648_v37 = vld [vmem:[%s11531_s8 + $0x190] sm:$0xf] }
0x1581   :  { %v4522_v47 = vmul.f32 %v4514_v4, %v9478_v24  ;;  %v8687_v4 = vld [vmem:[%s11531_s8 + $0x1cc] sm:$0xf0] }
0x1583   :  { %v10672_v32 = vsub.f32 %v4502_v50, %v4522_v47  ;;  %v10758_v47 = vld [vmem:[%s11529_s6 + $0x1] ss:$0 sm:$0xff] }
0x1585   :  { %v4530_v7 = vmul.f32 %v10672_v32, %v10672_v32 }
0x1587   :  { %v4536_v60 = vsel %vm79_vm0, %v4530_v7, 0.0 }
0x1588   :  { %v4517_v11 = vpop.xlane.xlu0 %4516  ;;  %4537 = vadd.xlane.f32.xlu2 %v4536_v60  ;;  %v7649_v60 = vor.u32 %v8687_v4, %v7648_v37  ;;  %v7666_v37 = vld [vmem:[%s11531_s8 + $0x1e0] sm:$0xf0]  ;;  %v7672_v4 = vld [vmem:[%s11531_s8 + $0x1a8] sm:$0xf] }
0x1589   :  { %v4523_v2 = vmul.f32 %v4517_v11, %v9478_v24  ;;  %v8679_v11 = vld [vmem:[%s11531_s8 + $0x194] sm:$0xf] }
0x158a   :  { %4931 = vmatpush.bf16.msrb.mxu3 %v7649_v60 }
0x158b   :  { %v10678_v44 = vsub.f32 %v4503_v51, %v4523_v2  ;;  %v7650_v2 = vld [vmem:[%s11531_s8 + $0x1d0] sm:$0xf0] }
0x158d   :  { %v4531_v21 = vmul.f32 %v10678_v44, %v10678_v44 }
0x158f   :  { %v4539_v56 = vsel %vm79_vm0, %v4531_v21, 0.0  ;;  %v7656_v21 = vld [vmem:[%s11531_s8 + $0x198] sm:$0xf] }
0x1590   :  { %4540 = vadd.xlane.f32.xlu2 %v4539_v56  ;;  %v4520_v28 = vpop.xlane.xlu2 %4519 }
0x1591   :  { %v4524_v57 = vmul.f32 %v4520_v28, %v9478_v24  ;;  %v7653_v28 = vor.u32 %v8679_v11, %v7650_v2  ;;  %v8682_v11 = vld [vmem:[%s11531_s8 + $0x1ac] sm:$0xf] }
0x1592   :  { %v7674_v2 = vld [vmem:[%s11531_s8 + $0x1e8] sm:$0xf0] }
0x1593   :  { %v10684_v1 = vsub.f32 %v4504_v52, %v4524_v57  ;;  %v8688_v57 = vld [vmem:[%s11531_s8 + $0x1d4] sm:$0xf0]  ;;  %4950 = vmatpush.bf16.msra.mxu0 %v7653_v28  ;;  %v8673_v28 = vld [vmem:[%s11531_s8 + $0x15c] sm:$0xf0] }
0x1594   :  { %v7657_v10 = vor.u32 %v8688_v57, %v7656_v21  ;;  %v7600_v21 = vld [vmem:[%s11531_s8 + $0x120] sm:$0xf]  ;;  %v8665_v57 = vld [vmem:[%s11531_s8 + $0x124] sm:$0xf] }
0x1595   :  { %v4532_v63 = vmul.f32 %v10684_v1, %v10684_v1 }
0x1596   :  { %4969 = vmatpush.bf16.msra.mxu1 %v7657_v10  ;;  %v8674_v10 = vld [vmem:[%s11531_s8 + $0x164] sm:$0xf0] }
0x1597   :  { %v4542_v17 = vsel %vm79_vm0, %v4532_v63, 0.0  ;;  %v8680_v63 = vld [vmem:[%s11531_s8 + $0x19c] sm:$0xf]  ;;  %4951 = vmatpush.bf16.msra.mxu0 %v7589_v62  ;;  %v7688_v62 = vld [vmem:[%s11531_s8 + $0x1b8] sm:$0xf] }
0x1598   :  { %4543 = vadd.xlane.f32.xlu2 %v4542_v17 }
0x15f3   :  { %v4535_v48 = vpop.xlane.xlu2 %4534 }
0x15f4   :  { %v4545_v36 = vmul.f32 %v4535_v48, %v9478_v24  ;;  %v7661_v48 = vor.u32 %v8680_v63, %v7658_v3  ;;  %v7602_v63 = vld [vmem:[%s11531_s8 + $0x160] sm:$0xf0]  ;;  %v8666_v3 = vld [vmem:[%s11531_s8 + $0x12c] sm:$0xf] }
0x15f6   :  { %v4549_v16 = vadd.f32 1e-05, %v4545_v36  ;;  %v7592_v36 = vld [vmem:[%s11531_s8 + $0x118] sm:$0xf]  ;;  %4988 = vmatpush.bf16.msrb.mxu2 %v7661_v48  ;;  %v7680_v48 = vld [vmem:[%s11531_s8 + $0x1b0] sm:$0xf] }
0x15f7   :  { %v7593_v18 = vor.u32 %v8672_v45, %v7592_v36  ;;  %v8692_v36 = vld [vmem:[%s11531_s8 + $0x1f4] sm:$0xf0] }
0x15f8   :  { %8995 = vrsqrt.f32 %v4549_v16  ;;  %vm4559_vm2 = vweird.f32 %v4549_v16 }
0x15f9   :  { %4970 = vmatpush.bf16.msra.mxu1 %v7593_v18  ;;  %v7690_v18 = vld [vmem:[%s11531_s8 + $0x1f8] sm:$0xf0] }
0x15fb   :  { %v4538_v22 = vpop.xlane.xlu2 %4537 }
0x15fc   :  { %v4546_v25 = vmul.f32 %v4538_v22, %v9478_v24 }
0x15fe   :  { %v8996_v50 = vpop.eup %8995  ;;  %v4550_v30 = vadd.f32 1e-05, %v4546_v25 }
0x15ff   :  { %v4554_v26 = vmul.f32 %v8996_v50, %v4549_v16  ;;  %vm4560_vm1 = vweird.f32 %v8996_v50  ;;  %v8664_v16 = vld [vmem:[%s11531_s8 + $0x11c] sm:$0xf] }
0x1600   :  { %8997 = vrsqrt.f32 %v4550_v30  ;;  %vm10743_vm15 = vmor %vm4559_vm2, %vm4560_vm1  ;;  %vm4569_vm4 = vweird.f32 %v4550_v30  ;;  %v7597_v8 = vor.u32 %v8664_v16, %v7594_v49  ;;  %v7616_v16 = vld [vmem:[%s11531_s8 + $0x130] sm:$0xf] }
0x1601   :  { %v4555_v19 = vmul.f32 %v8996_v50, %v4554_v26 }
0x1602   :  { %4989 = vmatpush.bf16.msrb.mxu2 %v7597_v8 }
0x1603   :  { %v4556_v29 = vmul.f32 0.5, %v4555_v19  ;;  %v4541_v58 = vpop.xlane.xlu2 %4540 }
0x1604   :  { %v4547_v51 = vmul.f32 %v4541_v58, %v9478_v24 }
0x1605   :  { %v4557_v31 = vsub.f32 1.5, %v4556_v29 }
0x1606   :  { %v8998_v38 = vpop.eup %8997  ;;  %v10740_v39 = vadd.f32 1e-05, %v4547_v51 }
0x1607   :  { %v4558_v35 = vmul.f32 %v8996_v50, %v4557_v31  ;;  %v4564_v59 = vmul.f32 %v8998_v38, %v4550_v30  ;;  %vm4570_vm3 = vweird.f32 %v8998_v38 }
0x1608   :  { %8999 = vrsqrt.f32 %v10740_v39  ;;  %vm4571_vm5 = vmor %vm4569_vm4, %vm4570_vm3  ;;  %vm4579_vm7 = vweird.f32 %v10740_v39 }
0x1609   :  { %v4565_v52 = vmul.f32 %v8998_v38, %v4564_v59  ;;  %v4562_v12 = vsel %vm10743_vm15, %v8996_v50, %v4558_v35 }
0x160a   :  { %v4593_v41 = vmul.f32 %v4562_v12, %v10666_v46  ;;  %v8671_v46 = vld [vmem:[%s11531_s8 + $0x14c] sm:$0xf0] }
0x160b   :  { %v4566_v15 = vmul.f32 0.5, %v4565_v52  ;;  %v4544_v61 = vpop.xlane.xlu2 %4543  ;;  %v7585_v23 = vor.u32 %v8671_v46, %v7584_v54  ;;  %v8691_v46 = vld [vmem:[%s11531_s8 + $0x1ec] sm:$0xf0] }
0x160c   :  { %v4548_v7 = vmul.f32 %v4544_v61, %v9478_v24  ;;  %v4600_v14 = vmul.f32 %v10758_v47, %v4593_v41  ;;  %v7605_v41 = vor.u32 %v8665_v57, %v7602_v63  ;;  %v7681_v5 = vor.u32 %v8691_v46, %v7680_v48  ;;  %v8695_v57 = vld [vmem:[%s11533_s10 + $0x410] sm:$0xff] }
0x160d   :  { %v4567_v56 = vsub.f32 1.5, %v4566_v15  ;;  %4932 = vmatpush.bf16.msrb.mxu3 %v7585_v23  ;;  %v8681_v15 = vld [vmem:[%s11531_s8 + $0x1a4] sm:$0xf]  ;;  %v7682_v23 = vld [vmem:[%s11531_s8 + $0x1f0] sm:$0xf0] }
0x160e   :  { %v9000_v17 = vpop.eup %8999  ;;  %v4552_v6 = vadd.f32 1e-05, %v4548_v7  ;;  %v10812_v22 = vadd.f32 %v8844_v33, %v4600_v14  ;;  %v7669_v7 = vor.u32 %v8681_v15, %v7666_v37  ;;  %v7685_v45 = vor.u32 %v8683_v9, %v7682_v23  ;;  %v8667_v14 = vld [vmem:[%s11531_s8 + $0x134] sm:$0xf]  ;;  %v8713_v15 = vld [vmem:[%s11533_s10 + $0x4a0] sm:$0xff]  ;;  %v8722_v37 = vld [vmem:[%s11533_s10 + $0x4e8] sm:$0xff] }
0x160f   :  { %v4568_v34 = vmul.f32 %v8998_v38, %v4567_v56  ;;  %v4574_v20 = vmul.f32 %v9000_v17, %v10740_v39  ;;  %vm4580_vm6 = vweird.f32 %v9000_v17  ;;  %v7677_v56 = vor.u32 %v8682_v11, %v7674_v2  ;;  %v8703_v11 = vld [vmem:[%s11533_s10 + $0x450] sm:$0xff]  ;;  %v8732_v9 = vld [vmem:[%s11533_s10 + $0x538] sm:$0xff]  ;;  %v8738_v23 = vld [vmem:[%s11533_s10 + $0x568] sm:$0xff] }
0x1610   :  { %9001 = vrsqrt.f32 %v4552_v6  ;;  %vm4581_vm8 = vmor %vm4579_vm7, %vm4580_vm6  ;;  %vm4589_vm10 = vweird.f32 %v4552_v6  ;;  %v8711_v2 = vld [vmem:[%s11533_s10 + $0x490] sm:$0xff] }
0x1611   :  { %v4572_v55 = vsel %vm4571_vm5, %v8998_v38, %v4568_v34  ;;  %v4575_v13 = vmul.f32 %v9000_v17, %v4574_v20  ;;  %v7610_v34 = vld [vmem:[%s11531_s8 + $0x168] sm:$0xf0]  ;;  %v8719_v63 = vld [vmem:[%s11533_s10 + $0x4d0] sm:$0xff] }
0x1612   :  { %v4594_v0 = vmul.f32 %v4572_v55, %v10672_v32  ;;  %v7613_v20 = vor.u32 %v8666_v3, %v7610_v34  ;;  %v7689_v55 = vor.u32 %v8692_v36, %v7688_v62  ;;  %v8740_v3 = vld [vmem:[%s11533_s10 + $0x578] sm:$0xff]  ;;  %v8693_v34 = vld [vmem:[%s11533_s10 + $0x400] sm:$0xff]  ;;  %v8739_v48 = vld [vmem:[%s11533_s10 + $0x570] sm:$0xff] }
0x1613   :  { %v4576_v42 = vmul.f32 0.5, %v4575_v13  ;;  %v8684_v13 = vld [vmem:[%s11531_s8 + $0x1bc] sm:$0xf]  ;;  %v8747_v46 = vld [vmem:[%s11533_s10 + $0x5b0] sm:$0xff] }
0x1614   :  { %v4601_v40 = vmul.f32 %v10758_v47, %v4594_v0  ;;  %v7693_v49 = vor.u32 %v8684_v13, %v7690_v18  ;;  %v7618_v0 = vld [vmem:[%s11531_s8 + $0x170] sm:$0xf0]  ;;  %v8730_v13 = vld [vmem:[%s11533_s10 + $0x528] sm:$0xff] }
0x1615   :  { %v4577_v43 = vsub.f32 1.5, %v4576_v42  ;;  %v7621_v42 = vor.u32 %v8667_v14, %v7618_v0  ;;  %v8731_v62 = vld [vmem:[%s11533_s10 + $0x530] sm:$0xff]  ;;  %v8754_v18 = vld [vmem:[%s11533_s10 + $0x5e8] sm:$0xff] }
0x1616   :  { %v9002_v53 = vpop.eup %9001  ;;  %v10814_v25 = vadd.f32 %v8844_v33, %v4601_v40  ;;  %v7624_v40 = vld [vmem:[%s11531_s8 + $0x138] sm:$0xf]  ;;  %v8755_v36 = vld [vmem:[%s11533_s10 + $0x5f0] sm:$0xff] }
0x1617   :  { %v4578_v50 = vmul.f32 %v9000_v17, %v4577_v43  ;;  %v4584_v30 = vmul.f32 %v9002_v53, %v4552_v6  ;;  %vm4590_vm9 = vweird.f32 %v9002_v53  ;;  %v7608_v6 = vld [vmem:[%s11531_s8 + $0x128] sm:$0xf]  ;;  %v8676_v43 = vld [vmem:[%s11531_s8 + $0x174] sm:$0xf0] }
0x1618   :  { %v10818_v32 = vpack.c.bf16 %v10814_v25, %v10812_v22  ;;  %vm4591_vm11 = vmor %vm4589_vm10, %vm4590_vm9  ;;  %v7609_v54 = vor.u32 %v8674_v10, %v7608_v6  ;;  %v8694_v6 = vld [vmem:[%s11533_s10 + $0x408] sm:$0xff]  ;;  %vm6723_vm9 = vcmask 1041409   ;;  %vm6725_vm10 = vcmask 1042434  }
0x1619   :  { %v4585_v26 = vmul.f32 %v9002_v53, %v4584_v30  ;;  %v4582_v19 = vsel %vm4581_vm8, %v9000_v17, %v4578_v50  ;;  %v7601_v17 = vor.u32 %v8673_v28, %v7600_v21  ;;  %v7625_v50 = vor.u32 %v8676_v43, %v7624_v40  ;;  %v7626_v30 = vld [vmem:[%s11531_s8 + $0x178] sm:$0xf0]  ;;  %v8702_v28 = vld [vmem:[%s11533_s10 + $0x448] sm:$0xff]  ;;  %v8735_v43 = vld [vmem:[%s11533_s10 + $0x550] sm:$0xff] }
0x161a   :  { %7694 = vmatmul.msk.bf16.vlgmr.msra.gmra.mxu3 %vm79_vm0, %v10818_v32  ;;  %7696 = vmatmul.msk.bf16.vlgmr.msrb.gmra.mxu0 %vm79_vm0, %v10818_v32  ;;  %v4595_v51 = vmul.f32 %v4582_v19, %v10678_v44  ;;  %v7664_v44 = vld [vmem:[%s11531_s8 + $0x1a0] sm:$0xf]  ;;  %v8708_v19 = vld [vmem:[%s11533_s10 + $0x478] sm:$0xff]  ;;  %v8718_v10 = vld [vmem:[%s11533_s10 + $0x4c8] sm:$0xff] }
0x161b   :  { %v4586_v29 = vmul.f32 0.5, %v4585_v26  ;;  %7698 = vmatmul.msk.bf16.vlgmr.msrb.gmra.mxu1 %vm79_vm0, %v10818_v32  ;;  %7700 = vmatmul.msk.bf16.vlgmr.msra.gmra.mxu2 %vm79_vm0, %v10818_v32  ;;  %v8696_v21 = vld [vmem:[%s11533_s10 + $0x418] sm:$0xff] }
0x161c   :  { %v4602_v39 = vmul.f32 %v10758_v47, %v4595_v51  ;;  %5026 = vmatpush.bf16.msrb.mxu0 %v7669_v7  ;;  %5064 = vmatpush.bf16.msra.mxu2 %v7677_v56  ;;  %v8715_v51 = vld [vmem:[%s11533_s10 + $0x4b0] sm:$0xff]  ;;  %v8697_v7 = vld [vmem:[%s11533_s10 + $0x420] sm:$0xff]  ;;  %v8720_v56 = vld [vmem:[%s11533_s10 + $0x4d8] sm:$0xff] }
0x161d   :  { %v4587_v58 = vsub.f32 1.5, %v4586_v29  ;;  %v8716_v29 = vld [vmem:[%s11533_s10 + $0x4b8] sm:$0xff] }
0x161e   :  { %v10833_v52 = vadd.f32 %v8844_v33, %v4602_v39  ;;  %v8706_v39 = vld [vmem:[%s11533_s10 + $0x468] sm:$0xff] }
0x161f   :  { %v4588_v31 = vmul.f32 %v9002_v53, %v4587_v58  ;;  %v8707_v58 = vld [vmem:[%s11533_s10 + $0x470] sm:$0xff] }
0x1620   :  { %5027 = vmatpush.bf16.msrb.mxu0 %v7605_v41  ;;  %5065 = vmatpush.bf16.msra.mxu2 %v7613_v20  ;;  %v8709_v41 = vld [vmem:[%s11533_s10 + $0x480] sm:$0xff] }
0x1621   :  { %v4592_v38 = vsel %vm4591_vm11, %v9002_v53, %v4588_v31  ;;  %v8668_v53 = vld [vmem:[%s11531_s8 + $0x13c] sm:$0xf]  ;;  %v8717_v20 = vld [vmem:[%s11533_s10 + $0x4c0] sm:$0xff]  ;;  %vm6727_vm11 = vcmask 1043459  }
0x1622   :  { %v4596_v35 = vmul.f32 %v4592_v38, %v10684_v1  ;;  %v8689_v1 = vld [vmem:[%s11531_s8 + $0x1dc] sm:$0xf0]  ;;  %v7629_v26 = vor.u32 %v8668_v53, %v7626_v30  ;;  %v8700_v31 = vld [vmem:[%s11533_s10 + $0x438] sm:$0xff]  ;;  %v8743_v53 = vld [vmem:[%s11533_s10 + $0x590] sm:$0xff] }
0x1623   :  { %v7665_v61 = vor.u32 %v8689_v1, %v7664_v44  ;;  %v8724_v38 = vld [vmem:[%s11533_s10 + $0x4f8] sm:$0xff]  ;;  %v8723_v44 = vld [vmem:[%s11533_s10 + $0x4f0] sm:$0xff]  ;;  %v8705_v1 = vld [vmem:[%s11533_s10 + $0x460] sm:$0xff] }
0x1624   :  { %v4603_v59 = vmul.f32 %v10758_v47, %v4596_v35  ;;  %v8690_v47 = vld [vmem:[%s11531_s8 + $0x1e4] sm:$0xf0]  ;;  %v8728_v30 = vld [vmem:[%s11533_s10 + $0x518] sm:$0xff] }
0x1625   :  { %v7673_v60 = vor.u32 %v8690_v47, %v7672_v4  ;;  %5007 = vmatpush.bf16.msra.mxu3 %v7665_v61  ;;  %v8714_v35 = vld [vmem:[%s11533_s10 + $0x4a8] sm:$0xff]  ;;  %v8704_v4 = vld [vmem:[%s11533_s10 + $0x458] sm:$0xff] }
0x1626   :  { %v10835_v27 = vadd.f32 %v8844_v33, %v4603_v59  ;;  %v8675_v33 = vld [vmem:[%s11531_s8 + $0x16c] sm:$0xf0]  ;;  %v8698_v61 = vld [vmem:[%s11533_s10 + $0x428] sm:$0xff]  ;;  %v8712_v47 = vld [vmem:[%s11533_s10 + $0x498] sm:$0xff] }
0x1627   :  { %5045 = vmatpush.bf16.msrb.mxu1 %v7673_v60  ;;  %v7617_v8 = vor.u32 %v8675_v33, %v7616_v16  ;;  %v8699_v59 = vld [vmem:[%s11533_s10 + $0x430] sm:$0xff]  ;;  %v8721_v60 = vld [vmem:[%s11533_s10 + $0x4e0] sm:$0xff]  ;;  %v8736_v16 = vld [vmem:[%s11533_s10 + $0x558] sm:$0xff] }
0x1628   :  { %v10839_v12 = vpack.c.bf16 %v10835_v27, %v10833_v52  ;;  %v11140_v33 = vld [vmem:[%s11532_s9 + $0x10] sm:$0xff] }
0x1629   :  { %5008 = vmatpush.bf16.msra.mxu3 %v7601_v17  ;;  %v8701_v17 = vld [vmem:[%s11533_s10 + $0x440] sm:$0xff]  ;;  %v11149_v40 = vperm.slane %v11140_v33, 1 }
0x162a   :  { %7695 = vmatmul.msk.bf16.gmra.mxu3 %vm79_vm0, %v10839_v12  ;;  %7697 = vmatmul.msk.bf16.gmra.mxu0 %vm79_vm0, %v10839_v12 }
0x162b   :  { %7699 = vmatmul.msk.bf16.gmra.mxu1 %vm79_vm0, %v10839_v12  ;;  %7701 = vmatmul.msk.bf16.gmra.mxu2 %vm79_vm0, %v10839_v12 }
0x162c   :  { %5046 = vmatpush.bf16.msrb.mxu1 %v7609_v54  ;;  %v8748_v54 = vld [vmem:[%s11533_s10 + $0x5b8] sm:$0xff] }
0x163a   :  { %7702 = vmatmul.msk.bf16.vlgmr.msrb.gmra.mxu3 %vm79_vm0, %v10818_v32  ;;  %7704 = vmatmul.msk.bf16.vlgmr.msra.gmra.mxu0 %vm79_vm0, %v10818_v32 }
0x163b   :  { %7706 = vmatmul.msk.bf16.vlgmr.msra.gmra.mxu1 %vm79_vm0, %v10818_v32  ;;  %7708 = vmatmul.msk.bf16.vlgmr.msrb.gmra.mxu2 %vm79_vm0, %v10818_v32 }
0x163c   :  { %5083 = vmatpush.bf16.msrb.mxu3 %v7681_v5  ;;  %5102 = vmatpush.bf16.msra.mxu0 %v7685_v45  ;;  %v8756_v5 = vld [vmem:[%s11533_s10 + $0x5f8] sm:$0xff]  ;;  %v8737_v45 = vld [vmem:[%s11533_s10 + $0x560] sm:$0xff] }
0x163d   :  { %5121 = vmatpush.bf16.msra.mxu1 %v7689_v55  ;;  %5140 = vmatpush.bf16.msrb.mxu2 %v7693_v49  ;;  %v8745_v55 = vld [vmem:[%s11533_s10 + $0x5a0] sm:$0xff]  ;;  %v8744_v49 = vld [vmem:[%s11533_s10 + $0x598] sm:$0xff] }
0x1640   :  { %5084 = vmatpush.bf16.msrb.mxu3 %v7617_v8  ;;  %5103 = vmatpush.bf16.msra.mxu0 %v7621_v42  ;;  %v8729_v8 = vld [vmem:[%s11533_s10 + $0x520] sm:$0xff] }
0x1641   :  { %5122 = vmatpush.bf16.msra.mxu1 %v7625_v50  ;;  %5141 = vmatpush.bf16.msrb.mxu2 %v7629_v26  ;;  %v8753_v42 = vld [vmem:[%s11533_s10 + $0x5e0] sm:$0xff]  ;;  %v11158_v50 = vperm.slane %v11140_v33, 2  ;;  %v8752_v26 = vld [vmem:[%s11533_s10 + $0x5d8] sm:$0xff] }
0x164a   :  { %7703 = vmatmul.msk.bf16.gmra.mxu3 %vm79_vm0, %v10839_v12  ;;  %7705 = vmatmul.msk.bf16.gmra.mxu0 %vm79_vm0, %v10839_v12 }
0x164b   :  { %7707 = vmatmul.msk.bf16.gmra.mxu1 %vm79_vm0, %v10839_v12  ;;  %7709 = vmatmul.msk.bf16.gmra.mxu2 %vm79_vm0, %v10839_v12 }
0x165a   :  { %7710 = vmatmul.msk.bf16.vlgmr.msra.gmra.mxu3 %vm79_vm0, %v10818_v32  ;;  %7712 = vmatmul.msk.bf16.vlgmr.msrb.gmra.mxu0 %vm79_vm0, %v10818_v32 }
0x165b   :  { %7714 = vmatmul.msk.bf16.vlgmr.msrb.gmra.mxu1 %vm79_vm0, %v10818_v32  ;;  %7716 = vmatmul.msk.bf16.vlgmr.msra.gmra.mxu2 %vm79_vm0, %v10818_v32 }
0x165c   :  { %6298 = vmatpush.bf16.msrb.mxu0 %v8708_v19  ;;  %6317 = vmatpush.bf16.msrb.mxu1 %v8716_v29 }
0x165d   :  { %6279 = vmatpush.bf16.msra.mxu3 %v8700_v31  ;;  %6336 = vmatpush.bf16.msra.mxu2 %v8724_v38  ;;  %v8742_v31 = vld [vmem:[%s11533_s10 + $0x588] sm:$0xff] }
0x1660   :  { %6299 = vmatpush.bf16.msrb.mxu0 %v8707_v58  ;;  %6318 = vmatpush.bf16.msrb.mxu1 %v8715_v51  ;;  %v8734_v51 = vld [vmem:[%s11533_s10 + $0x548] sm:$0xff] }
0x1661   :  { %6280 = vmatpush.bf16.msra.mxu3 %v8699_v59  ;;  %6337 = vmatpush.bf16.msra.mxu2 %v8723_v44 }
0x1664   :  { %6300 = vmatpush.bf16.msrb.mxu0 %v8706_v39  ;;  %6319 = vmatpush.bf16.msrb.mxu1 %v8714_v35  ;;  %v11175_v35 = vperm.slane %v11140_v33, 0 }
0x1665   :  { %6281 = vmatpush.bf16.msra.mxu3 %v8698_v61  ;;  %6338 = vmatpush.bf16.msra.mxu2 %v8722_v37  ;;  %v11185_v61 = vperm.slane %v11140_v33, 3 }
0x1668   :  { %6301 = vmatpush.bf16.msrb.mxu0 %v8705_v1  ;;  %6320 = vmatpush.bf16.msrb.mxu1 %v8713_v15  ;;  %v8727_v1 = vld [vmem:[%s11533_s10 + $0x510] sm:$0xff] }
0x1669   :  { %6282 = vmatpush.bf16.msra.mxu3 %v8697_v7  ;;  %6339 = vmatpush.bf16.msra.mxu2 %v8721_v60  ;;  %v8751_v15 = vld [vmem:[%s11533_s10 + $0x5d0] sm:$0xff]  ;;  %v8733_v7 = vld [vmem:[%s11533_s10 + $0x540] sm:$0xff] }
0x166a   :  { %7711 = vmatmul.msk.bf16.gmra.mxu3 %vm79_vm0, %v10839_v12  ;;  %7713 = vmatmul.msk.bf16.gmra.mxu0 %vm79_vm0, %v10839_v12  ;;  %v8741_v60 = vld [vmem:[%s11533_s10 + $0x580] sm:$0xff] }
0x166b   :  { %7715 = vmatmul.msk.bf16.gmra.mxu1 %vm79_vm0, %v10839_v12  ;;  %7717 = vmatmul.msk.bf16.gmra.mxu2 %vm79_vm0, %v10839_v12 }
0x166c   :  { %6302 = vmatpush.bf16.msrb.mxu0 %v8704_v4  ;;  %6321 = vmatpush.bf16.msrb.mxu1 %v8712_v47 }
0x166d   :  { %6283 = vmatpush.bf16.msra.mxu3 %v8696_v21  ;;  %6340 = vmatpush.bf16.msra.mxu2 %v8720_v56 }
0x1670   :  { %6303 = vmatpush.bf16.msrb.mxu0 %v8703_v11  ;;  %6322 = vmatpush.bf16.msrb.mxu1 %v8711_v2 }
0x1671   :  { %6284 = vmatpush.bf16.msra.mxu3 %v8695_v57  ;;  %6341 = vmatpush.bf16.msra.mxu2 %v8719_v63 }
0x1674   :  { %6304 = vmatpush.bf16.msrb.mxu0 %v8702_v28  ;;  %v8726_v28 = vld [vmem:[%s11533_s10 + $0x508] sm:$0xff] }
0x1675   :  { %6285 = vmatpush.bf16.msra.mxu3 %v8694_v6  ;;  %6342 = vmatpush.bf16.msra.mxu2 %v8718_v10  ;;  %v8772_v10 = vld [vmem:[%s11533_s10 + $0x678] sm:$0xff] }
0x1678   :  { %6305 = vmatpush.bf16.msrb.mxu0 %v8701_v17 }
0x1679   :  { %6286 = vmatpush.bf16.msra.mxu3 %v8693_v34  ;;  %6343 = vmatpush.bf16.msra.mxu2 %v8717_v20 }
0x167a   :  { %7718 = vmatmul.msk.bf16.vlgmr.msrb.gmra.mxu3 %vm79_vm0, %v10818_v32  ;;  %7720 = vmatmul.msk.bf16.vlgmr.msra.gmra.mxu0 %vm79_vm0, %v10818_v32 }
0x167b   :  { %7722 = vmatmul.msk.bf16.vlgmr.msra.gmra.mxu1 %vm79_vm0, %v10818_v32  ;;  %7724 = vmatmul.msk.bf16.vlgmr.msrb.gmra.mxu2 %vm79_vm0, %v10818_v32  ;;  %v8710_v32 = vld [vmem:[%s11533_s10 + $0x488] sm:$0xff] }
0x167c   :  { %6323 = vmatpush.bf16.msrb.mxu1 %v8710_v32  ;;  %6374 = vmatpush.bf16.msra.mxu0 %v8740_v3  ;;  %v8750_v32 = vld [vmem:[%s11533_s10 + $0x5c8] sm:$0xff]  ;;  %v8780_v3 = vld [vmem:[%s11533_s10 + $0x6b8] sm:$0xff] }
0x167d   :  { %6355 = vmatpush.bf16.msrb.mxu3 %v8732_v9  ;;  %6412 = vmatpush.bf16.msrb.mxu2 %v8756_v5  ;;  %v8725_v9 = vld [vmem:[%s11533_s10 + $0x500] sm:$0xff] }
0x167e   :  { %v8749_v5 = vld [vmem:[%s11533_s10 + $0x5c0] sm:$0xff] }
0x1680   :  { %6324 = vmatpush.bf16.msrb.mxu1 %v8709_v41  ;;  %6375 = vmatpush.bf16.msra.mxu0 %v8739_v48 }
0x1681   :  { %6356 = vmatpush.bf16.msrb.mxu3 %v8731_v62  ;;  %6413 = vmatpush.bf16.msrb.mxu2 %v8755_v36  ;;  %v8771_v36 = vld [vmem:[%s11533_s10 + $0x670] sm:$0xff] }
0x1684   :  { %6393 = vmatpush.bf16.msra.mxu1 %v8748_v54  ;;  %6376 = vmatpush.bf16.msra.mxu0 %v8738_v23 }
0x1685   :  { %6357 = vmatpush.bf16.msrb.mxu3 %v8730_v13  ;;  %6414 = vmatpush.bf16.msrb.mxu2 %v8754_v18  ;;  %v8764_v13 = vld [vmem:[%s11533_s10 + $0x638] sm:$0xff] }
0x1686   :  { %v8788_v18 = vld [vmem:[%s11533_s10 + $0x6f8] sm:$0xff] }
0x1688   :  { %6394 = vmatpush.bf16.msra.mxu1 %v8747_v46  ;;  %6377 = vmatpush.bf16.msra.mxu0 %v8737_v45  ;;  %v8779_v45 = vld [vmem:[%s11533_s10 + $0x6b0] sm:$0xff] }
0x1689   :  { %6358 = vmatpush.bf16.msrb.mxu3 %v8729_v8  ;;  %6415 = vmatpush.bf16.msrb.mxu2 %v8753_v42  ;;  %v8778_v8 = vld [vmem:[%s11533_s10 + $0x6a8] sm:$0xff] }
0x168a   :  { %7719 = vmatmul.msk.bf16.gmra.mxu3 %vm79_vm0, %v10839_v12  ;;  %7721 = vmatmul.msk.bf16.gmra.mxu0 %vm79_vm0, %v10839_v12 }
0x168b   :  { %7723 = vmatmul.msk.bf16.gmra.mxu1 %vm79_vm0, %v10839_v12  ;;  %7725 = vmatmul.msk.bf16.gmra.mxu2 %vm79_vm0, %v10839_v12  ;;  %v8746_v12 = vld [vmem:[%s11533_s10 + $0x5a8] sm:$0xff] }
0x168c   :  { %6395 = vmatpush.bf16.msra.mxu1 %v8746_v12  ;;  %6378 = vmatpush.bf16.msra.mxu0 %v8736_v16 }
0x168d   :  { %6359 = vmatpush.bf16.msrb.mxu3 %v8728_v30  ;;  %6416 = vmatpush.bf16.msrb.mxu2 %v8752_v26  ;;  %v8763_v26 = vld [vmem:[%s11533_s10 + $0x630] sm:$0xff] }
0x1690   :  { %6396 = vmatpush.bf16.msra.mxu1 %v8745_v55  ;;  %6379 = vmatpush.bf16.msra.mxu0 %v8735_v43 }
0x1691   :  { %6360 = vmatpush.bf16.msrb.mxu3 %v8727_v1  ;;  %6417 = vmatpush.bf16.msrb.mxu2 %v8751_v15  ;;  %v8786_v1 = vld [vmem:[%s11533_s10 + $0x6e8] sm:$0xff] }
0x1694   :  { %6397 = vmatpush.bf16.msra.mxu1 %v8744_v49  ;;  %6380 = vmatpush.bf16.msra.mxu0 %v8734_v51 }
0x1695   :  { %6361 = vmatpush.bf16.msrb.mxu3 %v8726_v28  ;;  %6418 = vmatpush.bf16.msrb.mxu2 %v8750_v32 }
0x1697   :  { %v4877_v14 = vpop.f32.mrf.mxu0 }
0x1698   :  { %v4896_v0 = vpop.f32.mrf.mxu1  ;;  %6398 = vmatpush.bf16.msra.mxu1 %v8743_v53  ;;  %v4878_v29 = vadd.f32 %v4877_v14, %v11149_v40  ;;  %6381 = vmatpush.bf16.msra.mxu0 %v8733_v7 }
0x1699   :  { %v4897_v38 = vadd.f32 %v4896_v0, %v11158_v50  ;;  %6362 = vmatpush.bf16.msrb.mxu3 %v8725_v9  ;;  %6419 = vmatpush.bf16.msrb.mxu2 %v8749_v5  ;;  %v8770_v0 = vld [vmem:[%s11533_s10 + $0x668] sm:$0xff] }
0x169a   :  { %v5154_v4 = vmax.f32 %v4878_v29, 0.0  ;;  %v8766_v5 = vld [vmem:[%s11533_s10 + $0x648] sm:$0xff] }
0x169b   :  { %v5155_v11 = vmax.f32 %v4897_v38, 0.0 }
0x169c   :  { %6399 = vmatpush.bf16.msra.mxu1 %v8742_v31  ;;  %v8777_v31 = vld [vmem:[%s11533_s10 + $0x6a0] sm:$0xff] }
0x169d   :  { %v4858_v19 = vpop.f32.mrf.mxu3 }
0x169e   :  { %v4915_v58 = vpop.f32.mrf.mxu2  ;;  %v4859_v21 = vadd.f32 %v4858_v19, %v11175_v35  ;;  %v8787_v19 = vld [vmem:[%s11533_s10 + $0x6f0] sm:$0xff] }
0x169f   :  { %v4879_v39 = vpop.f32.mrf.mxu0  ;;  %v4916_v57 = vadd.f32 %v4915_v58, %v11185_v61 }
0x16a0   :  { %v4880_v59 = vadd.f32 %v4879_v39, %v11149_v40  ;;  %v4898_v44 = vpop.f32.mrf.mxu1  ;;  %6400 = vmatpush.bf16.msra.mxu1 %v8741_v60  ;;  %v5153_v20 = vmax.f32 %v4859_v21, 0.0  ;;  %v8768_v60 = vld [vmem:[%s11533_s10 + $0x658] sm:$0xff] }
0x16a1   :  { %v4899_v37 = vadd.f32 %v4898_v44, %v11158_v50  ;;  %v5156_v23 = vmax.f32 %v4916_v57, 0.0  ;;  %v8785_v57 = vld [vmem:[%s11533_s10 + $0x6e0] sm:$0xff] }
0x16a2   :  { %v5170_v47 = vmax.f32 %v4880_v59, 0.0 }
0x16a3   :  { %v5171_v2 = vmax.f32 %v4899_v37, 0.0 }
0x16a4   :  { %v5218_v56 = vpack.c.bf16 %v5170_v47, %v5154_v4 }
0x16a5   :  { %v5219_v63 = vpack.c.bf16 %v5171_v2, %v5155_v11  ;;  %v4860_v17 = vpop.f32.mrf.mxu3  ;;  %v8776_v11 = vld [vmem:[%s11533_s10 + $0x698] sm:$0xff] }
0x16a6   :  { %v4861_v41 = vadd.f32 %v4860_v17, %v11175_v35  ;;  %v4917_v6 = vpop.f32.mrf.mxu2  ;;  %6306 = vmatmul.bf16.vlgmr.msrb.gmra.mxu0 %v5218_v56 }
0x16a7   :  { %v4918_v54 = vadd.f32 %v4917_v6, %v11185_v61  ;;  %6325 = vmatmul.bf16.vlgmr.msrb.gmra.mxu1 %v5219_v63  ;;  %v4882_v34 = vpop.f32.mrf.mxu0  ;;  %6450 = vmatpush.bf16.msrb.mxu0 %v8772_v10  ;;  %v8767_v6 = vld [vmem:[%s11533_s10 + $0x650] sm:$0xff] }
0x16a8   :  { %v5169_v48 = vmax.f32 %v4861_v41, 0.0  ;;  %v4901_v46 = vpop.f32.mrf.mxu1  ;;  %6469 = vmatpush.bf16.msrb.mxu1 %v8780_v3  ;;  %v4883_v49 = vadd.f32 %v4882_v34, %v11149_v40  ;;  %v8775_v10 = vld [vmem:[%s11533_s10 + $0x690] sm:$0xff]  ;;  %v11282_v3 = vperm.slane %v11140_v33, 6  ;;  %v8760_v34 = vld [vmem:[%s11533_s10 + $0x618] sm:$0xff] }
0x16a9   :  { %v5172_v12 = vmax.f32 %v4918_v54, 0.0  ;;  %v4902_v42 = vadd.f32 %v4901_v46, %v11158_v50 }
0x16aa   :  { %v5217_v62 = vpack.c.bf16 %v5169_v48, %v5153_v20  ;;  %v5186_v58 = vmax.f32 %v4883_v49, 0.0  ;;  %v8784_v20 = vld [vmem:[%s11533_s10 + $0x6d8] sm:$0xff] }
0x16ab   :  { %v5220_v55 = vpack.c.bf16 %v5172_v12, %v5156_v23  ;;  %6451 = vmatpush.bf16.msrb.mxu0 %v8771_v36  ;;  %v5187_v38 = vmax.f32 %v4902_v42, 0.0  ;;  %v8774_v23 = vld [vmem:[%s11533_s10 + $0x688] sm:$0xff]  ;;  %v11299_v36 = vperm.slane %v11140_v33, 4  ;;  %v8773_v42 = vld [vmem:[%s11533_s10 + $0x680] sm:$0xff] }
0x16ac   :  { %6287 = vmatmul.bf16.vlgmr.msra.gmra.mxu3 %v5217_v62  ;;  %6470 = vmatpush.bf16.msrb.mxu1 %v8779_v45 }
0x16ad   :  { %6344 = vmatmul.bf16.vlgmr.msra.gmra.mxu2 %v5220_v55  ;;  %v4863_v16 = vpop.f32.mrf.mxu3  ;;  %6431 = vmatpush.bf16.msra.mxu3 %v8764_v13  ;;  %v8759_v13 = vld [vmem:[%s11533_s10 + $0x610] sm:$0xff] }
0x16ae   :  { %v4920_v14 = vpop.f32.mrf.mxu2  ;;  %6488 = vmatpush.bf16.msra.mxu2 %v8788_v18  ;;  %v4864_v59 = vadd.f32 %v4863_v16, %v11175_v35  ;;  %v8783_v18 = vld [vmem:[%s11533_s10 + $0x6d0] sm:$0xff]  ;;  %v11309_v16 = vperm.slane %v11140_v33, 7 }
0x16af   :  { %v4884_v43 = vpop.f32.mrf.mxu0  ;;  %6452 = vmatpush.bf16.msrb.mxu0 %v8770_v0  ;;  %v4921_v15 = vadd.f32 %v4920_v14, %v11185_v61 }
0x16b0   :  { %v4885_v53 = vadd.f32 %v4884_v43, %v11149_v40  ;;  %v4903_v30 = vpop.f32.mrf.mxu1  ;;  %6471 = vmatpush.bf16.msrb.mxu1 %v8778_v8  ;;  %v8769_v40 = vld [vmem:[%s11533_s10 + $0x660] sm:$0xff]  ;;  %v5185_v56 = vmax.f32 %v4864_v59, 0.0 }
0x16b1   :  { %v4904_v29 = vadd.f32 %v4903_v30, %v11158_v50  ;;  %6432 = vmatpush.bf16.msra.mxu3 %v8763_v26  ;;  %v8762_v50 = vld [vmem:[%s11533_s10 + $0x628] sm:$0xff]  ;;  %v5188_v63 = vmax.f32 %v4921_v15, 0.0  ;;  %v8765_v8 = vld [vmem:[%s11533_s10 + $0x640] sm:$0xff] }
0x16b2   :  { %v5202_v51 = vmax.f32 %v4885_v53, 0.0  ;;  %6489 = vmatpush.bf16.msra.mxu2 %v8787_v19  ;;  %v8758_v26 = vld [vmem:[%s11533_s10 + $0x608] sm:$0xff] }
0x16b3   :  { %v5203_v39 = vmax.f32 %v4904_v29, 0.0  ;;  %6453 = vmatpush.bf16.msrb.mxu0 %v8769_v40  ;;  %v8782_v19 = vld [vmem:[%s11533_s10 + $0x6c8] sm:$0xff] }
0x16b4   :  { %v5234_v44 = vpack.c.bf16 %v5202_v51, %v5186_v58  ;;  %6472 = vmatpush.bf16.msrb.mxu1 %v8777_v31 }
0x16b5   :  { %v4865_v37 = vpop.f32.mrf.mxu3  ;;  %v5235_v4 = vpack.c.bf16 %v5203_v39, %v5187_v38  ;;  %6433 = vmatpush.bf16.msra.mxu3 %v8762_v50  ;;  %v8804_v38 = vld [vmem:[%s11533_s10 + $0x778] sm:$0xff] }
0x16b6   :  { %v4866_v47 = vadd.f32 %v4865_v37, %v11175_v35  ;;  %v4922_v7 = vpop.f32.mrf.mxu2  ;;  %6311 = vmatmul.bf16.gmra.mxu0 %v5234_v44  ;;  %6490 = vmatpush.bf16.msra.mxu2 %v8786_v1  ;;  %v8761_v35 = vld [vmem:[%s11533_s10 + $0x620] sm:$0xff]  ;;  %v8812_v39 = vld [vmem:[%s11533_s10 + $0x7b8] sm:$0xff] }
0x16b7   :  { %v4923_v2 = vadd.f32 %v4922_v7, %v11185_v61  ;;  %6330 = vmatmul.bf16.gmra.mxu1 %v5235_v4  ;;  %v4953_v21 = vpop.f32.mrf.mxu0  ;;  %6454 = vmatpush.bf16.msrb.mxu0 %v8768_v60  ;;  %v11273_v61 = vperm.slane %v11140_v33, 5  ;;  %v8757_v37 = vld [vmem:[%s11533_s10 + $0x600] sm:$0xff] }
0x16b8   :  { %v5201_v28 = vmax.f32 %v4866_v47, 0.0  ;;  %v4972_v32 = vpop.f32.mrf.mxu1  ;;  %6473 = vmatpush.bf16.msrb.mxu1 %v8776_v11  ;;  %v8781_v4 = vld [vmem:[%s11533_s10 + $0x6c0] sm:$0xff]  ;;  %v8803_v11 = vld [vmem:[%s11533_s10 + $0x770] sm:$0xff] }
0x16b9   :  { %v5204_v17 = vmax.f32 %v4923_v2, 0.0  ;;  %6434 = vmatpush.bf16.msra.mxu3 %v8761_v35  ;;  %v4954_v46 = vadd.f32 %v4953_v21, %v11273_v61  ;;  %v4973_v12 = vadd.f32 %v4972_v32, %v11282_v3  ;;  %v8811_v2 = vld [vmem:[%s11533_s10 + $0x7b0] sm:$0xff] }
0x16ba   :  { %v5233_v41 = vpack.c.bf16 %v5201_v28, %v5185_v56  ;;  %6491 = vmatpush.bf16.msra.mxu2 %v8785_v57  ;;  %v8796_v56 = vld [vmem:[%s11533_s10 + $0x738] sm:$0xff] }
0x16bb   :  { %v5236_v54 = vpack.c.bf16 %v5204_v17, %v5188_v63  ;;  %6455 = vmatpush.bf16.msrb.mxu0 %v8767_v6  ;;  %v5158_v14 = vmax.f32 %v4954_v46, 0.0  ;;  %v5159_v43 = vmax.f32 %v4973_v12, 0.0  ;;  %v8820_v28 = vld [vmem:[%s11533_s10 + $0x7f8] sm:$0xff]  ;;  %v8802_v63 = vld [vmem:[%s11533_s10 + $0x768] sm:$0xff] }
0x16bc   :  { %6292 = vmatmul.bf16.gmra.mxu3 %v5233_v41  ;;  %6474 = vmatpush.bf16.msrb.mxu1 %v8775_v10  ;;  %v8810_v17 = vld [vmem:[%s11533_s10 + $0x7a8] sm:$0xff] }
0x16bd   :  { %6349 = vmatmul.bf16.gmra.mxu2 %v5236_v54  ;;  %v4934_v48 = vpop.f32.mrf.mxu3  ;;  %6435 = vmatpush.bf16.msra.mxu3 %v8760_v34  ;;  %v8795_v34 = vld [vmem:[%s11533_s10 + $0x730] sm:$0xff] }
0x16be   :  { %v4991_v9 = vpop.f32.mrf.mxu2  ;;  %6492 = vmatpush.bf16.msra.mxu2 %v8784_v20  ;;  %v4935_v33 = vadd.f32 %v4934_v48, %v11299_v36  ;;  %v8819_v20 = vld [vmem:[%s11533_s10 + $0x7f0] sm:$0xff] }
0x16bf   :  { %v4955_v62 = vpop.f32.mrf.mxu0  ;;  %6456 = vmatpush.bf16.msrb.mxu0 %v8766_v5  ;;  %v4992_v29 = vadd.f32 %v4991_v9, %v11309_v16  ;;  %v8809_v5 = vld [vmem:[%s11533_s10 + $0x7a0] sm:$0xff] }
0x16c0   :  { %v4956_v45 = vadd.f32 %v4955_v62, %v11273_v61  ;;  %v4974_v55 = vpop.f32.mrf.mxu1  ;;  %6475 = vmatpush.bf16.msrb.mxu1 %v8774_v23  ;;  %v5157_v50 = vmax.f32 %v4935_v33, 0.0 }
0x16c1   :  { %v4975_v49 = vadd.f32 %v4974_v55, %v11282_v3  ;;  %6436 = vmatpush.bf16.msra.mxu3 %v8759_v13  ;;  %v5160_v47 = vmax.f32 %v4992_v29, 0.0  ;;  %v8818_v55 = vld [vmem:[%s11533_s10 + $0x7e8] sm:$0xff] }
0x16c2   :  { %v5174_v0 = vmax.f32 %v4956_v45, 0.0  ;;  %6493 = vmatpush.bf16.msra.mxu2 %v8783_v18 }
0x16c3   :  { %v5175_v53 = vmax.f32 %v4975_v49, 0.0  ;;  %6457 = vmatpush.bf16.msrb.mxu0 %v8765_v8  ;;  %v8800_v8 = vld [vmem:[%s11533_s10 + $0x758] sm:$0xff] }
0x16c4   :  { %v5222_v30 = vpack.c.bf16 %v5174_v0, %v5158_v14  ;;  %6476 = vmatpush.bf16.msrb.mxu1 %v8773_v42  ;;  %v8808_v42 = vld [vmem:[%s11533_s10 + $0x798] sm:$0xff] }
0x16c5   :  { %v5223_v58 = vpack.c.bf16 %v5175_v53, %v5159_v43  ;;  %v4936_v51 = vpop.f32.mrf.mxu3  ;;  %6437 = vmatpush.bf16.msra.mxu3 %v8758_v26  ;;  %v11393_v53 = vld [vmem:[%s11532_s9 + $0x18] sm:$0xff] }
0x16c6   :  { %v4937_v40 = vadd.f32 %v4936_v51, %v11299_v36  ;;  %v4993_v31 = vpop.f32.mrf.mxu2  ;;  %6382 = vmatmul.bf16.vlgmr.msra.gmra.mxu0 %v5222_v30  ;;  %6494 = vmatpush.bf16.msra.mxu2 %v8782_v19  ;;  %v8793_v19 = vld [vmem:[%s11533_s10 + $0x720] sm:$0xff]  ;;  %v11402_v51 = vperm.slane %v11393_v53, 1 }
0x16c7   :  { %v4994_v59 = vadd.f32 %v4993_v31, %v11309_v16  ;;  %6401 = vmatmul.bf16.vlgmr.msra.gmra.mxu1 %v5223_v58  ;;  %v4958_v44 = vpop.f32.mrf.mxu0  ;;  %6526 = vmatpush.bf16.msra.mxu0 %v8804_v38  ;;  %v8799_v31 = vld [vmem:[%s11533_s10 + $0x750] sm:$0xff] }
0x16c8   :  { %v5173_v1 = vmax.f32 %v4937_v40, 0.0  ;;  %v4977_v15 = vpop.f32.mrf.mxu1  ;;  %6545 = vmatpush.bf16.msra.mxu1 %v8812_v39  ;;  %v4959_v35 = vadd.f32 %v4958_v44, %v11273_v61  ;;  %v8807_v38 = vld [vmem:[%s11533_s10 + $0x790] sm:$0xff]  ;;  %v11411_v39 = vperm.slane %v11393_v53, 2  ;;  %v8792_v44 = vld [vmem:[%s11533_s10 + $0x718] sm:$0xff] }
0x16c9   :  { %v5176_v7 = vmax.f32 %v4994_v59, 0.0  ;;  %6438 = vmatpush.bf16.msra.mxu3 %v8757_v37  ;;  %v4978_v41 = vadd.f32 %v4977_v15, %v11282_v3 }
0x16ca   :  { %v5221_v60 = vpack.c.bf16 %v5173_v1, %v5157_v50  ;;  %6495 = vmatpush.bf16.msra.mxu2 %v8781_v4  ;;  %v5190_v46 = vmax.f32 %v4959_v35, 0.0  ;;  %v8816_v50 = vld [vmem:[%s11533_s10 + $0x7d8] sm:$0xff]  ;;  %v8798_v4 = vld [vmem:[%s11533_s10 + $0x748] sm:$0xff] }
0x16cb   :  { %v5224_v21 = vpack.c.bf16 %v5176_v7, %v5160_v47  ;;  %6527 = vmatpush.bf16.msra.mxu0 %v8803_v11  ;;  %v5191_v23 = vmax.f32 %v4978_v41, 0.0  ;;  %v8806_v47 = vld [vmem:[%s11533_s10 + $0x788] sm:$0xff]  ;;  %v11428_v11 = vperm.slane %v11393_v53, 0  ;;  %v8805_v41 = vld [vmem:[%s11533_s10 + $0x780] sm:$0xff] }
0x16cc   :  { %6363 = vmatmul.bf16.vlgmr.msrb.gmra.mxu3 %v5221_v60  ;;  %6546 = vmatpush.bf16.msra.mxu1 %v8811_v2 }
0x16cd   :  { %6420 = vmatmul.bf16.vlgmr.msrb.gmra.mxu2 %v5224_v21  ;;  %v4939_v32 = vpop.f32.mrf.mxu3  ;;  %6507 = vmatpush.bf16.msrb.mxu3 %v8796_v56  ;;  %v8791_v56 = vld [vmem:[%s11533_s10 + $0x710] sm:$0xff] }
0x16ce   :  { %v4996_v57 = vpop.f32.mrf.mxu2  ;;  %6564 = vmatpush.bf16.msrb.mxu2 %v8820_v28  ;;  %v4940_v62 = vadd.f32 %v4939_v32, %v11299_v36  ;;  %v8815_v28 = vld [vmem:[%s11533_s10 + $0x7d0] sm:$0xff]  ;;  %v4662_v32 = vperm.slane %v11393_v53, 3 }
0x16cf   :  { %v4960_v6 = vpop.f32.mrf.mxu0  ;;  %6528 = vmatpush.bf16.msra.mxu0 %v8802_v63  ;;  %v4997_v13 = vadd.f32 %v4996_v57, %v11309_v16 }
0x16d0   :  { %v4961_v10 = vadd.f32 %v4960_v6, %v11273_v61  ;;  %v4979_v54 = vpop.f32.mrf.mxu1  ;;  %6547 = vmatpush.bf16.msra.mxu1 %v8810_v17  ;;  %v8801_v61 = vld [vmem:[%s11533_s10 + $0x760] sm:$0xff]  ;;  %v5189_v33 = vmax.f32 %v4940_v62, 0.0 }
0x16d1   :  { %v4980_v48 = vadd.f32 %v4979_v54, %v11282_v3  ;;  %6508 = vmatpush.bf16.msrb.mxu3 %v8795_v34  ;;  %v8794_v3 = vld [vmem:[%s11533_s10 + $0x728] sm:$0xff]  ;;  %v5192_v29 = vmax.f32 %v4997_v13, 0.0  ;;  %v8797_v17 = vld [vmem:[%s11533_s10 + $0x740] sm:$0xff] }
0x16d2   :  { %v5206_v9 = vmax.f32 %v4961_v10, 0.0  ;;  %6565 = vmatpush.bf16.msrb.mxu2 %v8819_v20  ;;  %v8790_v20 = vld [vmem:[%s11533_s10 + $0x708] sm:$0xff]  ;;  %v8789_v13 = vld [vmem:[%s11533_s10 + $0x700] sm:$0xff] }
0x16d3   :  { %v5207_v12 = vmax.f32 %v4980_v48, 0.0  ;;  %6529 = vmatpush.bf16.msra.mxu0 %v8801_v61  ;;  %v8814_v48 = vld [vmem:[%s11533_s10 + $0x7c8] sm:$0xff] }
0x16d4   :  { %v5238_v45 = vpack.c.bf16 %v5206_v9, %v5190_v46  ;;  %6548 = vmatpush.bf16.msra.mxu1 %v8809_v5 }
0x16d5   :  { %v4941_v18 = vpop.f32.mrf.mxu3  ;;  %v5239_v49 = vpack.c.bf16 %v5207_v12, %v5191_v23  ;;  %6509 = vmatpush.bf16.msrb.mxu3 %v8794_v3 }
0x16d6   :  { %v4942_v14 = vadd.f32 %v4941_v18, %v11299_v36  ;;  %v4998_v0 = vpop.f32.mrf.mxu2  ;;  %6387 = vmatmul.bf16.gmra.mxu0 %v5238_v45  ;;  %6566 = vmatpush.bf16.msrb.mxu2 %v8818_v55  ;;  %v8813_v18 = vld [vmem:[%s11533_s10 + $0x7c0] sm:$0xff] }
0x16d7   :  { %v4999_v43 = vadd.f32 %v4998_v0, %v11309_v16  ;;  %6406 = vmatmul.bf16.gmra.mxu1 %v5239_v49  ;;  %v5029_v36 = vpop.f32.mrf.mxu0  ;;  %6530 = vmatpush.bf16.msra.mxu0 %v8800_v8  ;;  %v8817_v16 = vld [vmem:[%s11533_s10 + $0x7e0] sm:$0xff] }
0x16d8   :  { %v5205_v30 = vmax.f32 %v4942_v14, 0.0  ;;  %v5048_v26 = vpop.f32.mrf.mxu1  ;;  %6549 = vmatpush.bf16.msra.mxu1 %v8808_v42  ;;  %v5030_v15 = vadd.f32 %v5029_v36, %v11402_v51 }
0x16d9   :  { %v5208_v58 = vmax.f32 %v4999_v43, 0.0  ;;  %6510 = vmatpush.bf16.msrb.mxu3 %v8793_v19  ;;  %v5049_v7 = vadd.f32 %v5048_v26, %v11411_v39 }
0x16da   :  { %v5237_v40 = vpack.c.bf16 %v5205_v30, %v5189_v33  ;;  %6567 = vmatpush.bf16.msrb.mxu2 %v8817_v16  ;;  %v5162_v57 = vmax.f32 %v5030_v15, 0.0 }
0x16db   :  { %v5240_v59 = vpack.c.bf16 %v5208_v58, %v5192_v29  ;;  %6531 = vmatpush.bf16.msra.mxu0 %v8799_v31  ;;  %v5163_v6 = vmax.f32 %v5049_v7, 0.0 }
0x16dc   :  { %6368 = vmatmul.bf16.gmra.mxu3 %v5237_v40  ;;  %6550 = vmatpush.bf16.msra.mxu1 %v8807_v38 }
0x16dd   :  { %6425 = vmatmul.bf16.gmra.mxu2 %v5240_v59  ;;  %v5010_v1 = vpop.f32.mrf.mxu3  ;;  %6511 = vmatpush.bf16.msrb.mxu3 %v8792_v44 }
0x16de   :  { %v5067_v37 = vpop.f32.mrf.mxu2  ;;  %6568 = vmatpush.bf16.msrb.mxu2 %v8816_v50  ;;  %v5011_v54 = vadd.f32 %v5010_v1, %v11428_v11 }
0x16df   :  { %v5031_v60 = vpop.f32.mrf.mxu0  ;;  %6532 = vmatpush.bf16.msra.mxu0 %v8798_v4  ;;  %v5068_v46 = vadd.f32 %v5067_v37, %v4662_v32 }
0x16e0   :  { %v5032_v2 = vadd.f32 %v5031_v60, %v11402_v51  ;;  %v5050_v21 = vpop.f32.mrf.mxu1  ;;  %6551 = vmatpush.bf16.msra.mxu1 %v8806_v47  ;;  %v5161_v45 = vmax.f32 %v5011_v54, 0.0  ;;  %v4666_v54 = vperm.slane %v11393_v53, 7 }
0x16e1   :  { %v5051_v35 = vadd.f32 %v5050_v21, %v11411_v39  ;;  %6512 = vmatpush.bf16.msrb.mxu3 %v8791_v56  ;;  %v5164_v49 = vmax.f32 %v5068_v46, 0.0  ;;  %v4664_v56 = vperm.slane %v11393_v53, 5 }
0x16e2   :  { %v5178_v63 = vmax.f32 %v5032_v2, 0.0  ;;  %6569 = vmatpush.bf16.msrb.mxu2 %v8815_v28 }
0x16e3   :  { %v5179_v10 = vmax.f32 %v5051_v35, 0.0  ;;  %6533 = vmatpush.bf16.msra.mxu0 %v8797_v17  ;;  %v4665_v35 = vperm.slane %v11393_v53, 6 }
0x16e4   :  { %v5226_v34 = vpack.c.bf16 %v5178_v63, %v5162_v57  ;;  %6552 = vmatpush.bf16.msra.mxu1 %v8805_v41  ;;  %v4663_v41 = vperm.slane %v11393_v53, 4 }
0x16e5   :  { %v5227_v9 = vpack.c.bf16 %v5179_v10, %v5163_v6  ;;  %v5012_v61 = vpop.f32.mrf.mxu3  ;;  %6513 = vmatpush.bf16.msrb.mxu3 %v8790_v20 }
0x16e6   :  { %v5013_v5 = vadd.f32 %v5012_v61, %v11428_v11  ;;  %v5069_v23 = vpop.f32.mrf.mxu2  ;;  %6458 = vmatmul.bf16.vlgmr.msrb.gmra.mxu0 %v5226_v34  ;;  %6570 = vmatpush.bf16.msrb.mxu2 %v8814_v48 }
0x16e7   :  { %v5070_v12 = vadd.f32 %v5069_v23, %v4662_v32  ;;  %6477 = vmatmul.bf16.vlgmr.msrb.gmra.mxu1 %v5227_v9  ;;  %v5034_v62 = vpop.f32.mrf.mxu0 }
0x16e8   :  { %v5177_v3 = vmax.f32 %v5013_v5, 0.0  ;;  %v5053_v55 = vpop.f32.mrf.mxu1  ;;  %v5035_v43 = vadd.f32 %v5034_v62, %v11402_v51 }
0x16e9   :  { %v5180_v14 = vmax.f32 %v5070_v12, 0.0  ;;  %6514 = vmatpush.bf16.msrb.mxu3 %v8789_v13  ;;  %v5054_v33 = vadd.f32 %v5053_v55, %v11411_v39 }
0x16ea   :  { %v5225_v0 = vpack.c.bf16 %v5177_v3, %v5161_v45  ;;  %6571 = vmatpush.bf16.msrb.mxu2 %v8813_v18  ;;  %v5194_v29 = vmax.f32 %v5035_v43, 0.0 }
0x16eb   :  { %v5228_v8 = vpack.c.bf16 %v5180_v14, %v5164_v49  ;;  %v5195_v40 = vmax.f32 %v5054_v33, 0.0 }
0x16ec   :  { %6439 = vmatmul.bf16.vlgmr.msra.gmra.mxu3 %v5225_v0 }
0x16ed   :  { %6496 = vmatmul.bf16.vlgmr.msra.gmra.mxu2 %v5228_v8  ;;  %v5015_v42 = vpop.f32.mrf.mxu3 }
0x16ee   :  { %v5072_v36 = vpop.f32.mrf.mxu2  ;;  %v5016_v38 = vadd.f32 %v5015_v42, %v11428_v11 }
0x16ef   :  { %v5036_v30 = vpop.f32.mrf.mxu0  ;;  %v5073_v44 = vadd.f32 %v5072_v36, %v4662_v32 }
0x16f0   :  { %v5037_v26 = vadd.f32 %v5036_v30, %v11402_v51  ;;  %v5055_v19 = vpop.f32.mrf.mxu1  ;;  %v5193_v47 = vmax.f32 %v5016_v38, 0.0 }
0x16f1   :  { %v5056_v16 = vadd.f32 %v5055_v19, %v11411_v39  ;;  %v5196_v60 = vmax.f32 %v5073_v44, 0.0 }
0x16f2   :  { %v5210_v58 = vmax.f32 %v5037_v26, 0.0 }
0x16f3   :  { %v5211_v31 = vmax.f32 %v5056_v16, 0.0 }
0x16f4   :  { %v5242_v59 = vpack.c.bf16 %v5210_v58, %v5194_v29 }
0x16f5   :  { %v5243_v50 = vpack.c.bf16 %v5211_v31, %v5195_v40  ;;  %v5017_v1 = vpop.f32.mrf.mxu3 }
0x16f6   :  { %v5018_v15 = vadd.f32 %v5017_v1, %v11428_v11  ;;  %v5074_v37 = vpop.f32.mrf.mxu2  ;;  %6463 = vmatmul.bf16.gmra.mxu0 %v5242_v59 }
0x16f7   :  { %v5075_v4 = vadd.f32 %v5074_v37, %v4662_v32  ;;  %6482 = vmatmul.bf16.gmra.mxu1 %v5243_v50  ;;  %v5105_v51 = vpop.f32.mrf.mxu0 }
0x16f8   :  { %v5209_v7 = vmax.f32 %v5018_v15, 0.0  ;;  %v5124_v39 = vpop.f32.mrf.mxu1  ;;  %v5106_v11 = vadd.f32 %v5105_v51, %v4664_v56 }
0x16f9   :  { %v5212_v2 = vmax.f32 %v5075_v4, 0.0  ;;  %v5125_v17 = vadd.f32 %v5124_v39, %v4665_v35 }
0x16fa   :  { %v5241_v21 = vpack.c.bf16 %v5209_v7, %v5193_v47  ;;  %v5166_v20 = vmax.f32 %v5106_v11, 0.0  ;;  %v8845_v11 = vld [vmem:[%s11534_s11 + $0x1] ss:$0 sm:$0xff] }
0x16fb   :  { %v5244_v28 = vpack.c.bf16 %v5212_v2, %v5196_v60  ;;  %v5167_v46 = vmax.f32 %v5125_v17, 0.0 }
0x16fc   :  { %6444 = vmatmul.bf16.gmra.mxu3 %v5241_v21 }
0x16fd   :  { %6501 = vmatmul.bf16.gmra.mxu2 %v5244_v28  ;;  %v5086_v57 = vpop.f32.mrf.mxu3 }
0x16fe   :  { %v5143_v63 = vpop.f32.mrf.mxu2  ;;  %v5087_v61 = vadd.f32 %v5086_v57, %v4663_v41 }
0x16ff   :  { %v5107_v32 = vpop.f32.mrf.mxu0  ;;  %v5144_v23 = vadd.f32 %v5143_v63, %v4666_v54 }
0x1700   :  { %v5108_v6 = vadd.f32 %v5107_v32, %v4664_v56  ;;  %v5126_v10 = vpop.f32.mrf.mxu1  ;;  %v5165_v18 = vmax.f32 %v5087_v61, 0.0 }
0x1701   :  { %v5127_v34 = vadd.f32 %v5126_v10, %v4665_v35  ;;  %v5168_v53 = vmax.f32 %v5144_v23, 0.0 }
0x1702   :  { %v5182_v48 = vmax.f32 %v5108_v6, 0.0 }
0x1703   :  { %v5183_v9 = vmax.f32 %v5127_v34, 0.0 }
0x1704   :  { %v5230_v5 = vpack.c.bf16 %v5182_v48, %v5166_v20 }
0x1705   :  { %v5231_v12 = vpack.c.bf16 %v5183_v9, %v5167_v46  ;;  %v5088_v62 = vpop.f32.mrf.mxu3 }
0x1706   :  { %v5089_v45 = vadd.f32 %v5088_v62, %v4663_v41  ;;  %v5145_v3 = vpop.f32.mrf.mxu2  ;;  %6534 = vmatmul.bf16.vlgmr.msra.gmra.mxu0 %v5230_v5 }
0x1707   :  { %v5146_v55 = vadd.f32 %v5145_v3, %v4666_v54  ;;  %6553 = vmatmul.bf16.vlgmr.msra.gmra.mxu1 %v5231_v12  ;;  %v5110_v13 = vpop.f32.mrf.mxu0 }
0x1708   :  { %v5181_v49 = vmax.f32 %v5089_v45, 0.0  ;;  %v5129_v14 = vpop.f32.mrf.mxu1  ;;  %v5111_v36 = vadd.f32 %v5110_v13, %v4664_v56 }
0x1709   :  { %v5184_v0 = vmax.f32 %v5146_v55, 0.0  ;;  %v5130_v30 = vadd.f32 %v5129_v14, %v4665_v35 }
0x170a   :  { %v5229_v8 = vpack.c.bf16 %v5181_v49, %v5165_v18  ;;  %v5198_v58 = vmax.f32 %v5111_v36, 0.0 }
0x170b   :  { %v5232_v42 = vpack.c.bf16 %v5184_v0, %v5168_v53  ;;  %v5199_v31 = vmax.f32 %v5130_v30, 0.0 }
0x170c   :  { %6515 = vmatmul.bf16.vlgmr.msrb.gmra.mxu3 %v5229_v8 }
0x170d   :  { %6572 = vmatmul.bf16.vlgmr.msrb.gmra.mxu2 %v5232_v42  ;;  %v5091_v43 = vpop.f32.mrf.mxu3 }
0x170e   :  { %v5148_v33 = vpop.f32.mrf.mxu2  ;;  %v5092_v59 = vadd.f32 %v5091_v43, %v4663_v41 }
0x170f   :  { %v5112_v26 = vpop.f32.mrf.mxu0  ;;  %v5149_v50 = vadd.f32 %v5148_v33, %v4666_v54 }
0x1710   :  { %v5113_v19 = vadd.f32 %v5112_v26, %v4664_v56  ;;  %v5131_v16 = vpop.f32.mrf.mxu1  ;;  %v5197_v47 = vmax.f32 %v5092_v59, 0.0 }
0x1711   :  { %v5132_v29 = vadd.f32 %v5131_v16, %v4665_v35  ;;  %v5200_v39 = vmax.f32 %v5149_v50, 0.0 }
0x1712   :  { %v5214_v40 = vmax.f32 %v5113_v19, 0.0 }
0x1713   :  { %v5215_v38 = vmax.f32 %v5132_v29, 0.0 }
0x1714   :  { %v5246_v44 = vpack.c.bf16 %v5214_v40, %v5198_v58 }
0x1715   :  { %v5247_v1 = vpack.c.bf16 %v5215_v38, %v5199_v31  ;;  %v5093_v15 = vpop.f32.mrf.mxu3 }
0x1716   :  { %v5094_v37 = vadd.f32 %v5093_v15, %v4663_v41  ;;  %v5150_v4 = vpop.f32.mrf.mxu2  ;;  %6539 = vmatmul.bf16.gmra.mxu0 %v5246_v44 }
0x1717   :  { %v5151_v51 = vadd.f32 %v5150_v4, %v4666_v54  ;;  %6558 = vmatmul.bf16.gmra.mxu1 %v5247_v1 }
0x1718   :  { %v5213_v7 = vmax.f32 %v5094_v37, 0.0 }
0x1719   :  { %v5216_v60 = vmax.f32 %v5151_v51, 0.0 }
0x171a   :  { %v5245_v2 = vpack.c.bf16 %v5213_v7, %v5197_v47 }
0x171b   :  { %v5248_v21 = vpack.c.bf16 %v5216_v60, %v5200_v39 }
0x171c   :  { %6520 = vmatmul.bf16.gmra.mxu3 %v5245_v2 }
0x171d   :  { %6577 = vmatmul.bf16.gmra.mxu2 %v5248_v21 }
0x1723   :  { %v6307_v56 = vpop.f32.mrf.mxu0 }
0x1724   :  { %v6326_v28 = vpop.f32.mrf.mxu1 }
0x172b   :  { %v6309_v35 = vpop.f32.mrf.mxu0 }
0x172c   :  { %v6328_v57 = vpop.f32.mrf.mxu1 }
0x172f   :  { %v6288_v63 = vpop.f32.mrf.mxu3 }
0x1730   :  { %v6289_v17 = vadd.f32 %v8845_v11, %v6288_v63  ;;  %v6345_v32 = vpop.f32.mrf.mxu2 }
0x1732   :  { %v6308_v41 = vadd.f32 %v6307_v56, %v6289_v17 }
0x1733   :  { %v6312_v6 = vpop.f32.mrf.mxu0 }
0x1734   :  { %v6327_v10 = vadd.f32 %v6326_v28, %v6308_v41  ;;  %v6331_v54 = vpop.f32.mrf.mxu1 }
0x1736   :  { %v6346_v34 = vadd.f32 %v6345_v32, %v6327_v10 }
0x1737   :  { %v6290_v20 = vpop.f32.mrf.mxu3 }
0x1738   :  { %v6291_v48 = vadd.f32 %v8845_v11, %v6290_v20  ;;  %v6347_v46 = vpop.f32.mrf.mxu2 }
0x173a   :  { %v6310_v9 = vadd.f32 %v6309_v35, %v6291_v48 }
0x173b   :  { %v6314_v61 = vpop.f32.mrf.mxu0 }
0x173c   :  { %v6329_v5 = vadd.f32 %v6328_v57, %v6310_v9  ;;  %v6333_v23 = vpop.f32.mrf.mxu1 }
0x173e   :  { %v6348_v12 = vadd.f32 %v6347_v46, %v6329_v5 }
0x173f   :  { %v6293_v62 = vpop.f32.mrf.mxu3 }
0x1740   :  { %v6294_v45 = vadd.f32 %v8845_v11, %v6293_v62  ;;  %v6350_v3 = vpop.f32.mrf.mxu2 }
0x1742   :  { %v6313_v55 = vadd.f32 %v6312_v6, %v6294_v45 }
0x1743   :  { %v6383_v13 = vpop.f32.mrf.mxu0 }
0x1744   :  { %v6332_v18 = vadd.f32 %v6331_v54, %v6313_v55  ;;  %v6402_v49 = vpop.f32.mrf.mxu1 }
0x1746   :  { %v6351_v14 = vadd.f32 %v6350_v3, %v6332_v18 }
0x1747   :  { %v6295_v53 = vpop.f32.mrf.mxu3 }
0x1748   :  { %v6296_v0 = vadd.f32 %v8845_v11, %v6295_v53  ;;  %v6352_v8 = vpop.f32.mrf.mxu2 }
0x174a   :  { %v6315_v42 = vadd.f32 %v6314_v61, %v6296_v0 }
0x174b   :  { %v6385_v43 = vpop.f32.mrf.mxu0 }
0x174c   :  { %v6334_v36 = vadd.f32 %v6333_v23, %v6315_v42  ;;  %v6404_v33 = vpop.f32.mrf.mxu1 }
0x174e   :  { %v6353_v30 = vadd.f32 %v6352_v8, %v6334_v36 }
0x174f   :  { %v6364_v26 = vpop.f32.mrf.mxu3 }
0x1750   :  { %v6421_v19 = vpop.f32.mrf.mxu2  ;;  %v6365_v39 = vadd.f32 %v6364_v26, %v6346_v34 }
0x1752   :  { %v6384_v21 = vadd.f32 %v6383_v13, %v6365_v39 }
0x1753   :  { %v6388_v16 = vpop.f32.mrf.mxu0 }
0x1754   :  { %v6407_v29 = vpop.f32.mrf.mxu1  ;;  %v6403_v35 = vadd.f32 %v6402_v49, %v6384_v21 }
0x1756   :  { %v6422_v63 = vadd.f32 %v6421_v19, %v6403_v35 }
0x1757   :  { %v6366_v58 = vpop.f32.mrf.mxu3 }
0x1758   :  { %v6423_v40 = vpop.f32.mrf.mxu2  ;;  %v6367_v57 = vadd.f32 %v6366_v58, %v6348_v12 }
0x175a   :  { %v6386_v17 = vadd.f32 %v6385_v43, %v6367_v57 }
0x175b   :  { %v6390_v31 = vpop.f32.mrf.mxu0 }
0x175c   :  { %v6409_v38 = vpop.f32.mrf.mxu1  ;;  %v6405_v54 = vadd.f32 %v6404_v33, %v6386_v17 }
0x175e   :  { %v6424_v9 = vadd.f32 %v6423_v40, %v6405_v54 }
0x175f   :  { %v6369_v59 = vpop.f32.mrf.mxu3 }
0x1760   :  { %v6426_v44 = vpop.f32.mrf.mxu2  ;;  %v6370_v20 = vadd.f32 %v6369_v59, %v6351_v14 }
0x1762   :  { %v6389_v34 = vadd.f32 %v6388_v16, %v6370_v20 }
0x1763   :  { %v6459_v50 = vpop.f32.mrf.mxu0 }
0x1764   :  { %v6478_v1 = vpop.f32.mrf.mxu1  ;;  %v6408_v45 = vadd.f32 %v6407_v29, %v6389_v34 }
0x1766   :  { %v6427_v49 = vadd.f32 %v6426_v44, %v6408_v45 }
0x1767   :  { %v6371_v15 = vpop.f32.mrf.mxu3 }
0x1768   :  { %v6428_v37 = vpop.f32.mrf.mxu2  ;;  %v6372_v3 = vadd.f32 %v6371_v15, %v6353_v30 }
0x176a   :  { %v6391_v53 = vadd.f32 %v6390_v31, %v6372_v3 }
0x176b   :  { %v6461_v4 = vpop.f32.mrf.mxu0 }
0x176c   :  { %v6480_v51 = vpop.f32.mrf.mxu1  ;;  %v6410_v36 = vadd.f32 %v6409_v38, %v6391_v53 }
0x176e   :  { %v6429_v30 = vadd.f32 %v6428_v37, %v6410_v36 }
0x176f   :  { %v6440_v47 = vpop.f32.mrf.mxu3 }
0x1770   :  { %v6497_v7 = vpop.f32.mrf.mxu2  ;;  %v6441_v6 = vadd.f32 %v6440_v47, %v6422_v63 }
0x1772   :  { %v6460_v48 = vadd.f32 %v6459_v50, %v6441_v6 }
0x1773   :  { %v6464_v60 = vpop.f32.mrf.mxu0 }
0x1774   :  { %v6483_v28 = vpop.f32.mrf.mxu1  ;;  %v6479_v5 = vadd.f32 %v6478_v1, %v6460_v48 }
0x1776   :  { %v6498_v55 = vadd.f32 %v6497_v7, %v6479_v5 }
0x1777   :  { %v6442_v2 = vpop.f32.mrf.mxu3 }
0x1778   :  { %v6499_v56 = vpop.f32.mrf.mxu2  ;;  %v6443_v23 = vadd.f32 %v6442_v2, %v6424_v9 }
0x177a   :  { %v6462_v13 = vadd.f32 %v6461_v4, %v6443_v23 }
0x177b   :  { %v6466_v41 = vpop.f32.mrf.mxu0 }
0x177c   :  { %v6485_v10 = vpop.f32.mrf.mxu1  ;;  %v6481_v42 = vadd.f32 %v6480_v51, %v6462_v13 }
0x177e   :  { %v6500_v19 = vadd.f32 %v6499_v56, %v6481_v42 }
0x177f   :  { %v6445_v11 = vpop.f32.mrf.mxu3 }
0x1780   :  { %v6502_v32 = vpop.f32.mrf.mxu2  ;;  %v6446_v14 = vadd.f32 %v6445_v11, %v6427_v49 }
0x1782   :  { %v6465_v16 = vadd.f32 %v6464_v60, %v6446_v14 }
0x1783   :  { %v6535_v62 = vpop.f32.mrf.mxu0 }
0x1784   :  { %v6554_v12 = vpop.f32.mrf.mxu1  ;;  %v6484_v44 = vadd.f32 %v6483_v28, %v6465_v16 }
0x1786   :  { %v6503_v38 = vadd.f32 %v6502_v32, %v6484_v44 }
0x1787   :  { %v6447_v46 = vpop.f32.mrf.mxu3 }
0x1788   :  { %v6504_v61 = vpop.f32.mrf.mxu2  ;;  %v6448_v31 = vadd.f32 %v6447_v46, %v6429_v30 }
0x178a   :  { %v6467_v47 = vadd.f32 %v6466_v41, %v6448_v31 }
0x178b   :  { %v6537_v26 = vpop.f32.mrf.mxu0 }
0x178c   :  { %v6556_v40 = vpop.f32.mrf.mxu1  ;;  %v6486_v56 = vadd.f32 %v6485_v10, %v6467_v47  ;;  %v8846_v47 = vld [vmem:[%s11535_s12 + $0x1] ss:$0 sm:$0xff]  ;;  %s9054_s12 = smov [#allocation2]  }
0x178e   :  { %v6505_v11 = vadd.f32 %v6504_v61, %v6486_v56 }
0x178f   :  { %v6516_v18 = vpop.f32.mrf.mxu3 }
0x1790   :  { %v6517_v0 = vadd.f32 %v6516_v18, %v6498_v55  ;;  %v6573_v8 = vpop.f32.mrf.mxu2 }
0x1792   :  { %v6536_v43 = vadd.f32 %v6535_v62, %v6517_v0 }
0x1793   :  { %v6540_v39 = vpop.f32.mrf.mxu0 }
0x1794   :  { %v6555_v33 = vadd.f32 %v6554_v12, %v6536_v43  ;;  %v6559_v37 = vpop.f32.mrf.mxu1 }
0x1796   :  { %v6574_v58 = vadd.f32 %v6573_v8, %v6555_v33 }
0x1797   :  { %v6518_v29 = vpop.f32.mrf.mxu3 }
0x1798   :  { %v6583_v59 = vadd.f32 %v6574_v58, %v10812_v22  ;;  %v6519_v50 = vadd.f32 %v6518_v29, %v6500_v19  ;;  %v6575_v1 = vpop.f32.mrf.mxu2 }
0x179a   :  { %v6538_v15 = vadd.f32 %v6537_v26, %v6519_v50  ;;  %v6591_v4 = vsel %vm79_vm0, %v6583_v59, 0.0 }
0x179b   :  { %6592 = vadd.xlane.f32.xlu1 %v6591_v4  ;;  %v6542_v6 = vpop.f32.mrf.mxu0 }
0x179c   :  { %v6557_v51 = vadd.f32 %v6556_v40, %v6538_v15 }
0x179e   :  { %v6576_v7 = vadd.f32 %v6575_v1, %v6557_v51 }
0x179f   :  { %v6521_v60 = vpop.f32.mrf.mxu3 }
0x17a0   :  { %v6584_v2 = vadd.f32 %v6576_v7, %v10814_v25  ;;  %v6522_v21 = vadd.f32 %v6521_v60, %v6503_v38  ;;  %v6578_v28 = vpop.f32.mrf.mxu2  ;;  %v6561_v25 = vpop.f32.mrf.mxu1 }
0x17a2   :  { %v6541_v22 = vadd.f32 %v6540_v39, %v6522_v21  ;;  %v6594_v35 = vsel %vm79_vm0, %v6584_v2, 0.0 }
0x17a3   :  { %6595 = vadd.xlane.f32.xlu0 %v6594_v35  ;;  %v8848_v35 = vld [vmem:[%s11537_s14] ss:$0 sm:$0xff] }
0x17a4   :  { %v6560_v57 = vadd.f32 %v6559_v37, %v6541_v22 }
0x17a6   :  { %v6579_v63 = vadd.f32 %v6578_v28, %v6560_v57 }
0x17a7   :  { %v6523_v17 = vpop.f32.mrf.mxu3 }
0x17a8   :  { %v6585_v32 = vadd.f32 %v6579_v63, %v10833_v52  ;;  %v6524_v41 = vadd.f32 %v6523_v17, %v6505_v11  ;;  %v6580_v10 = vpop.f32.mrf.mxu2 }
0x17aa   :  { %v6543_v54 = vadd.f32 %v6542_v6, %v6524_v41  ;;  %v6597_v20 = vsel %vm79_vm0, %v6585_v32, 0.0 }
0x17ab   :  { %6598 = vadd.xlane.f32.xlu2 %v6597_v20 }
0x17ac   :  { %v6562_v48 = vadd.f32 %v6561_v25, %v6543_v54 }
0x17ae   :  { %v6581_v46 = vadd.f32 %v6580_v10, %v6562_v48 }
0x17b0   :  { %v6586_v9 = vadd.f32 %v6581_v46, %v10835_v27 }
0x17b2   :  { %v6600_v34 = vsel %vm79_vm0, %v6586_v9, 0.0 }
0x17b3   :  { %6601 = vadd.xlane.f32.xlu1 %v6600_v34 }
0x180e   :  { %v6593_v61 = vpop.xlane.xlu1 %6592 }
0x180f   :  { %v6603_v5 = vmul.f32 %v6593_v61, %v9478_v24 }
0x1811   :  { %v6607_v23 = vsub.f32 %v6583_v59, %v6603_v5 }
0x1813   :  { %v6611_v52 = vmul.f32 %v6607_v23, %v6607_v23 }
0x1815   :  { %v6615_v62 = vsel %vm79_vm0, %v6611_v52, 0.0 }
0x1816   :  { %v6596_v45 = vpop.xlane.xlu0 %6595  ;;  %6616 = vadd.xlane.f32.xlu0 %v6615_v62 }
0x1817   :  { %v6604_v3 = vmul.f32 %v6596_v45, %v9478_v24 }
0x1819   :  { %v11483_v12 = vsub.f32 %v6584_v2, %v6604_v3  ;;  %v8847_v2 = vld [vmem:[%s11536_s13 + $0x1] ss:$0 sm:$0xff]  ;;  %s6737_s13 = sshll.u32 %s9054_s12, 4  ;;  %s6738_s13 = int_to_ptr.vmem [resolvable:$true] %s6737_s13 }
0x181b   :  { %v6612_v55 = vmul.f32 %v11483_v12, %v11483_v12 }
0x181d   :  { %v6618_v27 = vsel %vm79_vm0, %v6612_v55, 0.0 }
0x181e   :  { %6619 = vadd.xlane.f32.xlu2 %v6618_v27  ;;  %v6599_v13 = vpop.xlane.xlu2 %6598 }
0x181f   :  { %v6605_v18 = vmul.f32 %v6599_v13, %v9478_v24 }
0x1821   :  { %v11489_v49 = vsub.f32 %v6585_v32, %v6605_v18 }
0x1823   :  { %v6613_v53 = vmul.f32 %v11489_v49, %v11489_v49 }
0x1825   :  { %v6621_v0 = vsel %vm79_vm0, %v6613_v53, 0.0 }
0x1826   :  { %v6602_v8 = vpop.xlane.xlu1 %6601  ;;  %6622 = vadd.xlane.f32.xlu1 %v6621_v0 }
0x1827   :  { %v6606_v42 = vmul.f32 %v6602_v8, %v9478_v24 }
0x1829   :  { %v11495_v14 = vsub.f32 %v6586_v9, %v6606_v42 }
0x182b   :  { %v6614_v43 = vmul.f32 %v11495_v14, %v11495_v14 }
0x182d   :  { %v6624_v36 = vsel %vm79_vm0, %v6614_v43, 0.0 }
0x182e   :  { %6625 = vadd.xlane.f32.xlu0 %v6624_v36 }
0x1889   :  { %v6617_v33 = vpop.xlane.xlu0 %6616 }
0x188a   :  { %v6627_v26 = vmul.f32 %v6617_v33, %v9478_v24  ;;  %v6717_v33 = vlaneseq }
0x188c   :  { %v6631_v19 = vadd.f32 1e-05, %v6627_v26 }
0x188e   :  { %9003 = vrsqrt.f32 %v6631_v19  ;;  %vm6641_vm13 = vweird.f32 %v6631_v19 }
0x1891   :  { %v6620_v16 = vpop.xlane.xlu2 %6619 }
0x1892   :  { %v6628_v58 = vmul.f32 %v6620_v16, %v9478_v24  ;;  %v6718_v16 = vand.u32 127, %v6717_v33 }
0x1894   :  { %v9004_v40 = vpop.eup %9003  ;;  %v6632_v29 = vadd.f32 1e-05, %v6628_v58 }
0x1895   :  { %v6636_v30 = vmul.f32 %v9004_v40, %v6631_v19  ;;  %vm6642_vm12 = vweird.f32 %v9004_v40 }
0x1896   :  { %9005 = vrsqrt.f32 %v6632_v29  ;;  %vm6643_vm14 = vmor %vm6641_vm13, %vm6642_vm12  ;;  %vm6651_vm2 = vweird.f32 %v6632_v29 }
0x1897   :  { %v6637_v59 = vmul.f32 %v9004_v40, %v6636_v30 }
0x1899   :  { %v6638_v50 = vmul.f32 0.5, %v6637_v59  ;;  %v6623_v1 = vpop.xlane.xlu1 %6622 }
0x189a   :  { %v6629_v44 = vmul.f32 %v6623_v1, %v9478_v24 }
0x189b   :  { %v6639_v31 = vsub.f32 1.5, %v6638_v50 }
0x189c   :  { %v9006_v15 = vpop.eup %9005  ;;  %v6633_v4 = vadd.f32 1e-05, %v6629_v44 }
0x189d   :  { %v6640_v51 = vmul.f32 %v9004_v40, %v6639_v31  ;;  %v6646_v38 = vmul.f32 %v9006_v15, %v6632_v29  ;;  %vm6652_vm1 = vweird.f32 %v9006_v15 }
0x189e   :  { %9007 = vrsqrt.f32 %v6633_v4  ;;  %vm6653_vm15 = vmor %vm6651_vm2, %vm6652_vm1  ;;  %vm6661_vm4 = vweird.f32 %v6633_v4 }
0x189f   :  { %v6644_v7 = vsel %vm6643_vm14, %v9004_v40, %v6640_v51  ;;  %v6647_v39 = vmul.f32 %v9006_v15, %v6646_v38 }
0x18a0   :  { %v6675_v60 = vmul.f32 %v6644_v7, %v6607_v23 }
0x18a1   :  { %v6648_v21 = vmul.f32 0.5, %v6647_v39  ;;  %v6626_v37 = vpop.xlane.xlu0 %6625 }
0x18a2   :  { %v6630_v56 = vmul.f32 %v6626_v37, %v9478_v24  ;;  %v6682_v22 = vmul.f32 %v8846_v47, %v6675_v60 }
0x18a3   :  { %v6649_v28 = vsub.f32 1.5, %v6648_v21 }
0x18a4   :  { %v9008_v57 = vpop.eup %9007  ;;  %v6634_v11 = vadd.f32 1e-05, %v6630_v56  ;;  %v6689_v63 = vadd.f32 %v8847_v2, %v6682_v22 }
0x18a5   :  { %v6650_v17 = vmul.f32 %v9006_v15, %v6649_v28  ;;  %v6656_v32 = vmul.f32 %v9008_v57, %v6633_v4  ;;  %vm6662_vm3 = vweird.f32 %v9008_v57 }
0x18a6   :  { %9009 = vrsqrt.f32 %v6634_v11  ;;  %v6697_v41 = vmul.f32 %v8848_v35, %v6689_v63  ;;  %vm6663_vm5 = vmor %vm6661_vm4, %vm6662_vm3  ;;  %vm6671_vm7 = vweird.f32 %v6634_v11 }
0x18a7   :  { %v6654_v6 = vsel %vm6653_vm15, %v9006_v15, %v6650_v17  ;;  %v6657_v54 = vmul.f32 %v9008_v57, %v6656_v32 }
0x18a8   :  { %v6701_v24 = vsel %vm79_vm0, %v6697_v41, 0.0  ;;  %v6676_v20 = vmul.f32 %v6654_v6, %v11483_v12 }
0x18a9   :  { %v6658_v25 = vmul.f32 0.5, %v6657_v54  ;;  %6702 = vadd.xlane.f32.xlu2 %v6701_v24 }
0x18aa   :  { %v6683_v48 = vmul.f32 %v8846_v47, %v6676_v20 }
0x18ab   :  { %v6659_v10 = vsub.f32 1.5, %v6658_v25 }
0x18ac   :  { %v9010_v46 = vpop.eup %9009  ;;  %v6690_v9 = vadd.f32 %v8847_v2, %v6683_v48 }
0x18ad   :  { %v6660_v34 = vmul.f32 %v9008_v57, %v6659_v10  ;;  %v6666_v61 = vmul.f32 %v9010_v46, %v6634_v11  ;;  %vm6672_vm6 = vweird.f32 %v9010_v46 }
0x18ae   :  { %v6698_v5 = vmul.f32 %v8848_v35, %v6690_v9  ;;  %vm6673_vm8 = vmor %vm6671_vm7, %vm6672_vm6 }
0x18af   :  { %v6664_v23 = vsel %vm6663_vm5, %v9008_v57, %v6660_v34  ;;  %v6667_v52 = vmul.f32 %v9010_v46, %v6666_v61 }
0x18b0   :  { %v6704_v62 = vsel %vm79_vm0, %v6698_v5, 0.0  ;;  %v6677_v45 = vmul.f32 %v6664_v23, %v11489_v49 }
0x18b1   :  { %v6668_v3 = vmul.f32 0.5, %v6667_v52  ;;  %6705 = vadd.xlane.f32.xlu1 %v6704_v62 }
0x18b2   :  { %v6684_v12 = vmul.f32 %v8846_v47, %v6677_v45 }
0x18b3   :  { %v6669_v55 = vsub.f32 1.5, %v6668_v3 }
0x18b4   :  { %v6691_v27 = vadd.f32 %v8847_v2, %v6684_v12 }
0x18b5   :  { %v6670_v13 = vmul.f32 %v9010_v46, %v6669_v55 }
0x18b6   :  { %v6699_v18 = vmul.f32 %v8848_v35, %v6691_v27 }
0x18b7   :  { %v6674_v53 = vsel %vm6673_vm8, %v9010_v46, %v6670_v13 }
0x18b8   :  { %v6707_v0 = vsel %vm79_vm0, %v6699_v18, 0.0  ;;  %v6678_v8 = vmul.f32 %v6674_v53, %v11495_v14 }
0x18b9   :  { %6708 = vadd.xlane.f32.xlu0 %v6707_v0 }
0x18ba   :  { %v6685_v42 = vmul.f32 %v8846_v47, %v6678_v8 }
0x18bc   :  { %v6692_v43 = vadd.f32 %v8847_v2, %v6685_v42 }
0x18be   :  { %v6700_v36 = vmul.f32 %v8848_v35, %v6692_v43 }
0x18c0   :  { %v6710_v49 = vsel %vm79_vm0, %v6700_v36, 0.0  ;;  %vm6730_vm0 = vcmask 60416  }
0x18c1   :  { %6711 = vadd.xlane.f32.xlu2 %v6710_v49 }
0x191c   :  { %v6703_v26 = vpop.xlane.xlu2 %6702 }
0x191d   :  { %v6719_v30 = vperm.slane %v6703_v26, %v6718_v16 }
0x1924   :  { %v6706_v19 = vpop.xlane.xlu1 %6705 }
0x1925   :  { %v6720_v40 = vperm.slane %v6706_v19, %v6718_v16 }
0x1927   :  { %v6724_v59 = vsel %vm6723_vm9, %v6720_v40, %v6719_v30 }
0x192c   :  { %v6709_v58 = vpop.xlane.xlu0 %6708 }
0x192d   :  { %v6721_v29 = vperm.slane %v6709_v58, %v6718_v16 }
0x192f   :  { %v6726_v1 = vsel %vm6725_vm10, %v6721_v29, %v6724_v59 }
0x1934   :  { %v6712_v14 = vpop.xlane.xlu2 %6711 }
0x1935   :  { %v6722_v50 = vperm.slane %v6712_v14, %v6718_v16 }
0x1937   :  { %v6728_v44 = vsel %vm6727_vm11, %v6722_v50, %v6726_v1 }
0x1938   :  { %6731 = vst.msk [vmem:[#allocation2] sm:$0xf] %vm6730_vm0, %v6728_v44 }
0x1939   :  { %6742 = dma.vmem_to_hbm [thread:$0]  %s6738_s13, 64, %s6740_s5, [#allocation3]  }
0x193a   :  { %9040 = dma.done.wait [#allocation3], 64  }
0x193b   :  { %9041 = vsyncadd [#allocation3], 4294967232 }
0x193c   :  { %6747 = vsyncpa [#allocation3], 1 }

</bundles_post_ra>
